<compile_context>
chip_gen: v7x
topology: tpu7x:2x2x1
jax: 0.10.0
libtpu: 0.0.40
codegen_flags: <defaults>
</compile_context>

<pallas_src>
import jax
import jax.numpy as jnp
from jax import lax
from jax.experimental import pallas as pl
from jax.experimental.pallas import tpu as pltpu


# ----------------------------- Pallas kernels ------------------------------ #

def _conv_bn_relu_pool_kernel(p0_ref, p1_ref, p2_ref, p3_ref, w_ref, shift_ref,
                              o_ref):
    """Fused conv (as 4 corner GEMMs) + folded BN + ReLU + 2x2 max-pool.

    Each p*_ref holds the im2col patches of one pool-window corner, rows
    ordered (b, pooled_h, pooled_w), K ordered (kh, kw, cin).  BN scale is
    already folded into w_ref; shift_ref is the folded bias/beta term.
    """
    w = w_ref[...]
    s = shift_ref[...]

    def corner(p_ref):
        y = jnp.dot(p_ref[...], w, preferred_element_type=jnp.float32) + s
        return jnp.maximum(y, 0.0)

    pooled = jnp.maximum(jnp.maximum(corner(p0_ref), corner(p1_ref)),
                         jnp.maximum(corner(p2_ref), corner(p3_ref)))
    o_ref[...] = pooled.astype(o_ref.dtype)


def _fc_fused_kernel(x_ref, w1_ref, b1_ref, w2_ref, b2_ref, w3_ref, b3_ref,
                     o_ref):
    """fc1+ReLU -> fc2+ReLU -> fc3 in one kernel; h1/h2 never leave VMEM."""
    h1 = jnp.maximum(
        jnp.dot(x_ref[...], w1_ref[...], preferred_element_type=jnp.float32)
        + b1_ref[...], 0.0)
    h2 = jnp.maximum(
        jnp.dot(h1, w2_ref[...], preferred_element_type=jnp.float32)
        + b2_ref[...], 0.0)
    out = jnp.dot(h2, w3_ref[...], preferred_element_type=jnp.float32) + b3_ref[...]
    o_ref[...] = out.astype(o_ref.dtype)


# ------------------------------ Kernel wrappers ----------------------------- #

def _corner_patches(x_nhwc, dh, dw):
    """im2col patches (3x3, pad 1) for pool-window corner (dh, dw).

    x_nhwc: [B, H, W, C] (H, W even). Returns [B*(H//2)*(W//2), 9*C] with
    rows ordered (b, pooled_h, pooled_w) and K ordered (kh, kw, cin).
    """
    B, H, W, C = x_nhwc.shape
    Ho, Wo = H // 2, W // 2
    xp = jnp.pad(x_nhwc, ((0, 0), (1, 1), (1, 1), (0, 0)))
    cols = [xp[:, dh + kh:dh + kh + 2 * Ho:2, dw + kw:dw + kw + 2 * Wo:2, :]
            for kh in range(3) for kw in range(3)]
    p = jnp.concatenate(cols, axis=-1)            # [B, Ho, Wo, 9*C]
    return p.reshape(B * Ho * Wo, 9 * C)


def conv_bn_relu_pool(x_nhwc, w_folded, shift):
    """3x3/pad1 conv + eval-mode BN + ReLU + 2x2 max-pool, fused. NHWC in/out."""
    B, H, W, _ = x_nhwc.shape
    Ho, Wo = H // 2, W // 2
    K, Cout = w_folded.shape
    M = B * Ho * Wo

    patches = [_corner_patches(x_nhwc, dh, dw) for dh in (0, 1) for dw in (0, 1)]

    # 2-way row split (parallel grid) so v7x's two TensorCores both get work on
    # the larger conv; small convs use one full-array block.
    if M >= 256:
        tm = (((M + 1) // 2) + 7) // 8 * 8
    else:
        tm = M
    grid = (pl.cdiv(M, tm),)

    patch_spec = pl.BlockSpec((tm, K), lambda i: (i, 0))
    out = pl.pallas_call(
        _conv_bn_relu_pool_kernel,
        out_shape=jax.ShapeDtypeStruct((M, Cout), x_nhwc.dtype),
        grid_spec=pltpu.PrefetchScalarGridSpec(
            num_scalar_prefetch=0,
            grid=grid,
            in_specs=[patch_spec, patch_spec, patch_spec, patch_spec,
                      pl.BlockSpec((K, Cout), lambda i: (0, 0)),
                      pl.BlockSpec((1, Cout), lambda i: (0, 0))],
            out_specs=pl.BlockSpec((tm, Cout), lambda i: (i, 0)),
        ),
        compiler_params=pltpu.CompilerParams(
            dimension_semantics=("parallel",)),
    )(*patches, w_folded, shift)
    return out.reshape(B, Ho, Wo, Cout)


def fc_fused(flat, w1, b1, w2, b2, w3, b3):
    """All three FC layers in one pallas_call; weights total <0.5 MB (fits VMEM)."""
    B = flat.shape[0]
    n_out = w3.shape[1]

    def full(shape):
        return pl.BlockSpec(shape, lambda i: (0,) * len(shape))

    return pl.pallas_call(
        _fc_fused_kernel,
        out_shape=jax.ShapeDtypeStruct((B, n_out), flat.dtype),
        grid_spec=pltpu.PrefetchScalarGridSpec(
            num_scalar_prefetch=0,
            grid=(1,),
            in_specs=[full(flat.shape), full(w1.shape), full(b1.shape),
                      full(w2.shape), full(b2.shape), full(w3.shape),
                      full(b3.shape)],
            out_specs=full((B, n_out)),
        ),
    )(flat, w1, b1, w2, b2, w3, b3)


# ------------------------ One-time parameter preparation -------------------- #

def _fold_conv_bn(conv_w, conv_b, gamma, beta, mean, var, eps=1e-5):
    """OIHW conv weight -> [9*Cin, Cout] GEMM weight with BN scale folded in."""
    cout = conv_w.shape[0]
    scale = gamma / jnp.sqrt(var + eps)                         # [Cout]
    w_hwio = jnp.transpose(conv_w, (2, 3, 1, 0)).reshape(-1, cout)  # (kh,kw,cin) x cout
    w_folded = w_hwio * scale[None, :]
    shift = (conv_b - mean) * scale + beta
    return w_folded, shift.reshape(1, cout)


def prepare_params(p, eps=1e-5):
    """One-time transform of PyTorch-layout params into kernel-ready form."""
    w1, s1 = _fold_conv_bn(p["conv1_w"], p["conv1_b"], p["bn1_gamma"],
                           p["bn1_beta"], p["bn1_mean"], p["bn1_var"], eps)
    w2, s2 = _fold_conv_bn(p["conv2_w"], p["conv2_b"], p["bn2_gamma"],
                           p["bn2_beta"], p["bn2_mean"], p["bn2_var"], eps)
    # fc1 columns are ordered (c, h, w) in PyTorch's x.view(B, -1); permute them
    # to (h, w, c) to match our channels-last flatten, and pre-transpose to [in, out].
    fc1_w = (p["fc1_w"].reshape(120, 16, 7, 7)
             .transpose(0, 2, 3, 1).reshape(120, 7 * 7 * 16).T)
    return {
        "w1": w1, "shift1": s1,
        "w2": w2, "shift2": s2,
        "fc1_w": fc1_w, "fc1_b": p["fc1_b"].reshape(1, -1),
        "fc2_w": p["fc2_w"].T, "fc2_b": p["fc2_b"].reshape(1, -1),
        "fc3_w": p["fc3_w"].T, "fc3_b": p["fc3_b"].reshape(1, -1),
    }


# ---------------------------------- Forward --------------------------------- #

def weight_decay_lenet_forward(x_nchw, prep):
    B = x_nchw.shape[0]
    x = jnp.transpose(x_nchw, (0, 2, 3, 1))                    # one-time NCHW->NHWC
    y = conv_bn_relu_pool(x, prep["w1"], prep["shift1"])       # [B, 14, 14, 6]
    y = conv_bn_relu_pool(y, prep["w2"], prep["shift2"])       # [B, 7, 7, 16]
    flat = y.reshape(B, -1)                                    # (h, w, c) ordering
    return fc_fused(flat, prep["fc1_w"], prep["fc1_b"],
                    prep["fc2_w"], prep["fc2_b"],
                    prep["fc3_w"], prep["fc3_b"])


# --------------------------- Deterministic params --------------------------- #

def init_params(key, num_classes=10):
    ks = jax.random.split(key, 20)
    f32 = jnp.float32
    return {
        "conv1_w": 0.2 * jax.random.normal(ks[0], (6, 1, 3, 3), f32),
        "conv1_b": 0.1 * jax.random.normal(ks[1], (6,), f32),
        "bn1_gamma": 1.0 + 0.1 * jax.random.normal(ks[2], (6,), f32),
        "bn1_beta": 0.1 * jax.random.normal(ks[3], (6,), f32),
        "bn1_mean": 0.05 * jax.random.normal(ks[4], (6,), f32),
        "bn1_var": 1.0 + 0.1 * jax.random.uniform(ks[5], (6,), f32),
        "conv2_w": 0.2 * jax.random.normal(ks[6], (16, 6, 3, 3), f32),
        "conv2_b": 0.1 * jax.random.normal(ks[7], (16,), f32),
        "bn2_gamma": 1.0 + 0.1 * jax.random.normal(ks[8], (16,), f32),
        "bn2_beta": 0.1 * jax.random.normal(ks[9], (16,), f32),
        "bn2_mean": 0.05 * jax.random.normal(ks[10], (16,), f32),
        "bn2_var": 1.0 + 0.1 * jax.random.uniform(ks[11], (16,), f32),
        "fc1_w": 0.05 * jax.random.normal(ks[12], (120, 16 * 7 * 7), f32),
        "fc1_b": 0.05 * jax.random.normal(ks[13], (120,), f32),
        "fc2_w": 0.05 * jax.random.normal(ks[14], (84, 120), f32),
        "fc2_b": 0.05 * jax.random.normal(ks[15], (84,), f32),
        "fc3_w": 0.05 * jax.random.normal(ks[16], (num_classes, 84), f32),
        "fc3_b": 0.05 * jax.random.normal(ks[17], (num_classes,), f32),
    }


# ------------------------------ Pure-JAX reference --------------------------- #

def reference_forward(x, p, eps=1e-5):
    def conv(x, w, b):
        y = lax.conv_general_dilated(x, w, (1, 1), ((1, 1), (1, 1)),
                                     dimension_numbers=("NCHW", "OIHW", "NCHW"))
        return y + b.reshape(1, -1, 1, 1)

    def bn(x, g, bta, m, v):
        r = lambda a: a.reshape(1, -1, 1, 1)
        return (x - r(m)) / jnp.sqrt(r(v) + eps) * r(g) + r(bta)

    def pool(x):
        return lax.reduce_window(x, -jnp.inf, lax.max,
                                 (1, 1, 2, 2), (1, 1, 2, 2), "VALID")

    y = jax.nn.relu(bn(conv(x, p["conv1_w"], p["conv1_b"]),
                       p["bn1_gamma"], p["bn1_beta"], p["bn1_mean"], p["bn1_var"]))
    y = pool(y)
    y = jax.nn.relu(bn(conv(y, p["conv2_w"], p["conv2_b"]),
                       p["bn2_gamma"], p["bn2_beta"], p["bn2_mean"], p["bn2_var"]))
    y = pool(y)
    f = y.reshape(y.shape[0], -1)
    h1 = jax.nn.relu(f @ p["fc1_w"].T + p["fc1_b"])
    h2 = jax.nn.relu(h1 @ p["fc2_w"].T + p["fc2_b"])
    return h2 @ p["fc3_w"].T + p["fc3_b"]


# ----------------------------------- main ------------------------------------ #

if __name__ == "__main__":
    key = jax.random.PRNGKey(0)
    kx, kp = jax.random.split(key)
    # LeNet-with-padding geometry implies 28x28 inputs (28 -> 14 -> 7 => 16*7*7 fc1).
    x = jax.random.normal(kx, (2, 1, 28, 28), jnp.float32)
    params = init_params(kp, num_classes=10)
    prep = prepare_params(params)                 # one-time param transform

    forward = jax.jit(weight_decay_lenet_forward)
    out = jax.block_until_ready(forward(x, prep))
    assert out.shape == (2, 10), out.shape

    ref = jax.block_until_ready(reference_forward(x, params))
    if not jnp.allclose(out, ref, rtol=2e-2, atol=2e-2):
        raise AssertionError(
            f"mismatch vs reference: max abs err {jnp.max(jnp.abs(out - ref))}")

    print("KERNEL_OK")
</pallas_src>

<mosaic_0001>
module attributes {stable_mosaic.version = 11 : i64} {
  func.func @_conv_bn_relu_pool_kernel(%arg0: i32, %arg1: memref<200x9xf32, #tpu.memory_space<vmem>>, %arg2: memref<200x9xf32, #tpu.memory_space<vmem>>, %arg3: memref<200x9xf32, #tpu.memory_space<vmem>>, %arg4: memref<200x9xf32, #tpu.memory_space<vmem>>, %arg5: memref<9x6xf32, #tpu.memory_space<vmem>>, %arg6: memref<1x6xf32, #tpu.memory_space<vmem>>, %arg7: memref<200x6xf32, #tpu.memory_space<vmem>>) attributes {dimension_semantics = [#tpu.dimension_semantics<parallel>], iteration_bounds = array<i64: 2>, scalar_prefetch = 0 : i64, scratch_operands = 0 : i64, tpu.core_type = #tpu.core_type<tc>, window_params = [{transform_indices = @transform_0, window_bounds = array<i64: 200, 9>}, {transform_indices = @transform_1, window_bounds = array<i64: 200, 9>}, {transform_indices = @transform_2, window_bounds = array<i64: 200, 9>}, {transform_indices = @transform_3, window_bounds = array<i64: 200, 9>}, {pipeline_mode = #tpu.pipeline_mode<synchronous>, transform_indices = @transform_4, window_bounds = array<i64: 9, 6>}, {pipeline_mode = #tpu.pipeline_mode<synchronous>, transform_indices = @transform_5, window_bounds = array<i64: 1, 6>}, {transform_indices = @transform_6, window_bounds = array<i64: 200, 6>}]} {
    %c0 = arith.constant 0 : index
    %c0_0 = arith.constant 0 : index
    %0 = vector.load %arg5[%c0, %c0_0] : memref<9x6xf32, #tpu.memory_space<vmem>>, vector<9x6xf32>
    %c0_1 = arith.constant 0 : index
    %c0_2 = arith.constant 0 : index
    %1 = vector.load %arg6[%c0_1, %c0_2] : memref<1x6xf32, #tpu.memory_space<vmem>>, vector<1x6xf32>
    %c0_3 = arith.constant 0 : index
    %c0_4 = arith.constant 0 : index
    %2 = vector.load %arg1[%c0_3, %c0_4] : memref<200x9xf32, #tpu.memory_space<vmem>>, vector<200x9xf32>
    %cst = arith.constant dense<0.000000e+00> : vector<200x6xf32>
    %3 = tpu.matmul %2, %0, %cst {dimension_numbers = #tpu.dot_dimension_numbers<[1], [0], [0], [1], [0, 0, 1, 1], [], []>} : vector<200x9xf32>, vector<9x6xf32>, vector<200x6xf32> -> vector<200x6xf32>
    %4 = vector.broadcast %1 : vector<1x6xf32> to vector<200x6xf32>
    %5 = arith.addf %3, %4 : vector<200x6xf32>
    %cst_5 = arith.constant 0.000000e+00 : f32
    %6 = vector.broadcast %cst_5 : f32 to vector<200x6xf32>
    %7 = arith.maximumf %5, %6 : vector<200x6xf32>
    %c0_6 = arith.constant 0 : index
    %c0_7 = arith.constant 0 : index
    %8 = vector.load %arg2[%c0_6, %c0_7] : memref<200x9xf32, #tpu.memory_space<vmem>>, vector<200x9xf32>
    %cst_8 = arith.constant dense<0.000000e+00> : vector<200x6xf32>
    %9 = tpu.matmul %8, %0, %cst_8 {dimension_numbers = #tpu.dot_dimension_numbers<[1], [0], [0], [1], [0, 0, 1, 1], [], []>} : vector<200x9xf32>, vector<9x6xf32>, vector<200x6xf32> -> vector<200x6xf32>
    %10 = vector.broadcast %1 : vector<1x6xf32> to vector<200x6xf32>
    %11 = arith.addf %9, %10 : vector<200x6xf32>
    %cst_9 = arith.constant 0.000000e+00 : f32
    %12 = vector.broadcast %cst_9 : f32 to vector<200x6xf32>
    %13 = arith.maximumf %11, %12 : vector<200x6xf32>
    %14 = arith.maximumf %7, %13 : vector<200x6xf32>
    %c0_10 = arith.constant 0 : index
    %c0_11 = arith.constant 0 : index
    %15 = vector.load %arg3[%c0_10, %c0_11] : memref<200x9xf32, #tpu.memory_space<vmem>>, vector<200x9xf32>
    %cst_12 = arith.constant dense<0.000000e+00> : vector<200x6xf32>
    %16 = tpu.matmul %15, %0, %cst_12 {dimension_numbers = #tpu.dot_dimension_numbers<[1], [0], [0], [1], [0, 0, 1, 1], [], []>} : vector<200x9xf32>, vector<9x6xf32>, vector<200x6xf32> -> vector<200x6xf32>
    %17 = vector.broadcast %1 : vector<1x6xf32> to vector<200x6xf32>
    %18 = arith.addf %16, %17 : vector<200x6xf32>
    %cst_13 = arith.constant 0.000000e+00 : f32
    %19 = vector.broadcast %cst_13 : f32 to vector<200x6xf32>
    %20 = arith.maximumf %18, %19 : vector<200x6xf32>
    %c0_14 = arith.constant 0 : index
    %c0_15 = arith.constant 0 : index
    %21 = vector.load %arg4[%c0_14, %c0_15] : memref<200x9xf32, #tpu.memory_space<vmem>>, vector<200x9xf32>
    %cst_16 = arith.constant dense<0.000000e+00> : vector<200x6xf32>
    %22 = tpu.matmul %21, %0, %cst_16 {dimension_numbers = #tpu.dot_dimension_numbers<[1], [0], [0], [1], [0, 0, 1, 1], [], []>} : vector<200x9xf32>, vector<9x6xf32>, vector<200x6xf32> -> vector<200x6xf32>
    %23 = vector.broadcast %1 : vector<1x6xf32> to vector<200x6xf32>
    %24 = arith.addf %22, %23 : vector<200x6xf32>
    %cst_17 = arith.constant 0.000000e+00 : f32
    %25 = vector.broadcast %cst_17 : f32 to vector<200x6xf32>
    %26 = arith.maximumf %24, %25 : vector<200x6xf32>
    %27 = arith.maximumf %20, %26 : vector<200x6xf32>
    %28 = arith.maximumf %14, %27 : vector<200x6xf32>
    %c0_18 = arith.constant 0 : index
    %c0_19 = arith.constant 0 : index
    %29 = vector.load %arg7[%c0_18, %c0_19] : memref<200x6xf32, #tpu.memory_space<vmem>>, vector<200x6xf32>
    tpu.vector_store %arg7[%c0_18, %c0_19], %28 {strides = array<i32>} : memref<200x6xf32, #tpu.memory_space<vmem>>, vector<200x6xf32>,
    return
  }
  func.func @transform_0(%arg0: i32) -> (i32, i32) {
    %c0_i32 = arith.constant 0 : i32
    %c0_i32_0 = arith.constant 0 : i32
    return %arg0, %c0_i32 : i32, i32
  }
  func.func @transform_1(%arg0: i32) -> (i32, i32) {
    %c0_i32 = arith.constant 0 : i32
    %c0_i32_0 = arith.constant 0 : i32
    return %arg0, %c0_i32 : i32, i32
  }
  func.func @transform_2(%arg0: i32) -> (i32, i32) {
    %c0_i32 = arith.constant 0 : i32
    %c0_i32_0 = arith.constant 0 : i32
    return %arg0, %c0_i32 : i32, i32
  }
  func.func @transform_3(%arg0: i32) -> (i32, i32) {
    %c0_i32 = arith.constant 0 : i32
    %c0_i32_0 = arith.constant 0 : i32
    return %arg0, %c0_i32 : i32, i32
  }
  func.func @transform_4(%arg0: i32) -> (i32, i32) {
    %c0_i32 = arith.constant 0 : i32
    %c0_i32_0 = arith.constant 0 : i32
    %c0_i32_1 = arith.constant 0 : i32
    return %c0_i32, %c0_i32_0 : i32, i32
  }
  func.func @transform_5(%arg0: i32) -> (i32, i32) {
    %c0_i32 = arith.constant 0 : i32
    %c0_i32_0 = arith.constant 0 : i32
    %c0_i32_1 = arith.constant 0 : i32
    return %c0_i32, %c0_i32_0 : i32, i32
  }
  func.func @transform_6(%arg0: i32) -> (i32, i32) {
    %c0_i32 = arith.constant 0 : i32
    %c0_i32_0 = arith.constant 0 : i32
    return %arg0, %c0_i32 : i32, i32
  }
}

module attributes {stable_mosaic.version = 11 : i64} {
  func.func @_conv_bn_relu_pool_kernel(%arg0: i32, %arg1: memref<98x54xf32, #tpu.memory_space<vmem>>, %arg2: memref<98x54xf32, #tpu.memory_space<vmem>>, %arg3: memref<98x54xf32, #tpu.memory_space<vmem>>, %arg4: memref<98x54xf32, #tpu.memory_space<vmem>>, %arg5: memref<54x16xf32, #tpu.memory_space<vmem>>, %arg6: memref<1x16xf32, #tpu.memory_space<vmem>>, %arg7: memref<98x16xf32, #tpu.memory_space<vmem>>) attributes {dimension_semantics = [#tpu.dimension_semantics<parallel>], iteration_bounds = array<i64: 1>, scalar_prefetch = 0 : i64, scratch_operands = 0 : i64, tpu.core_type = #tpu.core_type<tc>, window_params = [{transform_indices = @transform_0, window_bounds = array<i64: 98, 54>}, {transform_indices = @transform_1, window_bounds = array<i64: 98, 54>}, {transform_indices = @transform_2, window_bounds = array<i64: 98, 54>}, {transform_indices = @transform_3, window_bounds = array<i64: 98, 54>}, {pipeline_mode = #tpu.pipeline_mode<synchronous>, transform_indices = @transform_4, window_bounds = array<i64: 54, 16>}, {pipeline_mode = #tpu.pipeline_mode<synchronous>, transform_indices = @transform_5, window_bounds = array<i64: 1, 16>}, {transform_indices = @transform_6, window_bounds = array<i64: 98, 16>}]} {
    %c0 = arith.constant 0 : index
    %c0_0 = arith.constant 0 : index
    %0 = vector.load %arg5[%c0, %c0_0] : memref<54x16xf32, #tpu.memory_space<vmem>>, vector<54x16xf32>
    %c0_1 = arith.constant 0 : index
    %c0_2 = arith.constant 0 : index
    %1 = vector.load %arg6[%c0_1, %c0_2] : memref<1x16xf32, #tpu.memory_space<vmem>>, vector<1x16xf32>
    %c0_3 = arith.constant 0 : index
    %c0_4 = arith.constant 0 : index
    %2 = vector.load %arg1[%c0_3, %c0_4] : memref<98x54xf32, #tpu.memory_space<vmem>>, vector<98x54xf32>
    %cst = arith.constant dense<0.000000e+00> : vector<98x16xf32>
    %3 = tpu.matmul %2, %0, %cst {dimension_numbers = #tpu.dot_dimension_numbers<[1], [0], [0], [1], [0, 0, 1, 1], [], []>} : vector<98x54xf32>, vector<54x16xf32>, vector<98x16xf32> -> vector<98x16xf32>
    %4 = vector.broadcast %1 : vector<1x16xf32> to vector<98x16xf32>
    %5 = arith.addf %3, %4 : vector<98x16xf32>
    %cst_5 = arith.constant 0.000000e+00 : f32
    %6 = vector.broadcast %cst_5 : f32 to vector<98x16xf32>
    %7 = arith.maximumf %5, %6 : vector<98x16xf32>
    %c0_6 = arith.constant 0 : index
    %c0_7 = arith.constant 0 : index
    %8 = vector.load %arg2[%c0_6, %c0_7] : memref<98x54xf32, #tpu.memory_space<vmem>>, vector<98x54xf32>
    %cst_8 = arith.constant dense<0.000000e+00> : vector<98x16xf32>
    %9 = tpu.matmul %8, %0, %cst_8 {dimension_numbers = #tpu.dot_dimension_numbers<[1], [0], [0], [1], [0, 0, 1, 1], [], []>} : vector<98x54xf32>, vector<54x16xf32>, vector<98x16xf32> -> vector<98x16xf32>
    %10 = vector.broadcast %1 : vector<1x16xf32> to vector<98x16xf32>
    %11 = arith.addf %9, %10 : vector<98x16xf32>
    %cst_9 = arith.constant 0.000000e+00 : f32
    %12 = vector.broadcast %cst_9 : f32 to vector<98x16xf32>
    %13 = arith.maximumf %11, %12 : vector<98x16xf32>
    %14 = arith.maximumf %7, %13 : vector<98x16xf32>
    %c0_10 = arith.constant 0 : index
    %c0_11 = arith.constant 0 : index
    %15 = vector.load %arg3[%c0_10, %c0_11] : memref<98x54xf32, #tpu.memory_space<vmem>>, vector<98x54xf32>
    %cst_12 = arith.constant dense<0.000000e+00> : vector<98x16xf32>
    %16 = tpu.matmul %15, %0, %cst_12 {dimension_numbers = #tpu.dot_dimension_numbers<[1], [0], [0], [1], [0, 0, 1, 1], [], []>} : vector<98x54xf32>, vector<54x16xf32>, vector<98x16xf32> -> vector<98x16xf32>
    %17 = vector.broadcast %1 : vector<1x16xf32> to vector<98x16xf32>
    %18 = arith.addf %16, %17 : vector<98x16xf32>
    %cst_13 = arith.constant 0.000000e+00 : f32
    %19 = vector.broadcast %cst_13 : f32 to vector<98x16xf32>
    %20 = arith.maximumf %18, %19 : vector<98x16xf32>
    %c0_14 = arith.constant 0 : index
    %c0_15 = arith.constant 0 : index
    %21 = vector.load %arg4[%c0_14, %c0_15] : memref<98x54xf32, #tpu.memory_space<vmem>>, vector<98x54xf32>
    %cst_16 = arith.constant dense<0.000000e+00> : vector<98x16xf32>
    %22 = tpu.matmul %21, %0, %cst_16 {dimension_numbers = #tpu.dot_dimension_numbers<[1], [0], [0], [1], [0, 0, 1, 1], [], []>} : vector<98x54xf32>, vector<54x16xf32>, vector<98x16xf32> -> vector<98x16xf32>
    %23 = vector.broadcast %1 : vector<1x16xf32> to vector<98x16xf32>
    %24 = arith.addf %22, %23 : vector<98x16xf32>
    %cst_17 = arith.constant 0.000000e+00 : f32
    %25 = vector.broadcast %cst_17 : f32 to vector<98x16xf32>
    %26 = arith.maximumf %24, %25 : vector<98x16xf32>
    %27 = arith.maximumf %20, %26 : vector<98x16xf32>
    %28 = arith.maximumf %14, %27 : vector<98x16xf32>
    %c0_18 = arith.constant 0 : index
    %c0_19 = arith.constant 0 : index
    %29 = vector.load %arg7[%c0_18, %c0_19] : memref<98x16xf32, #tpu.memory_space<vmem>>, vector<98x16xf32>
    tpu.vector_store %arg7[%c0_18, %c0_19], %28 {strides = array<i32>} : memref<98x16xf32, #tpu.memory_space<vmem>>, vector<98x16xf32>,
    return
  }
  func.func @transform_0(%arg0: i32) -> (i32, i32) {
    %c0_i32 = arith.constant 0 : i32
    %c0_i32_0 = arith.constant 0 : i32
    return %arg0, %c0_i32 : i32, i32
  }
  func.func @transform_1(%arg0: i32) -> (i32, i32) {
    %c0_i32 = arith.constant 0 : i32
    %c0_i32_0 = arith.constant 0 : i32
    return %arg0, %c0_i32 : i32, i32
  }
  func.func @transform_2(%arg0: i32) -> (i32, i32) {
    %c0_i32 = arith.constant 0 : i32
    %c0_i32_0 = arith.constant 0 : i32
    return %arg0, %c0_i32 : i32, i32
  }
  func.func @transform_3(%arg0: i32) -> (i32, i32) {
    %c0_i32 = arith.constant 0 : i32
    %c0_i32_0 = arith.constant 0 : i32
    return %arg0, %c0_i32 : i32, i32
  }
  func.func @transform_4(%arg0: i32) -> (i32, i32) {
    %c0_i32 = arith.constant 0 : i32
    %c0_i32_0 = arith.constant 0 : i32
    %c0_i32_1 = arith.constant 0 : i32
    return %c0_i32, %c0_i32_0 : i32, i32
  }
  func.func @transform_5(%arg0: i32) -> (i32, i32) {
    %c0_i32 = arith.constant 0 : i32
    %c0_i32_0 = arith.constant 0 : i32
    %c0_i32_1 = arith.constant 0 : i32
    return %c0_i32, %c0_i32_0 : i32, i32
  }
  func.func @transform_6(%arg0: i32) -> (i32, i32) {
    %c0_i32 = arith.constant 0 : i32
    %c0_i32_0 = arith.constant 0 : i32
    return %arg0, %c0_i32 : i32, i32
  }
}

module attributes {stable_mosaic.version = 11 : i64} {
  func.func @_fc_fused_kernel(%arg0: i32, %arg1: memref<2x784xf32, #tpu.memory_space<vmem>>, %arg2: memref<784x120xf32, #tpu.memory_space<vmem>>, %arg3: memref<1x120xf32, #tpu.memory_space<vmem>>, %arg4: memref<120x84xf32, #tpu.memory_space<vmem>>, %arg5: memref<1x84xf32, #tpu.memory_space<vmem>>, %arg6: memref<84x10xf32, #tpu.memory_space<vmem>>, %arg7: memref<1x10xf32, #tpu.memory_space<vmem>>, %arg8: memref<2x10xf32, #tpu.memory_space<vmem>>) attributes {dimension_semantics = [#tpu.dimension_semantics<arbitrary>], iteration_bounds = array<i64: 1>, scalar_prefetch = 0 : i64, scratch_operands = 0 : i64, tpu.core_type = #tpu.core_type<tc>, window_params = [{pipeline_mode = #tpu.pipeline_mode<synchronous>, transform_indices = @transform_0, window_bounds = array<i64: 2, 784>}, {pipeline_mode = #tpu.pipeline_mode<synchronous>, transform_indices = @transform_1, window_bounds = array<i64: 784, 120>}, {pipeline_mode = #tpu.pipeline_mode<synchronous>, transform_indices = @transform_2, window_bounds = array<i64: 1, 120>}, {pipeline_mode = #tpu.pipeline_mode<synchronous>, transform_indices = @transform_3, window_bounds = array<i64: 120, 84>}, {pipeline_mode = #tpu.pipeline_mode<synchronous>, transform_indices = @transform_4, window_bounds = array<i64: 1, 84>}, {pipeline_mode = #tpu.pipeline_mode<synchronous>, transform_indices = @transform_5, window_bounds = array<i64: 84, 10>}, {pipeline_mode = #tpu.pipeline_mode<synchronous>, transform_indices = @transform_6, window_bounds = array<i64: 1, 10>}, {pipeline_mode = #tpu.pipeline_mode<synchronous>, transform_indices = @transform_7, window_bounds = array<i64: 2, 10>}]} {
    %c0 = arith.constant 0 : index
    %c0_0 = arith.constant 0 : index
    %0 = vector.load %arg1[%c0, %c0_0] : memref<2x784xf32, #tpu.memory_space<vmem>>, vector<2x784xf32>
    %c0_1 = arith.constant 0 : index
    %c0_2 = arith.constant 0 : index
    %1 = vector.load %arg2[%c0_1, %c0_2] : memref<784x120xf32, #tpu.memory_space<vmem>>, vector<784x120xf32>
    %cst = arith.constant dense<0.000000e+00> : vector<2x120xf32>
    %2 = tpu.matmul %0, %1, %cst {dimension_numbers = #tpu.dot_dimension_numbers<[1], [0], [0], [1], [0, 0, 1, 1], [], []>} : vector<2x784xf32>, vector<784x120xf32>, vector<2x120xf32> -> vector<2x120xf32>
    %c0_3 = arith.constant 0 : index
    %c0_4 = arith.constant 0 : index
    %3 = vector.load %arg3[%c0_3, %c0_4] : memref<1x120xf32, #tpu.memory_space<vmem>>, vector<1x120xf32>
    %4 = vector.broadcast %3 : vector<1x120xf32> to vector<2x120xf32>
    %5 = arith.addf %2, %4 : vector<2x120xf32>
    %cst_5 = arith.constant 0.000000e+00 : f32
    %6 = vector.broadcast %cst_5 : f32 to vector<2x120xf32>
    %7 = arith.maximumf %5, %6 : vector<2x120xf32>
    %c0_6 = arith.constant 0 : index
    %c0_7 = arith.constant 0 : index
    %8 = vector.load %arg4[%c0_6, %c0_7] : memref<120x84xf32, #tpu.memory_space<vmem>>, vector<120x84xf32>
    %cst_8 = arith.constant dense<0.000000e+00> : vector<2x84xf32>
    %9 = tpu.matmul %7, %8, %cst_8 {dimension_numbers = #tpu.dot_dimension_numbers<[1], [0], [0], [1], [0, 0, 1, 1], [], []>} : vector<2x120xf32>, vector<120x84xf32>, vector<2x84xf32> -> vector<2x84xf32>
    %c0_9 = arith.constant 0 : index
    %c0_10 = arith.constant 0 : index
    %10 = vector.load %arg5[%c0_9, %c0_10] : memref<1x84xf32, #tpu.memory_space<vmem>>, vector<1x84xf32>
    %11 = vector.broadcast %10 : vector<1x84xf32> to vector<2x84xf32>
    %12 = arith.addf %9, %11 : vector<2x84xf32>
    %cst_11 = arith.constant 0.000000e+00 : f32
    %13 = vector.broadcast %cst_11 : f32 to vector<2x84xf32>
    %14 = arith.maximumf %12, %13 : vector<2x84xf32>
    %c0_12 = arith.constant 0 : index
    %c0_13 = arith.constant 0 : index
    %15 = vector.load %arg6[%c0_12, %c0_13] : memref<84x10xf32, #tpu.memory_space<vmem>>, vector<84x10xf32>
    %cst_14 = arith.constant dense<0.000000e+00> : vector<2x10xf32>
    %16 = tpu.matmul %14, %15, %cst_14 {dimension_numbers = #tpu.dot_dimension_numbers<[1], [0], [0], [1], [0, 0, 1, 1], [], []>} : vector<2x84xf32>, vector<84x10xf32>, vector<2x10xf32> -> vector<2x10xf32>
    %c0_15 = arith.constant 0 : index
    %c0_16 = arith.constant 0 : index
    %17 = vector.load %arg7[%c0_15, %c0_16] : memref<1x10xf32, #tpu.memory_space<vmem>>, vector<1x10xf32>
    %18 = vector.broadcast %17 : vector<1x10xf32> to vector<2x10xf32>
    %19 = arith.addf %16, %18 : vector<2x10xf32>
    %c0_17 = arith.constant 0 : index
    %c0_18 = arith.constant 0 : index
    %20 = vector.load %arg8[%c0_17, %c0_18] : memref<2x10xf32, #tpu.memory_space<vmem>>, vector<2x10xf32>
    tpu.vector_store %arg8[%c0_17, %c0_18], %19 {strides = array<i32>} : memref<2x10xf32, #tpu.memory_space<vmem>>, vector<2x10xf32>,
    return
  }
  func.func @transform_0(%arg0: i32) -> (i32, i32) {
    %c0_i32 = arith.constant 0 : i32
    %c0_i32_0 = arith.constant 0 : i32
    %c0_i32_1 = arith.constant 0 : i32
    return %c0_i32, %c0_i32_0 : i32, i32
  }
  func.func @transform_1(%arg0: i32) -> (i32, i32) {
    %c0_i32 = arith.constant 0 : i32
    %c0_i32_0 = arith.constant 0 : i32
    %c0_i32_1 = arith.constant 0 : i32
    return %c0_i32, %c0_i32_0 : i32, i32
  }
  func.func @transform_2(%arg0: i32) -> (i32, i32) {
    %c0_i32 = arith.constant 0 : i32
    %c0_i32_0 = arith.constant 0 : i32
    %c0_i32_1 = arith.constant 0 : i32
    return %c0_i32, %c0_i32_0 : i32, i32
  }
  func.func @transform_3(%arg0: i32) -> (i32, i32) {
    %c0_i32 = arith.constant 0 : i32
    %c0_i32_0 = arith.constant 0 : i32
    %c0_i32_1 = arith.constant 0 : i32
    return %c0_i32, %c0_i32_0 : i32, i32
  }
  func.func @transform_4(%arg0: i32) -> (i32, i32) {
    %c0_i32 = arith.constant 0 : i32
    %c0_i32_0 = arith.constant 0 : i32
    %c0_i32_1 = arith.constant 0 : i32
    return %c0_i32, %c0_i32_0 : i32, i32
  }
  func.func @transform_5(%arg0: i32) -> (i32, i32) {
    %c0_i32 = arith.constant 0 : i32
    %c0_i32_0 = arith.constant 0 : i32
    %c0_i32_1 = arith.constant 0 : i32
    return %c0_i32, %c0_i32_0 : i32, i32
  }
  func.func @transform_6(%arg0: i32) -> (i32, i32) {
    %c0_i32 = arith.constant 0 : i32
    %c0_i32_0 = arith.constant 0 : i32
    %c0_i32_1 = arith.constant 0 : i32
    return %c0_i32, %c0_i32_0 : i32, i32
  }
  func.func @transform_7(%arg0: i32) -> (i32, i32) {
    %c0_i32 = arith.constant 0 : i32
    %c0_i32_0 = arith.constant 0 : i32
    %c0_i32_1 = arith.constant 0 : i32
    return %c0_i32, %c0_i32_0 : i32, i32
  }
}

</mosaic_0001>

<bundles_post_ra>
// kernel: weight_decay_lenet_forward.3
= control target key start
LH: loop header
LB: loop body
LE: loop exit
PB: predicated region body
PF: predicated region fallthrough
CT: control target
= control target key end

     0   :  { %s2914_s21 = smov 0   ;;  %s2916_s22 = smov 0   ;;  %s3742_s0 = inlined_call_operand.vmem [shape: f32[392,9], index: 0, kind: input, shape index: {}]   ;;  %s3743_s1 = inlined_call_operand.vmem [shape: f32[392,9], index: 1, kind: input, shape index: {}]   ;;  %s3744_s2 = inlined_call_operand.vmem [shape: f32[392,9], index: 2, kind: input, shape index: {}]   ;;  %s3745_s3 = inlined_call_operand.vmem [shape: f32[392,9], index: 3, kind: input, shape index: {}]   ;;  %s3746_s4 = inlined_call_operand.vmem [shape: f32[9,6], index: 4, kind: input, shape index: {}]   ;;  %s3747_s5 = inlined_call_operand.vmem [shape: f32[1,6], index: 5, kind: input, shape index: {}]   ;;  %s3748_s6 = inlined_call_operand.vmem [shape: f32[392,6], index: 6, kind: output, shape index: {}]  }
   0x1   :  { %s2918_s23 = smov 0  }
   0x2 LB: > { %s2927_s24 = sadd.s32 4294967295, %s2841_s23   ;;  %s2929_s25 = sadd.s32 1, %s2841_s23   ;;  %s2841_s23 = sphi %s2918_s23, %s3759_s23   ;;  %s2837_s22 = sphi %s2916_s22, %s3758_s22   ;;  %s2833_s21 = sphi %s2914_s21, %s3757_s21  }
   0x3   : > { %s166_s26 = ssub.s32 %s2841_s23, %s2929_s25  ;;  %s169_s27 = sadd.s32 1, %s2837_s22 }
   0x4   : > { %p167_p0 = scmp.eq.s32.totalorder %s166_s26, 0  ;;  %p179_p1 = scmp.ne.s32.totalorder %s2837_s22, %s2833_s21 }
   0x5   : > { %p180_p2 = scmp.eq.s32.totalorder %s2927_s24, 1  ;;  %p2126_p3 = scmp.ge.s32.totalorder %s2841_s23, 1 }
   0x6   : > { %s2937_s28 = scalar_select %p167_p0, %s2837_s22, %s169_s27  }
   0x7   : > { %p2939_p4 = por %p180_p2, %p179_p1  ;;  %p278_p5 = scmp.lt.s32.totalorder %s2841_s23, 3 }
   0x9   : > { %p279_p6 = pnand %p2126_p3, %p278_p5 }
   0xa   : > { %v399_v0 = vld [vmem:[%s3746_s4] sm:$0xff] (!%p279_p6)  ;;  %v400_v1 = vld [vmem:[%s3746_s4 + $0x8] sm:$0x1] (!%p279_p6)  ;;  %vm509_vm0 = vcmask (!%p279_p6), 1040384   ;;  %v2875_v2 = vmov (!%p279_p6), 0.0|0.0   ;;  %vm2876_vm1 = vmmov (!%p279_p6), 1  }
   0xb   : > { %282 = sbr.rel (%p279_p6) target bundleno = 506 (0x1fa), region = 44  ;;  %2673 = vmatprep.subr.bf16.mxu0 (!%p279_p6), %v2875_v2  ;;  %2677 = vmatprep.subr.bf16.mxu1 (!%p279_p6), %v2875_v2  ;;  %v2674_v3 = vpack.c.bf16 (!%p279_p6), %v400_v1, %v399_v0  ;;  %vm2949_vm2 = vmpackc.low (!%p279_p6), %vm509_vm0, %vm2876_vm1  ;;  %vm2877_vm3 = vmmov (!%p279_p6), 0   ;;  %v2878_v5 = vmov (!%p279_p6), 0.0   ;;  %vm433_vm4 = vcmask (!%p279_p6), 72704   ;;  %s335_s9 = sand.u32 (!%p279_p6), 1, %s2833_s21  }
   0xc   : > { %s2954_s10 = smul.u32 (!%p279_p6), 25, %s2927_s24  ;;  %2361 = vmatprep.mubr.msk.f32.mxu0 (!%p279_p6), %vm2877_vm3, %v2878_v5  ;;  %2440 = vmatprep.mubr.msk.f32.mxu1 (!%p279_p6), %vm2877_vm3, %v2878_v5  ;;  %vm1748_vm5 = vcmask (!%p279_p6), 48128  }
   0xd   : > { %2676 = vmatpush3.bf16.msk.msra.mxu0 (!%p279_p6), %vm2949_vm2, %v2674_v3  ;;  %2680 = vmatpush3.bf16.msk.msra.mxu1 (!%p279_p6), %vm2949_vm2, %v2674_v3 }
   0xe   : > { %p343_p7 = scmp.lt.s32.totalorder (!%p279_p6), %s2954_s10, 48  ;;  %2681 = vmatprep.subr.bf16.mxu0 (!%p279_p6), %v2875_v2  ;;  %2685 = vmatprep.subr.bf16.mxu1 (!%p279_p6), %v2875_v2 }
  0x12   : > { %s344_s11 = scalar_select %p343_p7, %s2954_s10, 48 }
  0x13   : > { %s2248_s13 = smul.u32 (%p2939_p4), 200, %s2927_s24 }
  0x14   : > { %s2966_s12 = sshll.u32 %s344_s11, 3  ;;  %s2689_s11 = smul.u32 200, %s335_s9 }
  0x15   : > { %s2972_s15 = scalar_lea.vmem %s3742_s0, %s2966_s12  ;;  %s2978_s18 = scalar_lea.vmem %s3743_s1, %s2966_s12 }
  0x16   : > { %v402_v6 = vld [vmem:[%s2972_s15] sm:$0xff]  ;;  %v403_v8 = vld [vmem:[%s2972_s15 + $0x8] sm:$0xff]  ;;  %v404_v10 = vld [vmem:[%s2972_s15 + $0x10] sm:$0xff]  ;;  %s3182_s23 = scalar_lea.vmem %s3744_s2, %s2966_s12  ;;  %s3188_s30 = scalar_lea.vmem %s3745_s3, %s2966_s12 }
  0x17   : > { %v728_v7 = vld [vmem:[%s2978_s18] sm:$0xff]  ;;  %2362 = vmatmul.mubr.msk.f32.vlgmr.msra.gmra.mrb[0].mxu0 %vm433_vm4, %v402_v6  ;;  %v729_v9 = vld [vmem:[%s2978_s18 + $0x8] sm:$0xff]  ;;  %v730_v11 = vld [vmem:[%s2978_s18 + $0x10] sm:$0xff]  ;;  %s3503_s21 = scalar_lea.vmem [#allocation2], %s2689_s11   ;;  %s1782_s12 = ssub.s32 (%p2939_p4), 49, %s2954_s10 }
  0x18   : > { %2441 = vmatmul.mubr.msk.f32.vlgmr.msra.gmra.mrb[0].mxu1 %vm433_vm4, %v728_v7  ;;  %2684 = vmatpush3.bf16.msk.msra.mxu0 %vm2949_vm2, %v2674_v3  ;;  %v405_v12 = vld [vmem:[%s2972_s15 + $0x18] sm:$0xff]  ;;  %v406_v14 = vld [vmem:[%s2972_s15 + $0x20] sm:$0xff]  ;;  %v407_v16 = vld [vmem:[%s2972_s15 + $0x28] sm:$0xff]  ;;  %p1783_p8 = scmp.lt.s32.totalorder (%p2939_p4), %s1782_s12, 25  ;;  %s3632_s16 = scalar_lea.vmem (%p2939_p4), %s3748_s6, %s2248_s13  }
  0x19   : > { %2688 = vmatpush3.bf16.msk.msra.mxu1 %vm2949_vm2, %v2674_v3  ;;  %2364 = vmatprep.mubr.msk.f32.mxu0 %vm2877_vm3, %v2878_v5  ;;  %v731_v13 = vld [vmem:[%s2978_s18 + $0x18] sm:$0xff]  ;;  %v732_v15 = vld [vmem:[%s2978_s18 + $0x20] sm:$0xff]  ;;  %v733_v17 = vld [vmem:[%s2978_s18 + $0x28] sm:$0xff] }
  0x1a   : > { %2443 = vmatprep.mubr.msk.f32.mxu1 %vm2877_vm3, %v2878_v5  ;;  %v408_v18 = vld [vmem:[%s2972_s15 + $0x30] sm:$0xff]  ;;  %v409_v20 = vld [vmem:[%s2972_s15 + $0x38] sm:$0xff]  ;;  %v410_v22 = vld [vmem:[%s2972_s15 + $0x40] sm:$0xff] }
  0x1b   : > { %2365 = vmatmul.mubr.msk.f32.gmra.mrb[2].mxu0 %vm433_vm4, %v403_v8  ;;  %v734_v19 = vld [vmem:[%s2978_s18 + $0x30] sm:$0xff]  ;;  %v735_v21 = vld [vmem:[%s2978_s18 + $0x38] sm:$0xff]  ;;  %v736_v23 = vld [vmem:[%s2978_s18 + $0x40] sm:$0xff] }
  0x1c   : > { %2444 = vmatmul.mubr.msk.f32.gmra.mrb[2].mxu1 %vm433_vm4, %v729_v9  ;;  %2367 = vmatprep.mubr.msk.f32.mxu0 %vm2877_vm3, %v2878_v5  ;;  %v411_v24 = vld [vmem:[%s2972_s15 + $0x48] sm:$0xff]  ;;  %v412_v26 = vld [vmem:[%s2972_s15 + $0x50] sm:$0xff]  ;;  %v413_v28 = vld [vmem:[%s2972_s15 + $0x58] sm:$0xff] }
  0x1d   : > { %2446 = vmatprep.mubr.msk.f32.mxu1 %vm2877_vm3, %v2878_v5  ;;  %v737_v25 = vld [vmem:[%s2978_s18 + $0x48] sm:$0xff]  ;;  %v738_v27 = vld [vmem:[%s2978_s18 + $0x50] sm:$0xff]  ;;  %v739_v29 = vld [vmem:[%s2978_s18 + $0x58] sm:$0xff] }
  0x1e   : > { %v414_v30 = vld [vmem:[%s2972_s15 + $0x60] sm:$0xff]  ;;  %v415_v32 = vld [vmem:[%s2972_s15 + $0x68] sm:$0xff]  ;;  %v416_v34 = vld [vmem:[%s2972_s15 + $0x70] sm:$0xff] }
  0x1f   : > { %2368 = vmatmul.mubr.msk.f32.gmra.mrb[4].mxu0 %vm433_vm4, %v404_v10  ;;  %v740_v31 = vld [vmem:[%s2978_s18 + $0x60] sm:$0xff]  ;;  %v741_v33 = vld [vmem:[%s2978_s18 + $0x68] sm:$0xff]  ;;  %v742_v35 = vld [vmem:[%s2978_s18 + $0x70] sm:$0xff] }
  0x20   : > { %2447 = vmatmul.mubr.msk.f32.gmra.mrb[4].mxu1 %vm433_vm4, %v730_v11  ;;  %2370 = vmatprep.mubr.msk.f32.mxu0 %vm2877_vm3, %v2878_v5  ;;  %v417_v36 = vld [vmem:[%s2972_s15 + $0x78] sm:$0xff]  ;;  %v418_v38 = vld [vmem:[%s2972_s15 + $0x80] sm:$0xff]  ;;  %v419_v40 = vld [vmem:[%s2972_s15 + $0x88] sm:$0xff] }
  0x21   : > { %2449 = vmatprep.mubr.msk.f32.mxu1 %vm2877_vm3, %v2878_v5  ;;  %v743_v37 = vld [vmem:[%s2978_s18 + $0x78] sm:$0xff]  ;;  %v744_v39 = vld [vmem:[%s2978_s18 + $0x80] sm:$0xff]  ;;  %v745_v41 = vld [vmem:[%s2978_s18 + $0x88] sm:$0xff] }
  0x22   : > { %v420_v42 = vld [vmem:[%s2972_s15 + $0x90] sm:$0xff]  ;;  %v421_v44 = vld [vmem:[%s2972_s15 + $0x98] sm:$0xff]  ;;  %v422_v46 = vld [vmem:[%s2972_s15 + $0xa0] sm:$0xff] }
  0x23   : > { %2371 = vmatmul.mubr.msk.f32.gmra.mrb[6].mxu0 %vm433_vm4, %v405_v12  ;;  %v746_v43 = vld [vmem:[%s2978_s18 + $0x90] sm:$0xff]  ;;  %v747_v45 = vld [vmem:[%s2978_s18 + $0x98] sm:$0xff]  ;;  %v748_v47 = vld [vmem:[%s2978_s18 + $0xa0] sm:$0xff] }
  0x24   : > { %2450 = vmatmul.mubr.msk.f32.gmra.mrb[6].mxu1 %vm433_vm4, %v731_v13  ;;  %2373 = vmatprep.mubr.msk.f32.mxu0 %vm2877_vm3, %v2878_v5  ;;  %v423_v48 = vld [vmem:[%s2972_s15 + $0xa8] sm:$0xff]  ;;  %v424_v50 = vld [vmem:[%s2972_s15 + $0xb0] sm:$0xff]  ;;  %v425_v52 = vld [vmem:[%s2972_s15 + $0xb8] sm:$0xff] }
  0x25   : > { %2452 = vmatprep.mubr.msk.f32.mxu1 %vm2877_vm3, %v2878_v5  ;;  %v749_v49 = vld [vmem:[%s2978_s18 + $0xa8] sm:$0xff]  ;;  %v750_v51 = vld [vmem:[%s2978_s18 + $0xb0] sm:$0xff]  ;;  %v751_v53 = vld [vmem:[%s2978_s18 + $0xb8] sm:$0xff] }
  0x26   : > { %v426_v54 = vld [vmem:[%s2972_s15 + $0xc0] sm:$0xff]  ;;  %v1069_v58 = vld [vmem:[%s3182_s23 + $0x8] sm:$0xff]  ;;  %v1070_v60 = vld [vmem:[%s3182_s23 + $0x10] sm:$0xff] }
  0x27   : > { %2374 = vmatmul.mubr.msk.f32.gmra.mrb[8].mxu0 %vm433_vm4, %v406_v14  ;;  %v752_v55 = vld [vmem:[%s2978_s18 + $0xc0] sm:$0xff]  ;;  %v1384_v59 = vld [vmem:[%s3188_s30 + $0x8] sm:$0xff]  ;;  %v1385_v61 = vld [vmem:[%s3188_s30 + $0x10] sm:$0xff] }
  0x28   : > { %2453 = vmatmul.mubr.msk.f32.gmra.mrb[8].mxu1 %vm433_vm4, %v732_v15  ;;  %2376 = vmatprep.mubr.msk.f32.mxu0 %vm2877_vm3, %v2878_v5  ;;  %v1068_v56 = vld [vmem:[%s3182_s23] sm:$0xff]  ;;  %v1071_v62 = vld [vmem:[%s3182_s23 + $0x18] sm:$0xff]  ;;  %v1073_v2 = vld [vmem:[%s3182_s23 + $0x28] sm:$0xff] }
  0x29   : > { %2455 = vmatprep.mubr.msk.f32.mxu1 %vm2877_vm3, %v2878_v5  ;;  %v1383_v57 = vld [vmem:[%s3188_s30] sm:$0xff]  ;;  %v1386_v63 = vld [vmem:[%s3188_s30 + $0x18] sm:$0xff]  ;;  %v1388_v3 = vld [vmem:[%s3188_s30 + $0x28] sm:$0xff] }
  0x2a   : > { %v1072_v0 = vld [vmem:[%s3182_s23 + $0x20] sm:$0xff]  ;;  %v1074_v4 = vld [vmem:[%s3182_s23 + $0x30] sm:$0xff]  ;;  %v1075_v7 = vld [vmem:[%s3182_s23 + $0x38] sm:$0xff] }
  0x2b   : > { %2377 = vmatmul.mubr.msk.f32.gmra.mrb[10].mxu0 %vm433_vm4, %v407_v16  ;;  %v1387_v1 = vld [vmem:[%s3188_s30 + $0x20] sm:$0xff]  ;;  %v1389_v6 = vld [vmem:[%s3188_s30 + $0x30] sm:$0xff]  ;;  %v1390_v8 = vld [vmem:[%s3188_s30 + $0x38] sm:$0xff] }
  0x2c   : > { %2456 = vmatmul.mubr.msk.f32.gmra.mrb[10].mxu1 %vm433_vm4, %v733_v17  ;;  %2379 = vmatprep.mubr.msk.f32.mxu0 %vm2877_vm3, %v2878_v5  ;;  %v1076_v9 = vld [vmem:[%s3182_s23 + $0x40] sm:$0xff]  ;;  %v1077_v11 = vld [vmem:[%s3182_s23 + $0x48] sm:$0xff]  ;;  %v1078_v13 = vld [vmem:[%s3182_s23 + $0x50] sm:$0xff] }
  0x2d   : > { %2458 = vmatprep.mubr.msk.f32.mxu1 %vm2877_vm3, %v2878_v5  ;;  %v1391_v10 = vld [vmem:[%s3188_s30 + $0x40] sm:$0xff]  ;;  %v1392_v12 = vld [vmem:[%s3188_s30 + $0x48] sm:$0xff]  ;;  %v1393_v14 = vld [vmem:[%s3188_s30 + $0x50] sm:$0xff] }
  0x2e   : > { %v1079_v15 = vld [vmem:[%s3182_s23 + $0x58] sm:$0xff]  ;;  %v1080_v17 = vld [vmem:[%s3182_s23 + $0x60] sm:$0xff] }
  0x2f   : > { %2380 = vmatmul.mubr.msk.f32.gmra.mrb[12].mxu0 %vm433_vm4, %v408_v18  ;;  %v1394_v16 = vld [vmem:[%s3188_s30 + $0x58] sm:$0xff]  ;;  %v1395_v18 = vld [vmem:[%s3188_s30 + $0x60] sm:$0xff] }
  0x30   : > { %2459 = vmatmul.mubr.msk.f32.gmra.mrb[12].mxu1 %vm433_vm4, %v734_v19  ;;  %2382 = vmatprep.mubr.msk.f32.mxu0 %vm2877_vm3, %v2878_v5  ;;  %v1081_v19 = vld [vmem:[%s3182_s23 + $0x68] sm:$0xff] }
  0x31   : > { %2461 = vmatprep.mubr.msk.f32.mxu1 %vm2877_vm3, %v2878_v5 }
  0x33   : > { %2383 = vmatmul.mubr.msk.f32.gmra.mrb[14].mxu0 %vm433_vm4, %v409_v20  ;;  %v1396_v20 = vld [vmem:[%s3188_s30 + $0x68] sm:$0xff] }
  0x34   : > { %2462 = vmatmul.mubr.msk.f32.gmra.mrb[14].mxu1 %vm433_vm4, %v735_v21  ;;  %2385 = vmatprep.mubr.msk.f32.mxu0 %vm2877_vm3, %v2878_v5  ;;  %v1082_v21 = vld [vmem:[%s3182_s23 + $0x70] sm:$0xff] }
  0x35   : > { %2464 = vmatprep.mubr.msk.f32.mxu1 %vm2877_vm3, %v2878_v5 }
  0x37   : > { %2386 = vmatmul.mubr.msk.f32.gmra.mrb[16].mxu0 %vm433_vm4, %v410_v22  ;;  %v1397_v22 = vld [vmem:[%s3188_s30 + $0x70] sm:$0xff] }
  0x38   : > { %2465 = vmatmul.mubr.msk.f32.gmra.mrb[16].mxu1 %vm433_vm4, %v736_v23  ;;  %2388 = vmatprep.mubr.msk.f32.mxu0 %vm2877_vm3, %v2878_v5  ;;  %v1083_v23 = vld [vmem:[%s3182_s23 + $0x78] sm:$0xff] }
  0x39   : > { %2467 = vmatprep.mubr.msk.f32.mxu1 %vm2877_vm3, %v2878_v5 }
  0x3b   : > { %2389 = vmatmul.mubr.msk.f32.gmra.mrb[18].mxu0 %vm433_vm4, %v411_v24  ;;  %v1398_v24 = vld [vmem:[%s3188_s30 + $0x78] sm:$0xff] }
  0x3c   : > { %2468 = vmatmul.mubr.msk.f32.gmra.mrb[18].mxu1 %vm433_vm4, %v737_v25  ;;  %2391 = vmatprep.mubr.msk.f32.mxu0 %vm2877_vm3, %v2878_v5  ;;  %v1084_v25 = vld [vmem:[%s3182_s23 + $0x80] sm:$0xff] }
  0x3d   : > { %2470 = vmatprep.mubr.msk.f32.mxu1 %vm2877_vm3, %v2878_v5 }
  0x3f   : > { %2392 = vmatmul.mubr.msk.f32.gmra.mrb[20].mxu0 %vm433_vm4, %v412_v26  ;;  %v1399_v26 = vld [vmem:[%s3188_s30 + $0x80] sm:$0xff] }
  0x40   : > { %2471 = vmatmul.mubr.msk.f32.gmra.mrb[20].mxu1 %vm433_vm4, %v738_v27  ;;  %2394 = vmatprep.mubr.msk.f32.mxu0 %vm2877_vm3, %v2878_v5  ;;  %v1085_v27 = vld [vmem:[%s3182_s23 + $0x88] sm:$0xff] }
  0x41   : > { %2473 = vmatprep.mubr.msk.f32.mxu1 %vm2877_vm3, %v2878_v5 }
  0x43   : > { %2395 = vmatmul.mubr.msk.f32.gmra.mrb[22].mxu0 %vm433_vm4, %v413_v28  ;;  %v1400_v28 = vld [vmem:[%s3188_s30 + $0x88] sm:$0xff] }
  0x44   : > { %2474 = vmatmul.mubr.msk.f32.gmra.mrb[22].mxu1 %vm433_vm4, %v739_v29  ;;  %2397 = vmatprep.mubr.msk.f32.mxu0 %vm2877_vm3, %v2878_v5  ;;  %v1086_v29 = vld [vmem:[%s3182_s23 + $0x90] sm:$0xff] }
  0x45   : > { %2476 = vmatprep.mubr.msk.f32.mxu1 %vm2877_vm3, %v2878_v5 }
  0x47   : > { %2398 = vmatmul.mubr.msk.f32.gmra.mrb[24].mxu0 %vm433_vm4, %v414_v30  ;;  %v1401_v30 = vld [vmem:[%s3188_s30 + $0x90] sm:$0xff] }
  0x48   : > { %2477 = vmatmul.mubr.msk.f32.gmra.mrb[24].mxu1 %vm433_vm4, %v740_v31  ;;  %2400 = vmatprep.mubr.msk.f32.mxu0 %vm2877_vm3, %v2878_v5  ;;  %v1087_v31 = vld [vmem:[%s3182_s23 + $0x98] sm:$0xff] }
  0x49   : > { %2479 = vmatprep.mubr.msk.f32.mxu1 %vm2877_vm3, %v2878_v5 }
  0x4b   : > { %2401 = vmatmul.mubr.msk.f32.gmra.mrb[26].mxu0 %vm433_vm4, %v415_v32  ;;  %v1402_v32 = vld [vmem:[%s3188_s30 + $0x98] sm:$0xff] }
  0x4c   : > { %2480 = vmatmul.mubr.msk.f32.gmra.mrb[26].mxu1 %vm433_vm4, %v741_v33  ;;  %2403 = vmatprep.mubr.msk.f32.mxu0 %vm2877_vm3, %v2878_v5  ;;  %v1088_v33 = vld [vmem:[%s3182_s23 + $0xa0] sm:$0xff] }
  0x4d   : > { %2482 = vmatprep.mubr.msk.f32.mxu1 %vm2877_vm3, %v2878_v5 }
  0x4f   : > { %2404 = vmatmul.mubr.msk.f32.gmra.mrb[28].mxu0 %vm433_vm4, %v416_v34  ;;  %v1403_v34 = vld [vmem:[%s3188_s30 + $0xa0] sm:$0xff] }
  0x50   : > { %2483 = vmatmul.mubr.msk.f32.gmra.mrb[28].mxu1 %vm433_vm4, %v742_v35  ;;  %2406 = vmatprep.mubr.msk.f32.mxu0 %vm2877_vm3, %v2878_v5  ;;  %v1089_v35 = vld [vmem:[%s3182_s23 + $0xa8] sm:$0xff] }
  0x51   : > { %2485 = vmatprep.mubr.msk.f32.mxu1 %vm2877_vm3, %v2878_v5 }
  0x53   : > { %2407 = vmatmul.mubr.msk.f32.gmra.mrb[30].mxu0 %vm433_vm4, %v417_v36  ;;  %v1404_v36 = vld [vmem:[%s3188_s30 + $0xa8] sm:$0xff] }
  0x54   : > { %2486 = vmatmul.mubr.msk.f32.gmra.mrb[30].mxu1 %vm433_vm4, %v743_v37  ;;  %2409 = vmatprep.mubr.msk.f32.mxu0 %vm2877_vm3, %v2878_v5  ;;  %v1090_v37 = vld [vmem:[%s3182_s23 + $0xb0] sm:$0xff] }
  0x55   : > { %2488 = vmatprep.mubr.msk.f32.mxu1 %vm2877_vm3, %v2878_v5 }
  0x57   : > { %2410 = vmatmul.mubr.msk.f32.gmra.mrb[32].mxu0 %vm433_vm4, %v418_v38  ;;  %v1405_v38 = vld [vmem:[%s3188_s30 + $0xb0] sm:$0xff] }
  0x58   : > { %2489 = vmatmul.mubr.msk.f32.gmra.mrb[32].mxu1 %vm433_vm4, %v744_v39  ;;  %2412 = vmatprep.mubr.msk.f32.mxu0 %vm2877_vm3, %v2878_v5  ;;  %v1091_v39 = vld [vmem:[%s3182_s23 + $0xb8] sm:$0xff] }
  0x59   : > { %2491 = vmatprep.mubr.msk.f32.mxu1 %vm2877_vm3, %v2878_v5 }
  0x5b   : > { %2413 = vmatmul.mubr.msk.f32.gmra.mrb[34].mxu0 %vm433_vm4, %v419_v40  ;;  %v1406_v40 = vld [vmem:[%s3188_s30 + $0xb8] sm:$0xff] }
  0x5c   : > { %2492 = vmatmul.mubr.msk.f32.gmra.mrb[34].mxu1 %vm433_vm4, %v745_v41  ;;  %2415 = vmatprep.mubr.msk.f32.mxu0 %vm2877_vm3, %v2878_v5  ;;  %v1092_v41 = vld [vmem:[%s3182_s23 + $0xc0] sm:$0xff] }
  0x5d   : > { %2494 = vmatprep.mubr.msk.f32.mxu1 %vm2877_vm3, %v2878_v5 }
  0x5f   : > { %2416 = vmatmul.mubr.msk.f32.gmra.mrb[36].mxu0 %vm433_vm4, %v420_v42  ;;  %v1407_v42 = vld [vmem:[%s3188_s30 + $0xc0] sm:$0xff] }
  0x60   : > { %2495 = vmatmul.mubr.msk.f32.gmra.mrb[36].mxu1 %vm433_vm4, %v746_v43  ;;  %2418 = vmatprep.mubr.msk.f32.mxu0 %vm2877_vm3, %v2878_v5  ;;  %v3395_v43 = vld [vmem:[%s3747_s5] ss:$0 sm:$0xff] }
  0x61   : > { %2497 = vmatprep.mubr.msk.f32.mxu1 %vm2877_vm3, %v2878_v5 }
  0x63   : > { %2419 = vmatmul.mubr.msk.f32.gmra.mrb[38].mxu0 %vm433_vm4, %v421_v44 }
  0x64   : > { %2498 = vmatmul.mubr.msk.f32.gmra.mrb[38].mxu1 %vm433_vm4, %v747_v45  ;;  %2421 = vmatprep.mubr.msk.f32.mxu0 %vm2877_vm3, %v2878_v5 }
  0x65   : > { %2500 = vmatprep.mubr.msk.f32.mxu1 %vm2877_vm3, %v2878_v5 }
  0x67   : > { %2422 = vmatmul.mubr.msk.f32.gmra.mrb[40].mxu0 %vm433_vm4, %v422_v46 }
  0x68   : > { %2501 = vmatmul.mubr.msk.f32.gmra.mrb[40].mxu1 %vm433_vm4, %v748_v47  ;;  %2424 = vmatprep.mubr.msk.f32.mxu0 %vm2877_vm3, %v2878_v5 }
  0x69   : > { %2503 = vmatprep.mubr.msk.f32.mxu1 %vm2877_vm3, %v2878_v5 }
  0x6b   : > { %2425 = vmatmul.mubr.msk.f32.gmra.mrb[42].mxu0 %vm433_vm4, %v423_v48 }
  0x6c   : > { %2504 = vmatmul.mubr.msk.f32.gmra.mrb[42].mxu1 %vm433_vm4, %v749_v49  ;;  %2427 = vmatprep.mubr.msk.f32.mxu0 %vm2877_vm3, %v2878_v5 }
  0x6d   : > { %2506 = vmatprep.mubr.msk.f32.mxu1 %vm2877_vm3, %v2878_v5 }
  0x6f   : > { %2428 = vmatmul.mubr.msk.f32.gmra.mrb[44].mxu0 %vm433_vm4, %v424_v50 }
  0x70   : > { %2507 = vmatmul.mubr.msk.f32.gmra.mrb[44].mxu1 %vm433_vm4, %v750_v51  ;;  %2430 = vmatprep.mubr.msk.f32.mxu0 %vm2877_vm3, %v2878_v5 }
  0x71   : > { %2509 = vmatprep.mubr.msk.f32.mxu1 %vm2877_vm3, %v2878_v5 }
  0x73   : > { %2431 = vmatmul.mubr.msk.f32.gmra.mrb[46].mxu0 %vm433_vm4, %v425_v52 }
  0x74   : > { %2510 = vmatmul.mubr.msk.f32.gmra.mrb[46].mxu1 %vm433_vm4, %v751_v53  ;;  %2433 = vmatprep.mubr.msk.f32.mxu0 %vm2877_vm3, %v2878_v5 }
  0x75   : > { %2512 = vmatprep.mubr.msk.f32.mxu1 %vm2877_vm3, %v2878_v5 }
  0x77   : > { %2434 = vmatmul.mubr.msk.f32.gmra.mrb[48].mxu0 %vm433_vm4, %v426_v54 }
  0x78   : > { %2513 = vmatmul.mubr.msk.f32.gmra.mrb[48].mxu1 %vm433_vm4, %v752_v55  ;;  %2519 = vmatprep.mubr.msk.f32.mxu0 %vm2877_vm3, %v2878_v5 }
  0x79   : > { %2598 = vmatprep.mubr.msk.f32.mxu1 %vm2877_vm3, %v2878_v5 }
  0x7b   : > { %2520 = vmatmul.mubr.msk.f32.vlgmr.msra.gmra.mrb[50].mxu0 %vm433_vm4, %v1068_v56 }
  0x7c   : > { %2599 = vmatmul.mubr.msk.f32.vlgmr.msra.gmra.mrb[50].mxu1 %vm433_vm4, %v1383_v57  ;;  %2522 = vmatprep.mubr.msk.f32.mxu0 %vm2877_vm3, %v2878_v5 }
  0x7d   : > { %2601 = vmatprep.mubr.msk.f32.mxu1 %vm2877_vm3, %v2878_v5 }
  0x7f   : > { %2523 = vmatmul.mubr.msk.f32.gmra.mrb[52].mxu0 %vm433_vm4, %v1069_v58 }
  0x80   : > { %2602 = vmatmul.mubr.msk.f32.gmra.mrb[52].mxu1 %vm433_vm4, %v1384_v59  ;;  %2525 = vmatprep.mubr.msk.f32.mxu0 %vm2877_vm3, %v2878_v5 }
  0x81   : > { %2604 = vmatprep.mubr.msk.f32.mxu1 %vm2877_vm3, %v2878_v5 }
  0x83   : > { %2526 = vmatmul.mubr.msk.f32.gmra.mrb[54].mxu0 %vm433_vm4, %v1070_v60 }
  0x84   : > { %2605 = vmatmul.mubr.msk.f32.gmra.mrb[54].mxu1 %vm433_vm4, %v1385_v61  ;;  %2528 = vmatprep.mubr.msk.f32.mxu0 %vm2877_vm3, %v2878_v5 }
  0x85   : > { %2607 = vmatprep.mubr.msk.f32.mxu1 %vm2877_vm3, %v2878_v5 }
  0x87   : > { %2529 = vmatmul.mubr.msk.f32.gmra.mrb[56].mxu0 %vm433_vm4, %v1071_v62 }
  0x88   : > { %2608 = vmatmul.mubr.msk.f32.gmra.mrb[56].mxu1 %vm433_vm4, %v1386_v63  ;;  %2531 = vmatprep.mubr.msk.f32.mxu0 %vm2877_vm3, %v2878_v5 }
  0x89   : > { %2610 = vmatprep.mubr.msk.f32.mxu1 %vm2877_vm3, %v2878_v5 }
  0x8b   : > { %2532 = vmatmul.mubr.msk.f32.gmra.mrb[58].mxu0 %vm433_vm4, %v1072_v0 }
  0x8c   : > { %2611 = vmatmul.mubr.msk.f32.gmra.mrb[58].mxu1 %vm433_vm4, %v1387_v1  ;;  %2534 = vmatprep.mubr.msk.f32.mxu0 %vm2877_vm3, %v2878_v5 }
  0x8d   : > { %2613 = vmatprep.mubr.msk.f32.mxu1 %vm2877_vm3, %v2878_v5 }
  0x8f   : > { %2535 = vmatmul.mubr.msk.f32.gmra.mrb[60].mxu0 %vm433_vm4, %v1073_v2 }
  0x90   : > { %2614 = vmatmul.mubr.msk.f32.gmra.mrb[60].mxu1 %vm433_vm4, %v1388_v3  ;;  %2537 = vmatprep.mubr.msk.f32.mxu0 %vm2877_vm3, %v2878_v5 }
  0x91   : > { %2616 = vmatprep.mubr.msk.f32.mxu1 %vm2877_vm3, %v2878_v5 }
  0x93   : > { %2538 = vmatmul.mubr.msk.f32.gmra.mrb[62].mxu0 %vm433_vm4, %v1074_v4 }
  0x94   : > { %2617 = vmatmul.mubr.msk.f32.gmra.mrb[62].mxu1 %vm433_vm4, %v1389_v6  ;;  %2540 = vmatprep.mubr.msk.f32.mxu0 %vm2877_vm3, %v2878_v5 }
  0x95   : > { %2619 = vmatprep.mubr.msk.f32.mxu1 %vm2877_vm3, %v2878_v5 }
  0x97   : > { %2541 = vmatmul.mubr.msk.f32.gmra.mrb[64].mxu0 %vm433_vm4, %v1075_v7 }
  0x98   : > { %2620 = vmatmul.mubr.msk.f32.gmra.mrb[64].mxu1 %vm433_vm4, %v1390_v8  ;;  %2543 = vmatprep.mubr.msk.f32.mxu0 %vm2877_vm3, %v2878_v5 }
  0x99   : > { %2622 = vmatprep.mubr.msk.f32.mxu1 %vm2877_vm3, %v2878_v5 }
  0x9b   : > { %2544 = vmatmul.mubr.msk.f32.gmra.mrb[66].mxu0 %vm433_vm4, %v1076_v9 }
  0x9c   : > { %2623 = vmatmul.mubr.msk.f32.gmra.mrb[66].mxu1 %vm433_vm4, %v1391_v10  ;;  %2546 = vmatprep.mubr.msk.f32.mxu0 %vm2877_vm3, %v2878_v5 }
  0x9d   : > { %2625 = vmatprep.mubr.msk.f32.mxu1 %vm2877_vm3, %v2878_v5 }
  0x9f   : > { %2547 = vmatmul.mubr.msk.f32.gmra.mrb[68].mxu0 %vm433_vm4, %v1077_v11 }
  0xa0   : > { %2626 = vmatmul.mubr.msk.f32.gmra.mrb[68].mxu1 %vm433_vm4, %v1392_v12  ;;  %2549 = vmatprep.mubr.msk.f32.mxu0 %vm2877_vm3, %v2878_v5 }
  0xa1   : > { %2628 = vmatprep.mubr.msk.f32.mxu1 %vm2877_vm3, %v2878_v5 }
  0xa3   : > { %2550 = vmatmul.mubr.msk.f32.gmra.mrb[70].mxu0 %vm433_vm4, %v1078_v13 }
  0xa4   : > { %2629 = vmatmul.mubr.msk.f32.gmra.mrb[70].mxu1 %vm433_vm4, %v1393_v14  ;;  %2552 = vmatprep.mubr.msk.f32.mxu0 %vm2877_vm3, %v2878_v5 }
  0xa5   : > { %2631 = vmatprep.mubr.msk.f32.mxu1 %vm2877_vm3, %v2878_v5 }
  0xa7   : > { %2553 = vmatmul.mubr.msk.f32.gmra.mrb[72].mxu0 %vm433_vm4, %v1079_v15 }
  0xa8   : > { %2632 = vmatmul.mubr.msk.f32.gmra.mrb[72].mxu1 %vm433_vm4, %v1394_v16  ;;  %2555 = vmatprep.mubr.msk.f32.mxu0 %vm2877_vm3, %v2878_v5 }
  0xa9   : > { %2634 = vmatprep.mubr.msk.f32.mxu1 %vm2877_vm3, %v2878_v5 }
  0xab   : > { %2556 = vmatmul.mubr.msk.f32.gmra.mrb[74].mxu0 %vm433_vm4, %v1080_v17 }
  0xac   : > { %2635 = vmatmul.mubr.msk.f32.gmra.mrb[74].mxu1 %vm433_vm4, %v1395_v18  ;;  %2558 = vmatprep.mubr.msk.f32.mxu0 %vm2877_vm3, %v2878_v5 }
  0xad   : > { %2637 = vmatprep.mubr.msk.f32.mxu1 %vm2877_vm3, %v2878_v5 }
  0xaf   : > { %2559 = vmatmul.mubr.msk.f32.gmra.mrb[76].mxu0 %vm433_vm4, %v1081_v19 }
  0xb0   : > { %2638 = vmatmul.mubr.msk.f32.gmra.mrb[76].mxu1 %vm433_vm4, %v1396_v20  ;;  %2561 = vmatprep.mubr.msk.f32.mxu0 %vm2877_vm3, %v2878_v5 }
  0xb1   : > { %2640 = vmatprep.mubr.msk.f32.mxu1 %vm2877_vm3, %v2878_v5 }
  0xb3   : > { %2562 = vmatmul.mubr.msk.f32.gmra.mrb[78].mxu0 %vm433_vm4, %v1082_v21 }
  0xb4   : > { %2641 = vmatmul.mubr.msk.f32.gmra.mrb[78].mxu1 %vm433_vm4, %v1397_v22  ;;  %2564 = vmatprep.mubr.msk.f32.mxu0 %vm2877_vm3, %v2878_v5 }
  0xb5   : > { %2643 = vmatprep.mubr.msk.f32.mxu1 %vm2877_vm3, %v2878_v5 }
  0xb7   : > { %2565 = vmatmul.mubr.msk.f32.gmra.mrb[80].mxu0 %vm433_vm4, %v1083_v23 }
  0xb8   : > { %2644 = vmatmul.mubr.msk.f32.gmra.mrb[80].mxu1 %vm433_vm4, %v1398_v24  ;;  %2567 = vmatprep.mubr.msk.f32.mxu0 %vm2877_vm3, %v2878_v5 }
  0xb9   : > { %2646 = vmatprep.mubr.msk.f32.mxu1 %vm2877_vm3, %v2878_v5 }
  0xbb   : > { %2568 = vmatmul.mubr.msk.f32.gmra.mrb[82].mxu0 %vm433_vm4, %v1084_v25 }
  0xbc   : > { %2647 = vmatmul.mubr.msk.f32.gmra.mrb[82].mxu1 %vm433_vm4, %v1399_v26  ;;  %2570 = vmatprep.mubr.msk.f32.mxu0 %vm2877_vm3, %v2878_v5 }
  0xbd   : > { %2649 = vmatprep.mubr.msk.f32.mxu1 %vm2877_vm3, %v2878_v5 }
  0xbf   : > { %2571 = vmatmul.mubr.msk.f32.gmra.mrb[84].mxu0 %vm433_vm4, %v1085_v27 }
  0xc0   : > { %2650 = vmatmul.mubr.msk.f32.gmra.mrb[84].mxu1 %vm433_vm4, %v1400_v28  ;;  %2573 = vmatprep.mubr.msk.f32.mxu0 %vm2877_vm3, %v2878_v5 }
  0xc1   : > { %2652 = vmatprep.mubr.msk.f32.mxu1 %vm2877_vm3, %v2878_v5 }
  0xc3   : > { %2574 = vmatmul.mubr.msk.f32.gmra.mrb[86].mxu0 %vm433_vm4, %v1086_v29 }
  0xc4   : > { %2653 = vmatmul.mubr.msk.f32.gmra.mrb[86].mxu1 %vm433_vm4, %v1401_v30  ;;  %2576 = vmatprep.mubr.msk.f32.mxu0 %vm2877_vm3, %v2878_v5 }
  0xc5   : > { %2655 = vmatprep.mubr.msk.f32.mxu1 %vm2877_vm3, %v2878_v5 }
  0xc7   : > { %2577 = vmatmul.mubr.msk.f32.gmra.mrb[88].mxu0 %vm433_vm4, %v1087_v31 }
  0xc8   : > { %2656 = vmatmul.mubr.msk.f32.gmra.mrb[88].mxu1 %vm433_vm4, %v1402_v32  ;;  %2579 = vmatprep.mubr.msk.f32.mxu0 %vm2877_vm3, %v2878_v5 }
  0xc9   : > { %2658 = vmatprep.mubr.msk.f32.mxu1 %vm2877_vm3, %v2878_v5 }
  0xcb   : > { %2580 = vmatmul.mubr.msk.f32.gmra.mrb[90].mxu0 %vm433_vm4, %v1088_v33 }
  0xcc   : > { %2659 = vmatmul.mubr.msk.f32.gmra.mrb[90].mxu1 %vm433_vm4, %v1403_v34  ;;  %2582 = vmatprep.mubr.msk.f32.mxu0 %vm2877_vm3, %v2878_v5 }
  0xcd   : > { %2661 = vmatprep.mubr.msk.f32.mxu1 %vm2877_vm3, %v2878_v5 }
  0xcf   : > { %2583 = vmatmul.mubr.msk.f32.gmra.mrb[92].mxu0 %vm433_vm4, %v1089_v35 }
  0xd0   : > { %2662 = vmatmul.mubr.msk.f32.gmra.mrb[92].mxu1 %vm433_vm4, %v1404_v36  ;;  %2585 = vmatprep.mubr.msk.f32.mxu0 %vm2877_vm3, %v2878_v5 }
  0xd1   : > { %2664 = vmatprep.mubr.msk.f32.mxu1 %vm2877_vm3, %v2878_v5 }
  0xd3   : > { %2586 = vmatmul.mubr.msk.f32.gmra.mrb[94].mxu0 %vm433_vm4, %v1090_v37 }
  0xd4   : > { %2665 = vmatmul.mubr.msk.f32.gmra.mrb[94].mxu1 %vm433_vm4, %v1405_v38  ;;  %2588 = vmatprep.mubr.msk.f32.mxu0 %vm2877_vm3, %v2878_v5 }
  0xd5   : > { %2667 = vmatprep.mubr.msk.f32.mxu1 %vm2877_vm3, %v2878_v5 }
  0xd7   : > { %2589 = vmatmul.mubr.msk.f32.gmra.mrb[96].mxu0 %vm433_vm4, %v1091_v39 }
  0xd8   : > { %2668 = vmatmul.mubr.msk.f32.gmra.mrb[96].mxu1 %vm433_vm4, %v1406_v40  ;;  %2591 = vmatprep.mubr.msk.f32.mxu0 %vm2877_vm3, %v2878_v5 }
  0xd9   : > { %2670 = vmatprep.mubr.msk.f32.mxu1 %vm2877_vm3, %v2878_v5 }
  0xdb   : > { %2592 = vmatmul.mubr.msk.f32.gmra.mrb[98].mxu0 %vm433_vm4, %v1092_v41 }
  0xdc   : > { %2671 = vmatmul.mubr.msk.f32.gmra.mrb[98].mxu1 %vm433_vm4, %v1407_v42 }
  0xea   : > { %v579_v44 = vpop.f32.mrb[0].mxu0 }
  0xeb   : > { %v894_v45 = vpop.f32.mrb[0].mxu1  ;;  %v580_v46 = vadd.f32 %v3395_v43, %v579_v44  ;;  %v2363_v48 = vpop.f32.mrb[1].mxu0 }
  0xec   : > { %v895_v47 = vadd.f32 %v3395_v43, %v894_v45  ;;  %v2442_v49 = vpop.f32.mrb[1].mxu1 }
  0xed   : > { %v703_v5 = vmax.f32 %v580_v46, 0.0 }
  0xee   : > { %v1018_v50 = vmax.f32 %v895_v47, 0.0  ;;  %v584_v51 = vpop.f32.mrb[2].mxu0 }
  0xef   : > { %v899_v52 = vpop.f32.mrb[2].mxu1  ;;  %v585_v54 = vadd.f32 %v3395_v43, %v584_v51  ;;  %v2366_v56 = vpop.f32.mrb[3].mxu0 }
  0xf0   : > { %v3399_v53 = vmax.f32 %v703_v5, %v1018_v50  ;;  %v900_v55 = vadd.f32 %v3395_v43, %v899_v52  ;;  %v2445_v57 = vpop.f32.mrb[3].mxu1 }
  0xf1   : > { %v704_v58 = vmax.f32 %v585_v54, 0.0 }
  0xf2   : > { %v1019_v59 = vmax.f32 %v900_v55, 0.0  ;;  %v589_v60 = vpop.f32.mrb[4].mxu0 }
  0xf3   : > { %v904_v61 = vpop.f32.mrb[4].mxu1  ;;  %v590_v63 = vadd.f32 %v3395_v43, %v589_v60  ;;  %v2369_v1 = vpop.f32.mrb[5].mxu0 }
  0xf4   : > { %v3403_v62 = vmax.f32 %v704_v58, %v1019_v59  ;;  %v905_v0 = vadd.f32 %v3395_v43, %v904_v61  ;;  %v2448_v2 = vpop.f32.mrb[5].mxu1 }
  0xf5   : > { %v705_v3 = vmax.f32 %v590_v63, 0.0 }
  0xf6   : > { %v1020_v4 = vmax.f32 %v905_v0, 0.0  ;;  %v594_v6 = vpop.f32.mrb[6].mxu0 }
  0xf7   : > { %v909_v7 = vpop.f32.mrb[6].mxu1  ;;  %v595_v9 = vadd.f32 %v3395_v43, %v594_v6  ;;  %v2372_v11 = vpop.f32.mrb[7].mxu0 }
  0xf8   : > { %v3407_v8 = vmax.f32 %v705_v3, %v1020_v4  ;;  %v910_v10 = vadd.f32 %v3395_v43, %v909_v7  ;;  %v2451_v12 = vpop.f32.mrb[7].mxu1 }
  0xf9   : > { %v706_v13 = vmax.f32 %v595_v9, 0.0 }
  0xfa   : > { %v1021_v14 = vmax.f32 %v910_v10, 0.0  ;;  %v599_v15 = vpop.f32.mrb[8].mxu0 }
  0xfb   : > { %v914_v16 = vpop.f32.mrb[8].mxu1  ;;  %v600_v18 = vadd.f32 %v3395_v43, %v599_v15  ;;  %v2375_v20 = vpop.f32.mrb[9].mxu0 }
  0xfc   : > { %v3411_v17 = vmax.f32 %v706_v13, %v1021_v14  ;;  %v915_v19 = vadd.f32 %v3395_v43, %v914_v16  ;;  %v2454_v21 = vpop.f32.mrb[9].mxu1 }
  0xfd   : > { %v707_v22 = vmax.f32 %v600_v18, 0.0 }
  0xfe   : > { %v1022_v23 = vmax.f32 %v915_v19, 0.0  ;;  %v604_v24 = vpop.f32.mrb[10].mxu0 }
  0xff   : > { %v919_v25 = vpop.f32.mrb[10].mxu1  ;;  %v605_v27 = vadd.f32 %v3395_v43, %v604_v24  ;;  %v2378_v29 = vpop.f32.mrb[11].mxu0 }
 0x100   : > { %v3415_v26 = vmax.f32 %v707_v22, %v1022_v23  ;;  %v920_v28 = vadd.f32 %v3395_v43, %v919_v25  ;;  %v2457_v30 = vpop.f32.mrb[11].mxu1 }
 0x101   : > { %v708_v31 = vmax.f32 %v605_v27, 0.0 }
 0x102   : > { %v1023_v32 = vmax.f32 %v920_v28, 0.0  ;;  %v609_v33 = vpop.f32.mrb[12].mxu0 }
 0x103   : > { %v924_v34 = vpop.f32.mrb[12].mxu1  ;;  %v610_v36 = vadd.f32 %v3395_v43, %v609_v33  ;;  %v2381_v38 = vpop.f32.mrb[13].mxu0 }
 0x104   : > { %v3419_v35 = vmax.f32 %v708_v31, %v1023_v32  ;;  %v925_v37 = vadd.f32 %v3395_v43, %v924_v34  ;;  %v2460_v39 = vpop.f32.mrb[13].mxu1 }
 0x105   : > { %v709_v40 = vmax.f32 %v610_v36, 0.0 }
 0x106   : > { %v1024_v41 = vmax.f32 %v925_v37, 0.0  ;;  %v614_v42 = vpop.f32.mrb[14].mxu0 }
 0x107   : > { %v929_v44 = vpop.f32.mrb[14].mxu1  ;;  %v615_v46 = vadd.f32 %v3395_v43, %v614_v42  ;;  %v2384_v48 = vpop.f32.mrb[15].mxu0 }
 0x108   : > { %v3423_v45 = vmax.f32 %v709_v40, %v1024_v41  ;;  %v930_v47 = vadd.f32 %v3395_v43, %v929_v44  ;;  %v2463_v49 = vpop.f32.mrb[15].mxu1 }
 0x109   : > { %v710_v5 = vmax.f32 %v615_v46, 0.0 }
 0x10a   : > { %v1025_v50 = vmax.f32 %v930_v47, 0.0  ;;  %v619_v51 = vpop.f32.mrb[16].mxu0 }
 0x10b   : > { %v934_v52 = vpop.f32.mrb[16].mxu1  ;;  %v620_v55 = vadd.f32 %v3395_v43, %v619_v51  ;;  %v2387_v57 = vpop.f32.mrb[17].mxu0 }
 0x10c   : > { %v3427_v54 = vmax.f32 %v710_v5, %v1025_v50  ;;  %v935_v56 = vadd.f32 %v3395_v43, %v934_v52  ;;  %v2466_v58 = vpop.f32.mrb[17].mxu1 }
 0x10d   : > { %v711_v59 = vmax.f32 %v620_v55, 0.0 }
 0x10e   : > { %v1026_v60 = vmax.f32 %v935_v56, 0.0  ;;  %v624_v61 = vpop.f32.mrb[18].mxu0 }
 0x10f   : > { %v939_v63 = vpop.f32.mrb[18].mxu1  ;;  %v625_v1 = vadd.f32 %v3395_v43, %v624_v61  ;;  %v2390_v3 = vpop.f32.mrb[19].mxu0 }
 0x110   : > { %v3431_v0 = vmax.f32 %v711_v59, %v1026_v60  ;;  %v940_v2 = vadd.f32 %v3395_v43, %v939_v63  ;;  %v2469_v4 = vpop.f32.mrb[19].mxu1 }
 0x111   : > { %v712_v6 = vmax.f32 %v625_v1, 0.0 }
 0x112   : > { %v1027_v7 = vmax.f32 %v940_v2, 0.0  ;;  %v629_v9 = vpop.f32.mrb[20].mxu0 }
 0x113   : > { %v944_v10 = vpop.f32.mrb[20].mxu1  ;;  %v630_v12 = vadd.f32 %v3395_v43, %v629_v9  ;;  %v2393_v14 = vpop.f32.mrb[21].mxu0 }
 0x114   : > { %v3435_v11 = vmax.f32 %v712_v6, %v1027_v7  ;;  %v945_v13 = vadd.f32 %v3395_v43, %v944_v10  ;;  %v2472_v15 = vpop.f32.mrb[21].mxu1 }
 0x115   : > { %v713_v16 = vmax.f32 %v630_v12, 0.0 }
 0x116   : > { %v1028_v18 = vmax.f32 %v945_v13, 0.0  ;;  %v634_v19 = vpop.f32.mrb[22].mxu0 }
 0x117   : > { %v949_v20 = vpop.f32.mrb[22].mxu1  ;;  %v635_v22 = vadd.f32 %v3395_v43, %v634_v19  ;;  %v2396_v24 = vpop.f32.mrb[23].mxu0 }
 0x118   : > { %v3439_v21 = vmax.f32 %v713_v16, %v1028_v18  ;;  %v950_v23 = vadd.f32 %v3395_v43, %v949_v20  ;;  %v2475_v25 = vpop.f32.mrb[23].mxu1 }
 0x119   : > { %v714_v27 = vmax.f32 %v635_v22, 0.0 }
 0x11a   : > { %v1029_v28 = vmax.f32 %v950_v23, 0.0  ;;  %v639_v29 = vpop.f32.mrb[24].mxu0 }
 0x11b   : > { %v954_v30 = vpop.f32.mrb[24].mxu1  ;;  %v640_v32 = vadd.f32 %v3395_v43, %v639_v29  ;;  %v2399_v34 = vpop.f32.mrb[25].mxu0 }
 0x11c   : > { %v3443_v31 = vmax.f32 %v714_v27, %v1029_v28  ;;  %v955_v33 = vadd.f32 %v3395_v43, %v954_v30  ;;  %v2478_v36 = vpop.f32.mrb[25].mxu1 }
 0x11d   : > { %v715_v37 = vmax.f32 %v640_v32, 0.0 }
 0x11e   : > { %v1030_v38 = vmax.f32 %v955_v33, 0.0  ;;  %v644_v39 = vpop.f32.mrb[26].mxu0 }
 0x11f   : > { %v959_v40 = vpop.f32.mrb[26].mxu1  ;;  %v645_v42 = vadd.f32 %v3395_v43, %v644_v39  ;;  %v2402_v46 = vpop.f32.mrb[27].mxu0 }
 0x120   : > { %v3447_v41 = vmax.f32 %v715_v37, %v1030_v38  ;;  %v960_v44 = vadd.f32 %v3395_v43, %v959_v40  ;;  %v2481_v47 = vpop.f32.mrb[27].mxu1 }
 0x121   : > { %v716_v48 = vmax.f32 %v645_v42, 0.0 }
 0x122   : > { %v1031_v49 = vmax.f32 %v960_v44, 0.0  ;;  %v649_v5 = vpop.f32.mrb[28].mxu0 }
 0x123   : > { %v964_v50 = vpop.f32.mrb[28].mxu1  ;;  %v650_v52 = vadd.f32 %v3395_v43, %v649_v5  ;;  %v2405_v56 = vpop.f32.mrb[29].mxu0 }
 0x124   : > { %v3451_v51 = vmax.f32 %v716_v48, %v1031_v49  ;;  %v965_v55 = vadd.f32 %v3395_v43, %v964_v50  ;;  %v2484_v57 = vpop.f32.mrb[29].mxu1 }
 0x125   : > { %v717_v58 = vmax.f32 %v650_v52, 0.0 }
 0x126   : > { %v1032_v59 = vmax.f32 %v965_v55, 0.0  ;;  %v654_v60 = vpop.f32.mrb[30].mxu0 }
 0x127   : > { %v969_v61 = vpop.f32.mrb[30].mxu1  ;;  %v655_v1 = vadd.f32 %v3395_v43, %v654_v60  ;;  %v2408_v3 = vpop.f32.mrb[31].mxu0 }
 0x128   : > { %v3455_v63 = vmax.f32 %v717_v58, %v1032_v59  ;;  %v970_v2 = vadd.f32 %v3395_v43, %v969_v61  ;;  %v2487_v4 = vpop.f32.mrb[31].mxu1 }
 0x129   : > { %v718_v6 = vmax.f32 %v655_v1, 0.0 }
 0x12a   : > { %v1033_v7 = vmax.f32 %v970_v2, 0.0  ;;  %v659_v9 = vpop.f32.mrb[32].mxu0 }
 0x12b   : > { %v974_v10 = vpop.f32.mrb[32].mxu1  ;;  %v660_v13 = vadd.f32 %v3395_v43, %v659_v9  ;;  %v2411_v15 = vpop.f32.mrb[33].mxu0 }
 0x12c   : > { %v3459_v12 = vmax.f32 %v718_v6, %v1033_v7  ;;  %v975_v14 = vadd.f32 %v3395_v43, %v974_v10  ;;  %v2490_v16 = vpop.f32.mrb[33].mxu1 }
 0x12d   : > { %v719_v18 = vmax.f32 %v660_v13, 0.0 }
 0x12e   : > { %v1034_v19 = vmax.f32 %v975_v14, 0.0  ;;  %v664_v20 = vpop.f32.mrb[34].mxu0 }
 0x12f   : > { %v979_v22 = vpop.f32.mrb[34].mxu1  ;;  %v665_v24 = vadd.f32 %v3395_v43, %v664_v20  ;;  %v2414_v27 = vpop.f32.mrb[35].mxu0 }
 0x130   : > { %v3463_v23 = vmax.f32 %v719_v18, %v1034_v19  ;;  %v980_v25 = vadd.f32 %v3395_v43, %v979_v22  ;;  %v2493_v28 = vpop.f32.mrb[35].mxu1 }
 0x131   : > { %v720_v29 = vmax.f32 %v665_v24, 0.0 }
 0x132   : > { %v1035_v30 = vmax.f32 %v980_v25, 0.0  ;;  %v669_v32 = vpop.f32.mrb[36].mxu0 }
 0x133   : > { %v984_v33 = vpop.f32.mrb[36].mxu1  ;;  %v670_v36 = vadd.f32 %v3395_v43, %v669_v32  ;;  %v2417_v38 = vpop.f32.mrb[37].mxu0 }
 0x134   : > { %v3467_v34 = vmax.f32 %v720_v29, %v1035_v30  ;;  %v985_v37 = vadd.f32 %v3395_v43, %v984_v33  ;;  %v2496_v39 = vpop.f32.mrb[37].mxu1 }
 0x135   : > { %v721_v40 = vmax.f32 %v670_v36, 0.0 }
 0x136   : > { %v1036_v42 = vmax.f32 %v985_v37, 0.0  ;;  %v674_v44 = vpop.f32.mrb[38].mxu0 }
 0x137   : > { %v989_v46 = vpop.f32.mrb[38].mxu1  ;;  %v675_v48 = vadd.f32 %v3395_v43, %v674_v44  ;;  %v2420_v5 = vpop.f32.mrb[39].mxu0 }
 0x138   : > { %v3471_v47 = vmax.f32 %v721_v40, %v1036_v42  ;;  %v990_v49 = vadd.f32 %v3395_v43, %v989_v46  ;;  %v2499_v50 = vpop.f32.mrb[39].mxu1 }
 0x139   : > { %v722_v52 = vmax.f32 %v675_v48, 0.0 }
 0x13a   : > { %v1037_v55 = vmax.f32 %v990_v49, 0.0  ;;  %v679_v56 = vpop.f32.mrb[40].mxu0 }
 0x13b   : > { %v994_v57 = vpop.f32.mrb[40].mxu1  ;;  %v680_v59 = vadd.f32 %v3395_v43, %v679_v56  ;;  %v2423_v61 = vpop.f32.mrb[41].mxu0 }
 0x13c   : > { %v3475_v58 = vmax.f32 %v722_v52, %v1037_v55  ;;  %v995_v60 = vadd.f32 %v3395_v43, %v994_v57  ;;  %v2502_v1 = vpop.f32.mrb[41].mxu1 }
 0x13d   : > { %v723_v2 = vmax.f32 %v680_v59, 0.0 }
 0x13e   : > { %v1038_v3 = vmax.f32 %v995_v60, 0.0  ;;  %v684_v4 = vpop.f32.mrb[42].mxu0 }
 0x13f   : > { %v999_v6 = vpop.f32.mrb[42].mxu1  ;;  %v685_v9 = vadd.f32 %v3395_v43, %v684_v4  ;;  %v2426_v13 = vpop.f32.mrb[43].mxu0 }
 0x140   : > { %v3479_v7 = vmax.f32 %v723_v2, %v1038_v3  ;;  %v1000_v10 = vadd.f32 %v3395_v43, %v999_v6  ;;  %v2505_v14 = vpop.f32.mrb[43].mxu1 }
 0x141   : > { %v724_v15 = vmax.f32 %v685_v9, 0.0 }
 0x142   : > { %v1039_v16 = vmax.f32 %v1000_v10, 0.0  ;;  %v689_v18 = vpop.f32.mrb[44].mxu0 }
 0x143   : > { %v1004_v19 = vpop.f32.mrb[44].mxu1  ;;  %v690_v22 = vadd.f32 %v3395_v43, %v689_v18  ;;  %v2429_v25 = vpop.f32.mrb[45].mxu0 }
 0x144   : > { %v3483_v20 = vmax.f32 %v724_v15, %v1039_v16  ;;  %v1005_v24 = vadd.f32 %v3395_v43, %v1004_v19  ;;  %v2508_v27 = vpop.f32.mrb[45].mxu1 }
 0x145   : > { %v725_v28 = vmax.f32 %v690_v22, 0.0 }
 0x146   : > { %v1040_v29 = vmax.f32 %v1005_v24, 0.0  ;;  %v694_v30 = vpop.f32.mrb[46].mxu0 }
 0x147   : > { %v1009_v32 = vpop.f32.mrb[46].mxu1  ;;  %v695_v36 = vadd.f32 %v3395_v43, %v694_v30  ;;  %v2432_v38 = vpop.f32.mrb[47].mxu0 }
 0x148   : > { %v3487_v33 = vmax.f32 %v725_v28, %v1040_v29  ;;  %v1010_v37 = vadd.f32 %v3395_v43, %v1009_v32  ;;  %v2511_v39 = vpop.f32.mrb[47].mxu1 }
 0x149   : > { %v726_v40 = vmax.f32 %v695_v36, 0.0 }
 0x14a   : > { %v1041_v42 = vmax.f32 %v1010_v37, 0.0  ;;  %v699_v44 = vpop.f32.mrb[48].mxu0 }
 0x14b   : > { %v1014_v46 = vpop.f32.mrb[48].mxu1  ;;  %v700_v49 = vadd.f32 %v3395_v43, %v699_v44  ;;  %v2435_v50 = vpop.f32.mrb[49].mxu0 }
 0x14c   : > { %v3491_v48 = vmax.f32 %v726_v40, %v1041_v42  ;;  %v1015_v5 = vadd.f32 %v3395_v43, %v1014_v46  ;;  %v2514_v52 = vpop.f32.mrb[49].mxu1 }
 0x14d   : > { %v727_v55 = vmax.f32 %v700_v49, 0.0 }
 0x14e   : > { %v1042_v56 = vmax.f32 %v1015_v5, 0.0  ;;  %v1234_v57 = vpop.f32.mrb[50].mxu0 }
 0x14f   : > { %v1549_v59 = vpop.f32.mrb[50].mxu1  ;;  %v1235_v61 = vadd.f32 %v3395_v43, %v1234_v57  ;;  %v2521_v2 = vpop.f32.mrb[51].mxu0 }
 0x150   : > { %v3496_v60 = vmax.f32 %v727_v55, %v1042_v56  ;;  %v1550_v1 = vadd.f32 %v3395_v43, %v1549_v59  ;;  %v2600_v3 = vpop.f32.mrb[51].mxu1 }
 0x151   : > { %v1358_v4 = vmax.f32 %v1235_v61, 0.0 }
 0x152   : > { %v1673_v6 = vmax.f32 %v1550_v1, 0.0  ;;  %v1239_v9 = vpop.f32.mrb[52].mxu0 }
 0x153   : > { %v1554_v10 = vpop.f32.mrb[52].mxu1  ;;  %v1240_v14 = vadd.f32 %v3395_v43, %v1239_v9  ;;  %v2524_v16 = vpop.f32.mrb[53].mxu0 }
 0x154   : > { %v1698_v13 = vmax.f32 %v1358_v4, %v1673_v6  ;;  %v1555_v15 = vadd.f32 %v3395_v43, %v1554_v10  ;;  %v2603_v18 = vpop.f32.mrb[53].mxu1 }
 0x155   : > { %v1359_v22 = vmax.f32 %v1240_v14, 0.0 }
 0x156   : > { %v1723_v19 = vmax.f32 %v3399_v53, %v1698_v13  ;;  %v1674_v24 = vmax.f32 %v1555_v15, 0.0  ;;  %v1244_v25 = vpop.f32.mrb[54].mxu0 }
 0x157   : > { %v1559_v27 = vpop.f32.mrb[54].mxu1  ;;  %v1245_v29 = vadd.f32 %v3395_v43, %v1244_v25  ;;  %v2527_v32 = vpop.f32.mrb[55].mxu0 }
 0x158   : > { %1749 = vst.msk [vmem:[%s3503_s21] sm:$0xff] %vm1748_vm5, %v1723_v19  ;;  %v1699_v28 = vmax.f32 %v1359_v22, %v1674_v24  ;;  %v1560_v30 = vadd.f32 %v3395_v43, %v1559_v27  ;;  %v2606_v36 = vpop.f32.mrb[55].mxu1 }
 0x159   : > { %v1360_v53 = vmax.f32 %v1245_v29, 0.0 }
 0x15a   : > { %v1724_v37 = vmax.f32 %v3403_v62, %v1699_v28  ;;  %v1675_v38 = vmax.f32 %v1560_v30, 0.0  ;;  %v1249_v39 = vpop.f32.mrb[56].mxu0 }
 0x15b   : > { %v1564_v40 = vpop.f32.mrb[56].mxu1  ;;  %v1250_v44 = vadd.f32 %v3395_v43, %v1249_v39  ;;  %v2530_v49 = vpop.f32.mrb[57].mxu0 }
 0x15c   : > { %1750 = vst.msk [vmem:[%s3503_s21 + $0x8] sm:$0xff] %vm1748_vm5, %v1724_v37  ;;  %v1700_v42 = vmax.f32 %v1360_v53, %v1675_v38  ;;  %v1565_v46 = vadd.f32 %v3395_v43, %v1564_v40  ;;  %v2609_v5 = vpop.f32.mrb[57].mxu1 }
 0x15d   : > { %v1361_v52 = vmax.f32 %v1250_v44, 0.0 }
 0x15e   : > { %v1725_v50 = vmax.f32 %v3407_v8, %v1700_v42  ;;  %v1676_v55 = vmax.f32 %v1565_v46, 0.0  ;;  %v1254_v62 = vpop.f32.mrb[58].mxu0 }
 0x15f   : > { %v1569_v56 = vpop.f32.mrb[58].mxu1  ;;  %v1255_v59 = vadd.f32 %v3395_v43, %v1254_v62  ;;  %v2533_v1 = vpop.f32.mrb[59].mxu0 }
 0x160   : > { %1751 = vst.msk [vmem:[%s3503_s21 + $0x10] sm:$0xff] %vm1748_vm5, %v1725_v50  ;;  %v1701_v57 = vmax.f32 %v1361_v52, %v1676_v55  ;;  %v1570_v61 = vadd.f32 %v3395_v43, %v1569_v56  ;;  %v2612_v2 = vpop.f32.mrb[59].mxu1 }
 0x161   : > { %v1362_v4 = vmax.f32 %v1255_v59, 0.0 }
 0x162   : > { %v1726_v3 = vmax.f32 %v3411_v17, %v1701_v57  ;;  %v1677_v6 = vmax.f32 %v1570_v61, 0.0  ;;  %v1259_v8 = vpop.f32.mrb[60].mxu0 }
 0x163   : > { %v1574_v9 = vpop.f32.mrb[60].mxu1  ;;  %v1260_v13 = vadd.f32 %v3395_v43, %v1259_v8  ;;  %v2536_v15 = vpop.f32.mrb[61].mxu0 }
 0x164   : > { %1752 = vst.msk [vmem:[%s3503_s21 + $0x18] sm:$0xff] %vm1748_vm5, %v1726_v3  ;;  %v1702_v10 = vmax.f32 %v1362_v4, %v1677_v6  ;;  %v1575_v14 = vadd.f32 %v3395_v43, %v1574_v9  ;;  %v2615_v16 = vpop.f32.mrb[61].mxu1 }
 0x165   : > { %v1363_v19 = vmax.f32 %v1260_v13, 0.0 }
 0x166   : > { %v1727_v18 = vmax.f32 %v3415_v26, %v1702_v10  ;;  %v1678_v22 = vmax.f32 %v1575_v14, 0.0  ;;  %v1264_v17 = vpop.f32.mrb[62].mxu0 }
 0x167   : > { %v1579_v24 = vpop.f32.mrb[62].mxu1  ;;  %v1265_v27 = vadd.f32 %v3395_v43, %v1264_v17  ;;  %v2539_v29 = vpop.f32.mrb[63].mxu0 }
 0x168   : > { %1753 = vst.msk [vmem:[%s3503_s21 + $0x20] sm:$0xff] %vm1748_vm5, %v1727_v18  ;;  %v1703_v25 = vmax.f32 %v1363_v19, %v1678_v22  ;;  %v1580_v28 = vadd.f32 %v3395_v43, %v1579_v24  ;;  %v2618_v30 = vpop.f32.mrb[63].mxu1 }
 0x169   : > { %v1364_v36 = vmax.f32 %v1265_v27, 0.0 }
 0x16a   : > { %v1728_v32 = vmax.f32 %v3419_v35, %v1703_v25  ;;  %v1679_v37 = vmax.f32 %v1580_v28, 0.0  ;;  %v1269_v26 = vpop.f32.mrb[64].mxu0 }
 0x16b   : > { %v1584_v53 = vpop.f32.mrb[64].mxu1  ;;  %v1270_v39 = vadd.f32 %v3395_v43, %v1269_v26  ;;  %v2542_v42 = vpop.f32.mrb[65].mxu0 }
 0x16c   : > { %1754 = vst.msk [vmem:[%s3503_s21 + $0x28] sm:$0xff] %vm1748_vm5, %v1728_v32  ;;  %v1704_v38 = vmax.f32 %v1364_v36, %v1679_v37  ;;  %v1585_v40 = vadd.f32 %v3395_v43, %v1584_v53  ;;  %v2621_v44 = vpop.f32.mrb[65].mxu1 }
 0x16d   : > { %v1365_v49 = vmax.f32 %v1270_v39, 0.0 }
 0x16e   : > { %v1729_v46 = vmax.f32 %v3423_v45, %v1704_v38  ;;  %v1680_v5 = vmax.f32 %v1585_v40, 0.0  ;;  %v1274_v35 = vpop.f32.mrb[66].mxu0 }
 0x16f   : > { %v1589_v50 = vpop.f32.mrb[66].mxu1  ;;  %v1275_v55 = vadd.f32 %v3395_v43, %v1274_v35  ;;  %v2545_v56 = vpop.f32.mrb[67].mxu0 }
 0x170   : > { %1755 = vst.msk [vmem:[%s3503_s21 + $0x30] sm:$0xff] %vm1748_vm5, %v1729_v46  ;;  %v1705_v52 = vmax.f32 %v1365_v49, %v1680_v5  ;;  %v1590_v62 = vadd.f32 %v3395_v43, %v1589_v50  ;;  %v2624_v57 = vpop.f32.mrb[67].mxu1 }
 0x171   : > { %v1366_v61 = vmax.f32 %v1275_v55, 0.0 }
 0x172   : > { %v1730_v59 = vmax.f32 %v3427_v54, %v1705_v52  ;;  %v1681_v1 = vmax.f32 %v1590_v62, 0.0  ;;  %v1279_v45 = vpop.f32.mrb[68].mxu0 }
 0x173   : > { %v1594_v2 = vpop.f32.mrb[68].mxu1  ;;  %v1280_v4 = vadd.f32 %v3395_v43, %v1279_v45  ;;  %v2548_v8 = vpop.f32.mrb[69].mxu0 }
 0x174   : > { %1756 = vst.msk [vmem:[%s3503_s21 + $0x38] sm:$0xff] %vm1748_vm5, %v1730_v59  ;;  %v1706_v3 = vmax.f32 %v1366_v61, %v1681_v1  ;;  %v1595_v6 = vadd.f32 %v3395_v43, %v1594_v2  ;;  %v2627_v9 = vpop.f32.mrb[69].mxu1 }
 0x175   : > { %v1367_v13 = vmax.f32 %v1280_v4, 0.0 }
 0x176   : > { %v1731_v10 = vmax.f32 %v3431_v0, %v1706_v3  ;;  %v1682_v14 = vmax.f32 %v1595_v6, 0.0  ;;  %v1284_v54 = vpop.f32.mrb[70].mxu0 }
 0x177   : > { %v1599_v15 = vpop.f32.mrb[70].mxu1  ;;  %v1285_v18 = vadd.f32 %v3395_v43, %v1284_v54  ;;  %v2551_v22 = vpop.f32.mrb[71].mxu0 }
 0x178   : > { %1757 = vst.msk [vmem:[%s3503_s21 + $0x40] sm:$0xff] %vm1748_vm5, %v1731_v10  ;;  %v1707_v16 = vmax.f32 %v1367_v13, %v1682_v14  ;;  %v1600_v19 = vadd.f32 %v3395_v43, %v1599_v15  ;;  %v2630_v17 = vpop.f32.mrb[71].mxu1 }
 0x179   : > { %v1368_v25 = vmax.f32 %v1285_v18, 0.0 }
 0x17a   : > { %v1732_v24 = vmax.f32 %v3435_v11, %v1707_v16  ;;  %v1683_v27 = vmax.f32 %v1600_v19, 0.0  ;;  %v1289_v0 = vpop.f32.mrb[72].mxu0 }
 0x17b   : > { %v1604_v28 = vpop.f32.mrb[72].mxu1  ;;  %v1290_v30 = vadd.f32 %v3395_v43, %v1289_v0  ;;  %v2554_v36 = vpop.f32.mrb[73].mxu0 }
 0x17c   : > { %1758 = vst.msk [vmem:[%s3503_s21 + $0x48] sm:$0xff] %vm1748_vm5, %v1732_v24  ;;  %v1708_v29 = vmax.f32 %v1368_v25, %v1683_v27  ;;  %v1605_v32 = vadd.f32 %v3395_v43, %v1604_v28  ;;  %v2633_v37 = vpop.f32.mrb[73].mxu1 }
 0x17d   : > { %v1369_v53 = vmax.f32 %v1290_v30, 0.0 }
 0x17e   : > { %v1733_v26 = vmax.f32 %v3439_v21, %v1708_v29  ;;  %v1684_v38 = vmax.f32 %v1605_v32, 0.0  ;;  %v1294_v11 = vpop.f32.mrb[74].mxu0 }
 0x17f   : > { %v1609_v39 = vpop.f32.mrb[74].mxu1  ;;  %v1295_v42 = vadd.f32 %v3395_v43, %v1294_v11  ;;  %v2557_v46 = vpop.f32.mrb[75].mxu0 }
 0x180   : > { %1759 = vst.msk [vmem:[%s3503_s21 + $0x50] sm:$0xff] %vm1748_vm5, %v1733_v26  ;;  %v1709_v40 = vmax.f32 %v1369_v53, %v1684_v38  ;;  %v1610_v44 = vadd.f32 %v3395_v43, %v1609_v39  ;;  %v2636_v49 = vpop.f32.mrb[75].mxu1 }
 0x181   : > { %v1370_v35 = vmax.f32 %v1295_v42, 0.0 }
 0x182   : > { %v1734_v5 = vmax.f32 %v3443_v31, %v1709_v40  ;;  %v1685_v50 = vmax.f32 %v1610_v44, 0.0  ;;  %v1299_v21 = vpop.f32.mrb[76].mxu0 }
 0x183   : > { %v1614_v52 = vpop.f32.mrb[76].mxu1  ;;  %v1300_v62 = vadd.f32 %v3395_v43, %v1299_v21  ;;  %v2560_v57 = vpop.f32.mrb[77].mxu0 }
 0x184   : > { %1760 = vst.msk [vmem:[%s3503_s21 + $0x58] sm:$0xff] %vm1748_vm5, %v1734_v5  ;;  %v1710_v55 = vmax.f32 %v1370_v35, %v1685_v50  ;;  %v1615_v56 = vadd.f32 %v3395_v43, %v1614_v52  ;;  %v2639_v59 = vpop.f32.mrb[77].mxu1 }
 0x185   : > { %v1371_v1 = vmax.f32 %v1300_v62, 0.0 }
 0x186   : > { %v1735_v61 = vmax.f32 %v3447_v41, %v1710_v55  ;;  %v1686_v45 = vmax.f32 %v1615_v56, 0.0  ;;  %v1304_v31 = vpop.f32.mrb[78].mxu0 }
 0x187   : > { %v1619_v2 = vpop.f32.mrb[78].mxu1  ;;  %v1305_v4 = vadd.f32 %v3395_v43, %v1304_v31  ;;  %v2563_v8 = vpop.f32.mrb[79].mxu0 }
 0x188   : > { %1761 = vst.msk [vmem:[%s3503_s21 + $0x60] sm:$0xff] %vm1748_vm5, %v1735_v61  ;;  %v1711_v3 = vmax.f32 %v1371_v1, %v1686_v45  ;;  %v1620_v6 = vadd.f32 %v3395_v43, %v1619_v2  ;;  %v2642_v9 = vpop.f32.mrb[79].mxu1 }
 0x189   : > { %v1372_v13 = vmax.f32 %v1305_v4, 0.0 }
 0x18a   : > { %v1736_v10 = vmax.f32 %v3451_v51, %v1711_v3  ;;  %v1687_v14 = vmax.f32 %v1620_v6, 0.0  ;;  %v1309_v41 = vpop.f32.mrb[80].mxu0 }
 0x18b   : > { %v1624_v54 = vpop.f32.mrb[80].mxu1  ;;  %v1310_v16 = vadd.f32 %v3395_v43, %v1309_v41  ;;  %v2566_v19 = vpop.f32.mrb[81].mxu0 }
 0x18c   : > { %1762 = vst.msk [vmem:[%s3503_s21 + $0x68] sm:$0xff] %vm1748_vm5, %v1736_v10  ;;  %v1712_v15 = vmax.f32 %v1372_v13, %v1687_v14  ;;  %v1625_v18 = vadd.f32 %v3395_v43, %v1624_v54  ;;  %v2645_v22 = vpop.f32.mrb[81].mxu1 }
 0x18d   : > { %v1373_v24 = vmax.f32 %v1310_v16, 0.0 }
 0x18e   : > { %v1737_v17 = vmax.f32 %v3455_v63, %v1712_v15  ;;  %v1688_v25 = vmax.f32 %v1625_v18, 0.0  ;;  %v1314_v51 = vpop.f32.mrb[82].mxu0 }
 0x18f   : > { %v1629_v27 = vpop.f32.mrb[82].mxu1  ;;  %v1315_v28 = vadd.f32 %v3395_v43, %v1314_v51  ;;  %v2569_v30 = vpop.f32.mrb[83].mxu0 }
 0x190   : > { %1763 = vst.msk [vmem:[%s3503_s21 + $0x70] sm:$0xff] %vm1748_vm5, %v1737_v17  ;;  %v1713_v0 = vmax.f32 %v1373_v24, %v1688_v25  ;;  %v1630_v29 = vadd.f32 %v3395_v43, %v1629_v27  ;;  %v2648_v32 = vpop.f32.mrb[83].mxu1 }
 0x191   : > { %v1374_v37 = vmax.f32 %v1315_v28, 0.0 }
 0x192   : > { %v1738_v36 = vmax.f32 %v3459_v12, %v1713_v0  ;;  %v1689_v26 = vmax.f32 %v1630_v29, 0.0  ;;  %v1319_v63 = vpop.f32.mrb[84].mxu0 }
 0x193   : > { %v1634_v53 = vpop.f32.mrb[84].mxu1  ;;  %v1320_v11 = vadd.f32 %v3395_v43, %v1319_v63  ;;  %v2572_v40 = vpop.f32.mrb[85].mxu0 }
 0x194   : > { %1764 = vst.msk [vmem:[%s3503_s21 + $0x78] sm:$0xff] %vm1748_vm5, %v1738_v36  ;;  %v1714_v38 = vmax.f32 %v1374_v37, %v1689_v26  ;;  %v1635_v39 = vadd.f32 %v3395_v43, %v1634_v53  ;;  %v2651_v42 = vpop.f32.mrb[85].mxu1 }
 0x195   : > { %v1375_v46 = vmax.f32 %v1320_v11, 0.0 }
 0x196   : > { %v1739_v44 = vmax.f32 %v3463_v23, %v1714_v38  ;;  %v1690_v49 = vmax.f32 %v1635_v39, 0.0  ;;  %v1324_v12 = vpop.f32.mrb[86].mxu0 }
 0x197   : > { %v1639_v5 = vpop.f32.mrb[86].mxu1  ;;  %v1325_v50 = vadd.f32 %v3395_v43, %v1324_v12  ;;  %v2575_v52 = vpop.f32.mrb[87].mxu0 }
 0x198   : > { %1765 = vst.msk [vmem:[%s3503_s21 + $0x80] sm:$0xff] %vm1748_vm5, %v1739_v44  ;;  %v1715_v35 = vmax.f32 %v1375_v46, %v1690_v49  ;;  %v1640_v21 = vadd.f32 %v3395_v43, %v1639_v5  ;;  %v2654_v55 = vpop.f32.mrb[87].mxu1 }
 0x199   : > { %v1376_v56 = vmax.f32 %v1325_v50, 0.0 }
 0x19a   : > { %v1740_v62 = vmax.f32 %v3467_v34, %v1715_v35  ;;  %v1691_v57 = vmax.f32 %v1640_v21, 0.0  ;;  %v1329_v23 = vpop.f32.mrb[88].mxu0 }
 0x19b   : > { %v1644_v59 = vpop.f32.mrb[88].mxu1  ;;  %v1330_v1 = vadd.f32 %v3395_v43, %v1329_v23  ;;  %v2578_v31 = vpop.f32.mrb[89].mxu0 }
 0x19c   : > { %1766 = vst.msk [vmem:[%s3503_s21 + $0x88] sm:$0xff] %vm1748_vm5, %v1740_v62  ;;  %v1716_v61 = vmax.f32 %v1376_v56, %v1691_v57  ;;  %v1645_v45 = vadd.f32 %v3395_v43, %v1644_v59  ;;  %v2657_v2 = vpop.f32.mrb[89].mxu1 }
 0x19d   : > { %v1377_v4 = vmax.f32 %v1330_v1, 0.0 }
 0x19e   : > { %v1741_v3 = vmax.f32 %v3471_v47, %v1716_v61  ;;  %v1692_v6 = vmax.f32 %v1645_v45, 0.0  ;;  %v1334_v34 = vpop.f32.mrb[90].mxu0 }
 0x19f   : > { %v1649_v8 = vpop.f32.mrb[90].mxu1  ;;  %v1335_v10 = vadd.f32 %v3395_v43, %v1334_v34  ;;  %v2581_v14 = vpop.f32.mrb[91].mxu0 }
 0x1a0   : > { %1767 = vst.msk [vmem:[%s3503_s21 + $0x90] sm:$0xff] %vm1748_vm5, %v1741_v3  ;;  %v1717_v9 = vmax.f32 %v1377_v4, %v1692_v6  ;;  %v1650_v13 = vadd.f32 %v3395_v43, %v1649_v8  ;;  %v2660_v41 = vpop.f32.mrb[91].mxu1 }
 0x1a1   : > { %v1378_v15 = vmax.f32 %v1335_v10, 0.0 }
 0x1a2   : > { %v1742_v54 = vmax.f32 %v3475_v58, %v1717_v9  ;;  %v1693_v16 = vmax.f32 %v1650_v13, 0.0  ;;  %v1339_v47 = vpop.f32.mrb[92].mxu0 }
 0x1a3   : > { %v1654_v18 = vpop.f32.mrb[92].mxu1  ;;  %v1340_v22 = vadd.f32 %v3395_v43, %v1339_v47  ;;  %v2584_v24 = vpop.f32.mrb[93].mxu0 }
 0x1a4   : > { %1768 = vst.msk [vmem:[%s3503_s21 + $0x98] sm:$0xff] %vm1748_vm5, %v1742_v54  ;;  %v1718_v19 = vmax.f32 %v1378_v15, %v1693_v16  ;;  %v1655_v17 = vadd.f32 %v3395_v43, %v1654_v18  ;;  %v2663_v25 = vpop.f32.mrb[93].mxu1 }
 0x1a5   : > { %v1379_v27 = vmax.f32 %v1340_v22, 0.0 }
 0x1a6   : > { %v1743_v51 = vmax.f32 %v3479_v7, %v1718_v19  ;;  %v1694_v0 = vmax.f32 %v1655_v17, 0.0  ;;  %v1344_v58 = vpop.f32.mrb[94].mxu0 }
 0x1a7   : > { %v1659_v28 = vpop.f32.mrb[94].mxu1  ;;  %v1345_v30 = vadd.f32 %v3395_v43, %v1344_v58  ;;  %v2587_v36 = vpop.f32.mrb[95].mxu0 }
 0x1a8   : > { %1769 = vst.msk [vmem:[%s3503_s21 + $0xa0] sm:$0xff] %vm1748_vm5, %v1743_v51  ;;  %v1719_v29 = vmax.f32 %v1379_v27, %v1694_v0  ;;  %v1660_v32 = vadd.f32 %v3395_v43, %v1659_v28  ;;  %v2666_v37 = vpop.f32.mrb[95].mxu1 }
 0x1a9   : > { %v1380_v63 = vmax.f32 %v1345_v30, 0.0 }
 0x1aa   : > { %v1744_v26 = vmax.f32 %v3483_v20, %v1719_v29  ;;  %v1695_v53 = vmax.f32 %v1660_v32, 0.0  ;;  %v1349_v7 = vpop.f32.mrb[96].mxu0 }
 0x1ab   : > { %v1664_v38 = vpop.f32.mrb[96].mxu1  ;;  %v1350_v39 = vadd.f32 %v3395_v43, %v1349_v7  ;;  %v2590_v42 = vpop.f32.mrb[97].mxu0 }
 0x1ac   : > { %1770 = vst.msk [vmem:[%s3503_s21 + $0xa8] sm:$0xff] %vm1748_vm5, %v1744_v26  ;;  %v1720_v11 = vmax.f32 %v1380_v63, %v1695_v53  ;;  %v1665_v40 = vadd.f32 %v3395_v43, %v1664_v38  ;;  %v2669_v44 = vpop.f32.mrb[97].mxu1 }
 0x1ad   : > { %v1381_v49 = vmax.f32 %v1350_v39, 0.0 }
 0x1ae   : > { %v1745_v46 = vmax.f32 %v3487_v33, %v1720_v11  ;;  %v1696_v20 = vmax.f32 %v1665_v40, 0.0  ;;  %v1354_v12 = vpop.f32.mrb[98].mxu0 }
 0x1af   : > { %v1669_v5 = vpop.f32.mrb[98].mxu1  ;;  %v1355_v50 = vadd.f32 %v3395_v43, %v1354_v12  ;;  %v2593_v52 = vpop.f32.mrb[99].mxu0 }
 0x1b0   : > { %1771 = vst.msk [vmem:[%s3503_s21 + $0xb0] sm:$0xff] %vm1748_vm5, %v1745_v46  ;;  %v1721_v35 = vmax.f32 %v1381_v49, %v1696_v20  ;;  %v1670_v21 = vadd.f32 %v3395_v43, %v1669_v5  ;;  %v2672_v55 = vpop.f32.mrb[99].mxu1 }
 0x1b1   : > { %v1382_v56 = vmax.f32 %v1355_v50, 0.0 }
 0x1b2   : > { %v1746_v62 = vmax.f32 %v3491_v48, %v1721_v35  ;;  %v1697_v57 = vmax.f32 %v1670_v21, 0.0  ;;  %1780 = sbr.rel (!%p2939_p4) target bundleno = 506 (0x1fa), region = 48 }
 0x1b4   : > { %1772 = vst.msk [vmem:[%s3503_s21 + $0xb8] sm:$0xff] %vm1748_vm5, %v1746_v62  ;;  %v1722_v33 = vmax.f32 %v1382_v56, %v1697_v57 }
 0x1b6   : > { %v1747_v23 = vmax.f32 %v3496_v60, %v1722_v33 }
 0x1b8   : > { %1773 = vst.msk [vmem:[%s3503_s21 + $0xc0] sm:$0xff] %vm1748_vm5, %v1747_v23 }
 0x1b9   : > { %s3761_s12 = smov (!%p1783_p8, %s1782_s12), 25 }
 0x1ba   : > { %s2236_s17 = sshll.u32 %s3761_s12, 7 }
 0x1bb   : > { %p2239_p9 = scmp.eq.s32.totalorder %s2236_s17, 0 }
 0x1bc   : > { %2783 = sdivrem.u32 (!%p2239_p9), %s3761_s12, 25 }
 0x1bd   : > { %1791 = sbr.rel (%p2239_p9) target bundleno = 506 (0x1fa), region = 52 }
 0x1c5   : > { %s3638_s29 = spop.drf %2783 }
 0x1c6   : > { %p2240_p10 = scmp.le.s32.totalorder %s3638_s29, 0 }
 0x1c7   : > { %s3752_s24 = smov (!%p2240_p10), %s3632_s16  ;;  %s3753_s10 = smov (!%p2240_p10), %s3503_s21 }
 0x1c8   : > { %2061 = sbr.rel (%p2240_p10) target bundleno = 477 (0x1dd), region = 137  ;;  %s3647_s18 = smov (!%p2240_p10), 0  }
 0x1c9   : > { %s3649_s19 = smov (!%p2240_p10), 0  }
 0x1cf LB: >> { %v1903_v43 = vld [vmem:[%s2849_s10] sm:$0xff]  ;;  %v1905_v48 = vld [vmem:[%s2849_s10 + $0x8] sm:$0xff]  ;;  %v1907_v60 = vld [vmem:[%s2849_s10 + $0x10] sm:$0xff]  ;;  %s1953_s20 = sadd.s32 1, %s2853_s18  ;;  %s1897_s19 = sadd.s32 1, %s2857_s19   ;;  %s2857_s19 = sphi %s3649_s19, %s1897_s19   ;;  %s2853_s18 = sphi %s3647_s18, %s3756_s18   ;;  %s2849_s10 = sphi %s3753_s10, %s3755_s10   ;;  %s2845_s24 = sphi %s3752_s24, %s3754_s24  }
 0x1d0   : >> { %1904 = vst [vmem:[%s2845_s24] sm:$0xff] %v1903_v43  ;;  %1906 = vst [vmem:[%s2845_s24 + $0x8] sm:$0xff] %v1905_v48  ;;  %v1909_v59 = vld [vmem:[%s2849_s10 + $0x18] sm:$0xff]  ;;  %v1911_v61 = vld [vmem:[%s2849_s10 + $0x20] sm:$0xff]  ;;  %p1954_p11 = scmp.ge.s32.totalorder %s1953_s20, %s3638_s29  ;;  %p1896_p12 = scmp.ge.s32.totalorder %s1897_s19, %s3638_s29 }
 0x1d1   : >> { %1908 = vst [vmem:[%s2845_s24 + $0x10] sm:$0xff] %v1907_v60  ;;  %v1913_v1 = vld [vmem:[%s2849_s10 + $0x28] sm:$0xff]  ;;  %1910 = vst [vmem:[%s2845_s24 + $0x18] sm:$0xff] %v1909_v59  ;;  %v1915_v45 = vld [vmem:[%s2849_s10 + $0x30] sm:$0xff] }
 0x1d2   : >> { %1912 = vst [vmem:[%s2845_s24 + $0x20] sm:$0xff] %v1911_v61  ;;  %1914 = vst [vmem:[%s2845_s24 + $0x28] sm:$0xff] %v1913_v1  ;;  %v1917_v31 = vld [vmem:[%s2849_s10 + $0x38] sm:$0xff]  ;;  %v1919_v2 = vld [vmem:[%s2849_s10 + $0x40] sm:$0xff]  ;;  %s3763_s20 = smov (%p1954_p11, %s1953_s20), 0 }
 0x1d3   : >> { %1916 = vst [vmem:[%s2845_s24 + $0x30] sm:$0xff] %v1915_v45  ;;  %1918 = vst [vmem:[%s2845_s24 + $0x38] sm:$0xff] %v1917_v31  ;;  %v1921_v3 = vld [vmem:[%s2849_s10 + $0x48] sm:$0xff]  ;;  %v1923_v4 = vld [vmem:[%s2849_s10 + $0x50] sm:$0xff]  ;;  %s1956_s23 = smul.u32 200, %s3763_s20  ;;  %s3756_s18 = smov %s3763_s20 }
 0x1d4   : >> { %1920 = vst [vmem:[%s2845_s24 + $0x40] sm:$0xff] %v1919_v2  ;;  %v1925_v6 = vld [vmem:[%s2849_s10 + $0x58] sm:$0xff]  ;;  %1922 = vst [vmem:[%s2845_s24 + $0x48] sm:$0xff] %v1921_v3  ;;  %v1927_v34 = vld [vmem:[%s2849_s10 + $0x60] sm:$0xff] }
 0x1d5   : >> { %1924 = vst [vmem:[%s2845_s24 + $0x50] sm:$0xff] %v1923_v4  ;;  %1926 = vst [vmem:[%s2845_s24 + $0x58] sm:$0xff] %v1925_v6  ;;  %v1929_v8 = vld [vmem:[%s2849_s10 + $0x68] sm:$0xff]  ;;  %v1931_v9 = vld [vmem:[%s2849_s10 + $0x70] sm:$0xff]  ;;  %s1958_s26 = scalar_lea.vmem %s3503_s21, %s1956_s23 [#allocation2]   ;;  %s1959_s27 = scalar_lea.vmem %s3632_s16, %s1956_s23  }
 0x1d6   : >> { %1928 = vst [vmem:[%s2845_s24 + $0x60] sm:$0xff] %v1927_v34  ;;  %1930 = vst [vmem:[%s2845_s24 + $0x68] sm:$0xff] %v1929_v8  ;;  %v1933_v10 = vld [vmem:[%s2849_s10 + $0x78] sm:$0xff]  ;;  %v1935_v13 = vld [vmem:[%s2849_s10 + $0x80] sm:$0xff]  ;;  %1899 = sbr.rel (!%p1896_p12) target bundleno = 463 (0x1cf), region = 143 }
 0x1d7   : >> { %1932 = vst [vmem:[%s2845_s24 + $0x70] sm:$0xff] %v1931_v9  ;;  %v1937_v14 = vld [vmem:[%s2849_s10 + $0x88] sm:$0xff]  ;;  %1934 = vst [vmem:[%s2845_s24 + $0x78] sm:$0xff] %v1933_v10  ;;  %v1939_v41 = vld [vmem:[%s2849_s10 + $0x90] sm:$0xff] }
 0x1d8   : >> { %1936 = vst [vmem:[%s2845_s24 + $0x80] sm:$0xff] %v1935_v13  ;;  %1938 = vst [vmem:[%s2845_s24 + $0x88] sm:$0xff] %v1937_v14  ;;  %v1941_v54 = vld [vmem:[%s2849_s10 + $0x98] sm:$0xff]  ;;  %v1943_v15 = vld [vmem:[%s2849_s10 + $0xa0] sm:$0xff] }
 0x1d9   : >> { %1940 = vst [vmem:[%s2845_s24 + $0x90] sm:$0xff] %v1939_v41  ;;  %1942 = vst [vmem:[%s2845_s24 + $0x98] sm:$0xff] %v1941_v54  ;;  %v1945_v16 = vld [vmem:[%s2849_s10 + $0xa8] sm:$0xff]  ;;  %v1947_v47 = vld [vmem:[%s2849_s10 + $0xb0] sm:$0xff] }
 0x1da   : >> { %1944 = vst [vmem:[%s2845_s24 + $0xa0] sm:$0xff] %v1943_v15  ;;  %v1949_v18 = vld [vmem:[%s2849_s10 + $0xb8] sm:$0xff]  ;;  %1946 = vst [vmem:[%s2845_s24 + $0xa8] sm:$0xff] %v1945_v16  ;;  %v1951_v19 = vld [vmem:[%s2849_s10 + $0xc0] sm:$0xff]  ;;  %s3755_s10 = smov %s1958_s26 }
 0x1db   : >> { %1948 = vst [vmem:[%s2845_s24 + $0xb0] sm:$0xff] %v1947_v47  ;;  %1950 = vst [vmem:[%s2845_s24 + $0xb8] sm:$0xff] %v1949_v18 }
 0x1dc   : >> { %1952 = vst [vmem:[%s2845_s24 + $0xc0] sm:$0xff] %v1951_v19  ;;  %s3754_s24 = smov %s1959_s27 }
 0x1dd PF: > { %2785 = sdivrem.u32 %s3761_s12, 25 }
 0x1de   : > { %s2241_s30 = smul.u32 200, %s3638_s29 }
 0x1e0   : > { %s1964_s7 = scalar_lea.vmem %s3503_s21, %s2241_s30 [#allocation2]   ;;  %s1966_s8 = scalar_lea.vmem %s3632_s16, %s2241_s30  }
 0x1e6   : > { %s2786_s9 = spop.drf %2785 }
 0x1e7   : > { %p2243_p13 = scmp.le.s32.totalorder %s2786_s9, 0 }
 0x1e8   : > { %s2859_s11 = smov (!%p2243_p13), %s1966_s8   ;;  %s2863_s13 = smov (!%p2243_p13), %s1964_s7  }
 0x1e9   : > { %2075 = sbr.rel (%p2243_p13) target bundleno = 506 (0x1fa), region = 148  ;;  %s2867_s14 = smov (!%p2243_p13), 0  }
 0x1ea   : > { %s2871_s15 = smov (!%p2243_p13), 0  }
 0x1f0 LB: >> { %v1976_v22 = vld [vmem:[%s2865_s13] sm:$0xff]  ;;  %s1978_s17 = sadd.s32 1, %s2869_s14  ;;  %s1970_s15 = sadd.s32 1, %s2873_s15   ;;  %s2873_s15 = sphi %s2871_s15, %s1970_s15   ;;  %s2869_s14 = sphi %s2867_s14, %s2868_s14   ;;  %s2865_s13 = sphi %s2863_s13, %s1983_s13   ;;  %s2861_s11 = sphi %s2859_s11, %s1984_s11  }
 0x1f1   : >> { %1977 = vst [vmem:[%s2861_s11] sm:$0xff] %v1976_v22  ;;  %p1979_p0 = scmp.ge.s32.totalorder %s1978_s17, %s2786_s9  ;;  %p1969_p1 = scmp.ge.s32.totalorder %s1970_s15, %s2786_s9 }
 0x1f3   : >> { %s3765_s17 = smov (%p1979_p0, %s1978_s17), 0  ;;  %1972 = sbr.rel (!%p1969_p1) target bundleno = 496 (0x1f0), region = 154 }
 0x1f4   : >> { %s2244_s21 = sshll.u32 %s3765_s17, 3  ;;  %s2868_s14 = smov %s3765_s17  }
 0x1f5   : >> { %s1983_s13 = scalar_lea.vmem %s1964_s7, %s2244_s21 [#allocation2]   ;;  %s1984_s11 = scalar_lea.vmem %s1966_s8, %s2244_s21  }
 0x1fa PF: > { %p13_p2 = scmp.ge.s32.totalorder %s2929_s25, 4   ;;  %s3757_s21 = smov %s2837_s22 }
 0x1fb   : > { %s3758_s22 = smov %s2937_s28  ;;  %s3759_s23 = smov %s2929_s25 }
 0x1fc   :  { %15 = sbr.rel (!%p13_p2) target bundleno = 2 (0x2), region = 165 }

// kernel: weight_decay_lenet_forward.4
= control target key start
LH: loop header
LB: loop body
LE: loop exit
PB: predicated region body
PF: predicated region fallthrough
CT: control target
= control target key end

     0   :  { %v1268_v0 = vmov 0.0|0.0   ;;  %vm1269_vm0 = vmmov 0   ;;  %v1270_v6 = vmov 0.0   ;;  %vm90_vm1 = vcmask 1045504   ;;  %s1806_s4 = inlined_call_operand.vmem [shape: f32[54,16], index: 4, kind: input, shape index: {}]   ;;  %s1807_s0 = inlined_call_operand.vmem [shape: f32[98,54], index: 0, kind: input, shape index: {}]   ;;  %s1808_s1 = inlined_call_operand.vmem [shape: f32[98,54], index: 1, kind: input, shape index: {}]   ;;  %s1809_s2 = inlined_call_operand.vmem [shape: f32[98,54], index: 2, kind: input, shape index: {}]   ;;  %s1810_s3 = inlined_call_operand.vmem [shape: f32[98,54], index: 3, kind: input, shape index: {}]   ;;  %s1811_s5 = inlined_call_operand.vmem [shape: f32[1,16], index: 5, kind: input, shape index: {}]   ;;  %s1812_s6 = inlined_call_operand.vmem [shape: f32[98,16], index: 6, kind: output, shape index: {}]  }
   0x1   :  { %1229 = vmatprep.subr.bf16.mxu0 %v1268_v0  ;;  %1238 = vmatprep.subr.bf16.mxu1 %v1268_v0  ;;  %v23_v1 = vld [vmem:[%s1806_s4] sm:$0xff]  ;;  %v24_v2 = vld [vmem:[%s1806_s4 + $0x8] sm:$0xff]  ;;  %v25_v3 = vld [vmem:[%s1806_s4 + $0x10] sm:$0xff]  ;;  %vm50_vm2 = vcmask 441344   ;;  %vm861_vm3 = vcmask 130048   ;;  %vm874_vm4 = vcmask 123904  }
   0x2   :  { %v1230_v4 = vpack.c.bf16 %v24_v2, %v23_v1  ;;  %v26_v5 = vld [vmem:[%s1806_s4 + $0x18] sm:$0xff]  ;;  %1031 = vmatprep.mubr.msk.f32.mxu0 %vm1269_vm0, %v1270_v6  ;;  %1084 = vmatprep.mubr.msk.f32.mxu1 %vm1269_vm0, %v1270_v6  ;;  %v27_v8 = vld [vmem:[%s1806_s4 + $0x20] sm:$0xff]  ;;  %v28_v9 = vld [vmem:[%s1806_s4 + $0x28] sm:$0xff] }
   0x3   :  { %v1233_v7 = vpack.c.bf16 %v26_v5, %v25_v3  ;;  %v1236_v10 = vpack.c.bf16 %v28_v9, %v27_v8  ;;  %v29_v11 = vld [vmem:[%s1806_s4 + $0x30] sm:$0x3f]  ;;  %v31_v12 = vld [vmem:[%s1807_s0] sm:$0xff]  ;;  %v32_v14 = vld [vmem:[%s1807_s0 + $0x8] sm:$0xff] }
   0x4   :  { %1231 = vmatpush3.bf16.msra.mxu0 %v1230_v4  ;;  %1240 = vmatpush3.bf16.msra.mxu1 %v1230_v4  ;;  %v237_v13 = vld [vmem:[%s1808_s1] sm:$0xff]  ;;  %v238_v15 = vld [vmem:[%s1808_s1 + $0x8] sm:$0xff]  ;;  %v33_v16 = vld [vmem:[%s1807_s0 + $0x10] sm:$0xff] }
   0x5   :  { %1232 = vmatprep.subr.bf16.mxu0 %v1268_v0  ;;  %1241 = vmatprep.subr.bf16.mxu1 %v1268_v0  ;;  %v239_v17 = vld [vmem:[%s1808_s1 + $0x10] sm:$0xff]  ;;  %v34_v18 = vld [vmem:[%s1807_s0 + $0x18] sm:$0xff]  ;;  %v35_v20 = vld [vmem:[%s1807_s0 + $0x20] sm:$0xff] }
   0x6   :  { %v240_v19 = vld [vmem:[%s1808_s1 + $0x18] sm:$0xff]  ;;  %v241_v21 = vld [vmem:[%s1808_s1 + $0x20] sm:$0xff]  ;;  %v36_v22 = vld [vmem:[%s1807_s0 + $0x28] sm:$0xff] }
   0x7   :  { %v242_v23 = vld [vmem:[%s1808_s1 + $0x28] sm:$0xff]  ;;  %v37_v24 = vld [vmem:[%s1807_s0 + $0x30] sm:$0xff]  ;;  %v38_v26 = vld [vmem:[%s1807_s0 + $0x38] sm:$0xff] }
   0x8   :  { %1234 = vmatpush3.bf16.msra.mxu0 %v1233_v7  ;;  %1243 = vmatpush3.bf16.msra.mxu1 %v1233_v7  ;;  %v243_v25 = vld [vmem:[%s1808_s1 + $0x30] sm:$0xff]  ;;  %v244_v27 = vld [vmem:[%s1808_s1 + $0x38] sm:$0xff]  ;;  %v39_v28 = vld [vmem:[%s1807_s0 + $0x40] sm:$0xff] }
   0x9   :  { %1235 = vmatprep.subr.bf16.mxu0 %v1268_v0  ;;  %1244 = vmatprep.subr.bf16.mxu1 %v1268_v0  ;;  %v245_v29 = vld [vmem:[%s1808_s1 + $0x40] sm:$0xff]  ;;  %v40_v30 = vld [vmem:[%s1807_s0 + $0x48] sm:$0xff]  ;;  %v41_v32 = vld [vmem:[%s1807_s0 + $0x50] sm:$0xff] }
   0xa   :  { %v246_v31 = vld [vmem:[%s1808_s1 + $0x48] sm:$0xff]  ;;  %v247_v33 = vld [vmem:[%s1808_s1 + $0x50] sm:$0xff]  ;;  %v42_v34 = vld [vmem:[%s1807_s0 + $0x58] sm:$0xff] }
   0xb   :  { %v248_v35 = vld [vmem:[%s1808_s1 + $0x58] sm:$0xff]  ;;  %v43_v36 = vld [vmem:[%s1807_s0 + $0x60] sm:$0x3]  ;;  %v446_v40 = vld [vmem:[%s1809_s2 + $0x8] sm:$0xff] }
   0xc   :  { %1237 = vmatpush3.bf16.msra.mxu0 %v1236_v10  ;;  %1246 = vmatpush3.bf16.msra.mxu1 %v1236_v10  ;;  %v249_v37 = vld [vmem:[%s1808_s1 + $0x60] sm:$0x3]  ;;  %v641_v41 = vld [vmem:[%s1810_s3 + $0x8] sm:$0xff]  ;;  %v447_v42 = vld [vmem:[%s1809_s2 + $0x10] sm:$0xff] }
   0xd   :  { %1029 = vmatprep.subr.mxu0 %v1270_v6  ;;  %1082 = vmatprep.subr.mxu1 %v1270_v6  ;;  %v445_v38 = vld [vmem:[%s1809_s2] sm:$0xff]  ;;  %v642_v43 = vld [vmem:[%s1810_s3 + $0x10] sm:$0xff]  ;;  %v448_v44 = vld [vmem:[%s1809_s2 + $0x18] sm:$0xff] }
   0xe   :  { %v640_v39 = vld [vmem:[%s1810_s3] sm:$0xff]  ;;  %v643_v45 = vld [vmem:[%s1810_s3 + $0x18] sm:$0xff]  ;;  %v450_v48 = vld [vmem:[%s1809_s2 + $0x28] sm:$0xff] }
   0xf   :  { %v449_v46 = vld [vmem:[%s1809_s2 + $0x20] sm:$0xff]  ;;  %v645_v49 = vld [vmem:[%s1810_s3 + $0x28] sm:$0xff]  ;;  %v451_v50 = vld [vmem:[%s1809_s2 + $0x30] sm:$0xff] }
  0x10   :  { %1030 = vmatpush3.msk.msra.mxu0 %vm90_vm1, %v29_v11  ;;  %1083 = vmatpush3.msk.msra.mxu1 %vm90_vm1, %v29_v11  ;;  %v644_v47 = vld [vmem:[%s1810_s3 + $0x20] sm:$0xff]  ;;  %v646_v51 = vld [vmem:[%s1810_s3 + $0x30] sm:$0xff]  ;;  %v452_v52 = vld [vmem:[%s1809_s2 + $0x38] sm:$0xff] }
  0x11   :  { %1032 = vmatmul.mubr.msk.f32.vlgmr.msra.gmra.mrb[0].mxu0 %vm50_vm2, %v31_v12  ;;  %1085 = vmatmul.mubr.msk.f32.vlgmr.msra.gmra.mrb[0].mxu1 %vm50_vm2, %v237_v13  ;;  %v647_v53 = vld [vmem:[%s1810_s3 + $0x38] sm:$0xff]  ;;  %v453_v54 = vld [vmem:[%s1809_s2 + $0x40] sm:$0xff]  ;;  %v454_v56 = vld [vmem:[%s1809_s2 + $0x48] sm:$0xff] }
  0x12   :  { %1247 = vmatprep.subr.bf16.mxu0 %v1268_v0  ;;  %1256 = vmatprep.subr.bf16.mxu1 %v1268_v0  ;;  %v648_v55 = vld [vmem:[%s1810_s3 + $0x40] sm:$0xff]  ;;  %v649_v57 = vld [vmem:[%s1810_s3 + $0x48] sm:$0xff]  ;;  %v455_v58 = vld [vmem:[%s1809_s2 + $0x50] sm:$0xff] }
  0x13   :  { %1249 = vmatpush3.bf16.msra.mxu0 %v1230_v4  ;;  %1258 = vmatpush3.bf16.msra.mxu1 %v1230_v4  ;;  %v650_v59 = vld [vmem:[%s1810_s3 + $0x50] sm:$0xff]  ;;  %v456_v60 = vld [vmem:[%s1809_s2 + $0x58] sm:$0xff]  ;;  %v457_v62 = vld [vmem:[%s1809_s2 + $0x60] sm:$0x3] }
  0x14   :  { %1034 = vmatprep.mubr.msk.f32.mxu0 %vm1269_vm0, %v1270_v6  ;;  %1087 = vmatprep.mubr.msk.f32.mxu1 %vm1269_vm0, %v1270_v6  ;;  %v651_v61 = vld [vmem:[%s1810_s3 + $0x58] sm:$0xff]  ;;  %v652_v63 = vld [vmem:[%s1810_s3 + $0x60] sm:$0x3] }
  0x15   :  { %1035 = vmatmul.mubr.msk.f32.gmra.mrb[2].mxu0 %vm50_vm2, %v32_v14  ;;  %1088 = vmatmul.mubr.msk.f32.gmra.mrb[2].mxu1 %vm50_vm2, %v238_v15 }
  0x16   :  { %1037 = vmatprep.mubr.msk.f32.mxu0 %vm1269_vm0, %v1270_v6  ;;  %1090 = vmatprep.mubr.msk.f32.mxu1 %vm1269_vm0, %v1270_v6 }
  0x17   :  { %1250 = vmatprep.subr.bf16.mxu0 %v1268_v0  ;;  %1259 = vmatprep.subr.bf16.mxu1 %v1268_v0 }
  0x18   :  { %1252 = vmatpush3.bf16.msra.mxu0 %v1233_v7  ;;  %1261 = vmatpush3.bf16.msra.mxu1 %v1233_v7 }
  0x19   :  { %1038 = vmatmul.mubr.msk.f32.gmra.mrb[4].mxu0 %vm50_vm2, %v33_v16  ;;  %1091 = vmatmul.mubr.msk.f32.gmra.mrb[4].mxu1 %vm50_vm2, %v239_v17 }
  0x1a   :  { %1040 = vmatprep.mubr.msk.f32.mxu0 %vm1269_vm0, %v1270_v6  ;;  %1093 = vmatprep.mubr.msk.f32.mxu1 %vm1269_vm0, %v1270_v6 }
  0x1b   :  { %1253 = vmatprep.subr.bf16.mxu0 %v1268_v0  ;;  %1262 = vmatprep.subr.bf16.mxu1 %v1268_v0  ;;  %v1662_v0 = vld [vmem:[%s1811_s5] ss:$0 sm:$0xff] }
  0x1c   :  { %1255 = vmatpush3.bf16.msra.mxu0 %v1236_v10  ;;  %1264 = vmatpush3.bf16.msra.mxu1 %v1236_v10 }
  0x1d   :  { %1041 = vmatmul.mubr.msk.f32.gmra.mrb[6].mxu0 %vm50_vm2, %v34_v18  ;;  %1094 = vmatmul.mubr.msk.f32.gmra.mrb[6].mxu1 %vm50_vm2, %v240_v19 }
  0x1e   :  { %1043 = vmatprep.mubr.msk.f32.mxu0 %vm1269_vm0, %v1270_v6  ;;  %1096 = vmatprep.mubr.msk.f32.mxu1 %vm1269_vm0, %v1270_v6 }
  0x1f   :  { %1135 = vmatprep.subr.mxu0 %v1270_v6  ;;  %1188 = vmatprep.subr.mxu1 %v1270_v6 }
  0x20   :  { %1136 = vmatpush3.msk.msra.mxu0 %vm90_vm1, %v29_v11  ;;  %1189 = vmatpush3.msk.msra.mxu1 %vm90_vm1, %v29_v11 }
  0x21   :  { %1044 = vmatmul.mubr.msk.f32.gmra.mrb[8].mxu0 %vm50_vm2, %v35_v20  ;;  %1097 = vmatmul.mubr.msk.f32.gmra.mrb[8].mxu1 %vm50_vm2, %v241_v21 }
  0x22   :  { %1046 = vmatprep.mubr.msk.f32.mxu0 %vm1269_vm0, %v1270_v6  ;;  %1099 = vmatprep.mubr.msk.f32.mxu1 %vm1269_vm0, %v1270_v6 }
  0x25   :  { %1047 = vmatmul.mubr.msk.f32.gmra.mrb[10].mxu0 %vm50_vm2, %v36_v22  ;;  %1100 = vmatmul.mubr.msk.f32.gmra.mrb[10].mxu1 %vm50_vm2, %v242_v23 }
  0x26   :  { %1049 = vmatprep.mubr.msk.f32.mxu0 %vm1269_vm0, %v1270_v6  ;;  %1102 = vmatprep.mubr.msk.f32.mxu1 %vm1269_vm0, %v1270_v6 }
  0x29   :  { %1050 = vmatmul.mubr.msk.f32.gmra.mrb[12].mxu0 %vm50_vm2, %v37_v24  ;;  %1103 = vmatmul.mubr.msk.f32.gmra.mrb[12].mxu1 %vm50_vm2, %v243_v25 }
  0x2a   :  { %1052 = vmatprep.mubr.msk.f32.mxu0 %vm1269_vm0, %v1270_v6  ;;  %1105 = vmatprep.mubr.msk.f32.mxu1 %vm1269_vm0, %v1270_v6 }
  0x2d   :  { %1053 = vmatmul.mubr.msk.f32.gmra.mrb[14].mxu0 %vm50_vm2, %v38_v26  ;;  %1106 = vmatmul.mubr.msk.f32.gmra.mrb[14].mxu1 %vm50_vm2, %v244_v27 }
  0x2e   :  { %1055 = vmatprep.mubr.msk.f32.mxu0 %vm1269_vm0, %v1270_v6  ;;  %1108 = vmatprep.mubr.msk.f32.mxu1 %vm1269_vm0, %v1270_v6 }
  0x31   :  { %1056 = vmatmul.mubr.msk.f32.gmra.mrb[16].mxu0 %vm50_vm2, %v39_v28  ;;  %1109 = vmatmul.mubr.msk.f32.gmra.mrb[16].mxu1 %vm50_vm2, %v245_v29 }
  0x32   :  { %1058 = vmatprep.mubr.msk.f32.mxu0 %vm1269_vm0, %v1270_v6  ;;  %1111 = vmatprep.mubr.msk.f32.mxu1 %vm1269_vm0, %v1270_v6 }
  0x35   :  { %1059 = vmatmul.mubr.msk.f32.gmra.mrb[18].mxu0 %vm50_vm2, %v40_v30  ;;  %1112 = vmatmul.mubr.msk.f32.gmra.mrb[18].mxu1 %vm50_vm2, %v246_v31 }
  0x36   :  { %1061 = vmatprep.mubr.msk.f32.mxu0 %vm1269_vm0, %v1270_v6  ;;  %1114 = vmatprep.mubr.msk.f32.mxu1 %vm1269_vm0, %v1270_v6 }
  0x39   :  { %1062 = vmatmul.mubr.msk.f32.gmra.mrb[20].mxu0 %vm50_vm2, %v41_v32  ;;  %1115 = vmatmul.mubr.msk.f32.gmra.mrb[20].mxu1 %vm50_vm2, %v247_v33 }
  0x3a   :  { %1064 = vmatprep.mubr.msk.f32.mxu0 %vm1269_vm0, %v1270_v6  ;;  %1117 = vmatprep.mubr.msk.f32.mxu1 %vm1269_vm0, %v1270_v6 }
  0x3d   :  { %1065 = vmatmul.mubr.msk.f32.gmra.mrb[22].mxu0 %vm50_vm2, %v42_v34  ;;  %1118 = vmatmul.mubr.msk.f32.gmra.mrb[22].mxu1 %vm50_vm2, %v248_v35 }
  0x3e   :  { %1067 = vmatprep.mubr.msk.f32.mxu0 %vm1269_vm0, %v1270_v6  ;;  %1120 = vmatprep.mubr.msk.f32.mxu1 %vm1269_vm0, %v1270_v6 }
  0x41   :  { %1068 = vmatmul.mubr.msk.f32.gmra.mrb[24].mxu0 %vm50_vm2, %v43_v36  ;;  %1121 = vmatmul.mubr.msk.f32.gmra.mrb[24].mxu1 %vm50_vm2, %v249_v37 }
  0x42   :  { %1137 = vmatprep.mubr.msk.f32.mxu0 %vm1269_vm0, %v1270_v6  ;;  %1190 = vmatprep.mubr.msk.f32.mxu1 %vm1269_vm0, %v1270_v6 }
  0x45   :  { %1138 = vmatmul.mubr.msk.f32.vlgmr.msra.gmra.mrb[26].mxu0 %vm50_vm2, %v445_v38  ;;  %1191 = vmatmul.mubr.msk.f32.vlgmr.msra.gmra.mrb[26].mxu1 %vm50_vm2, %v640_v39 }
  0x46   :  { %1140 = vmatprep.mubr.msk.f32.mxu0 %vm1269_vm0, %v1270_v6  ;;  %1193 = vmatprep.mubr.msk.f32.mxu1 %vm1269_vm0, %v1270_v6 }
  0x49   :  { %1141 = vmatmul.mubr.msk.f32.gmra.mrb[28].mxu0 %vm50_vm2, %v446_v40  ;;  %1194 = vmatmul.mubr.msk.f32.gmra.mrb[28].mxu1 %vm50_vm2, %v641_v41 }
  0x4a   :  { %1143 = vmatprep.mubr.msk.f32.mxu0 %vm1269_vm0, %v1270_v6  ;;  %1196 = vmatprep.mubr.msk.f32.mxu1 %vm1269_vm0, %v1270_v6 }
  0x4d   :  { %1144 = vmatmul.mubr.msk.f32.gmra.mrb[30].mxu0 %vm50_vm2, %v447_v42  ;;  %1197 = vmatmul.mubr.msk.f32.gmra.mrb[30].mxu1 %vm50_vm2, %v642_v43 }
  0x4e   :  { %1146 = vmatprep.mubr.msk.f32.mxu0 %vm1269_vm0, %v1270_v6  ;;  %1199 = vmatprep.mubr.msk.f32.mxu1 %vm1269_vm0, %v1270_v6 }
  0x51   :  { %1147 = vmatmul.mubr.msk.f32.gmra.mrb[32].mxu0 %vm50_vm2, %v448_v44  ;;  %1200 = vmatmul.mubr.msk.f32.gmra.mrb[32].mxu1 %vm50_vm2, %v643_v45 }
  0x52   :  { %1149 = vmatprep.mubr.msk.f32.mxu0 %vm1269_vm0, %v1270_v6  ;;  %1202 = vmatprep.mubr.msk.f32.mxu1 %vm1269_vm0, %v1270_v6 }
  0x55   :  { %1150 = vmatmul.mubr.msk.f32.gmra.mrb[34].mxu0 %vm50_vm2, %v449_v46  ;;  %1203 = vmatmul.mubr.msk.f32.gmra.mrb[34].mxu1 %vm50_vm2, %v644_v47 }
  0x56   :  { %1152 = vmatprep.mubr.msk.f32.mxu0 %vm1269_vm0, %v1270_v6  ;;  %1205 = vmatprep.mubr.msk.f32.mxu1 %vm1269_vm0, %v1270_v6 }
  0x59   :  { %1153 = vmatmul.mubr.msk.f32.gmra.mrb[36].mxu0 %vm50_vm2, %v450_v48  ;;  %1206 = vmatmul.mubr.msk.f32.gmra.mrb[36].mxu1 %vm50_vm2, %v645_v49 }
  0x5a   :  { %1155 = vmatprep.mubr.msk.f32.mxu0 %vm1269_vm0, %v1270_v6  ;;  %1208 = vmatprep.mubr.msk.f32.mxu1 %vm1269_vm0, %v1270_v6 }
  0x5d   :  { %1156 = vmatmul.mubr.msk.f32.gmra.mrb[38].mxu0 %vm50_vm2, %v451_v50  ;;  %1209 = vmatmul.mubr.msk.f32.gmra.mrb[38].mxu1 %vm50_vm2, %v646_v51 }
  0x5e   :  { %1158 = vmatprep.mubr.msk.f32.mxu0 %vm1269_vm0, %v1270_v6  ;;  %1211 = vmatprep.mubr.msk.f32.mxu1 %vm1269_vm0, %v1270_v6 }
  0x61   :  { %1159 = vmatmul.mubr.msk.f32.gmra.mrb[40].mxu0 %vm50_vm2, %v452_v52  ;;  %1212 = vmatmul.mubr.msk.f32.gmra.mrb[40].mxu1 %vm50_vm2, %v647_v53 }
  0x62   :  { %1161 = vmatprep.mubr.msk.f32.mxu0 %vm1269_vm0, %v1270_v6  ;;  %1214 = vmatprep.mubr.msk.f32.mxu1 %vm1269_vm0, %v1270_v6 }
  0x65   :  { %1162 = vmatmul.mubr.msk.f32.gmra.mrb[42].mxu0 %vm50_vm2, %v453_v54  ;;  %1215 = vmatmul.mubr.msk.f32.gmra.mrb[42].mxu1 %vm50_vm2, %v648_v55 }
  0x66   :  { %1164 = vmatprep.mubr.msk.f32.mxu0 %vm1269_vm0, %v1270_v6  ;;  %1217 = vmatprep.mubr.msk.f32.mxu1 %vm1269_vm0, %v1270_v6 }
  0x69   :  { %1165 = vmatmul.mubr.msk.f32.gmra.mrb[44].mxu0 %vm50_vm2, %v454_v56  ;;  %1218 = vmatmul.mubr.msk.f32.gmra.mrb[44].mxu1 %vm50_vm2, %v649_v57 }
  0x6a   :  { %1167 = vmatprep.mubr.msk.f32.mxu0 %vm1269_vm0, %v1270_v6  ;;  %1220 = vmatprep.mubr.msk.f32.mxu1 %vm1269_vm0, %v1270_v6 }
  0x6d   :  { %1168 = vmatmul.mubr.msk.f32.gmra.mrb[46].mxu0 %vm50_vm2, %v455_v58  ;;  %1221 = vmatmul.mubr.msk.f32.gmra.mrb[46].mxu1 %vm50_vm2, %v650_v59 }
  0x6e   :  { %1170 = vmatprep.mubr.msk.f32.mxu0 %vm1269_vm0, %v1270_v6  ;;  %1223 = vmatprep.mubr.msk.f32.mxu1 %vm1269_vm0, %v1270_v6 }
  0x71   :  { %1171 = vmatmul.mubr.msk.f32.gmra.mrb[48].mxu0 %vm50_vm2, %v456_v60  ;;  %1224 = vmatmul.mubr.msk.f32.gmra.mrb[48].mxu1 %vm50_vm2, %v651_v61 }
  0x72   :  { %1173 = vmatprep.mubr.msk.f32.mxu0 %vm1269_vm0, %v1270_v6  ;;  %1226 = vmatprep.mubr.msk.f32.mxu1 %vm1269_vm0, %v1270_v6 }
  0x75   :  { %1174 = vmatmul.mubr.msk.f32.gmra.mrb[50].mxu0 %vm50_vm2, %v457_v62  ;;  %1227 = vmatmul.mubr.msk.f32.gmra.mrb[50].mxu1 %vm50_vm2, %v652_v63 }
  0xe4   :  { %v160_v1 = vpop.f32.mrb[0].mxu0  ;;  %v355_v2 = vpop.f32.mrb[0].mxu1 }
  0xe5   :  { %v161_v3 = vadd.f32 %v1662_v0, %v160_v1  ;;  %v356_v4 = vadd.f32 %v1662_v0, %v355_v2  ;;  %v1033_v5 = vpop.f32.mrb[1].mxu0  ;;  %v1086_v6 = vpop.f32.mrb[1].mxu1 }
  0xe7   :  { %v224_v7 = vmax.f32 %v161_v3, 0.0  ;;  %v419_v8 = vmax.f32 %v356_v4, 0.0 }
  0xe8   :  { %v165_v9 = vpop.f32.mrb[2].mxu0  ;;  %v360_v10 = vpop.f32.mrb[2].mxu1 }
  0xe9   :  { %v1666_v11 = vmax.f32 %v224_v7, %v419_v8  ;;  %v166_v12 = vadd.f32 %v1662_v0, %v165_v9  ;;  %v361_v13 = vadd.f32 %v1662_v0, %v360_v10  ;;  %v1036_v14 = vpop.f32.mrb[3].mxu0  ;;  %v1089_v15 = vpop.f32.mrb[3].mxu1 }
  0xeb   :  { %v225_v16 = vmax.f32 %v166_v12, 0.0  ;;  %v420_v17 = vmax.f32 %v361_v13, 0.0 }
  0xec   :  { %v170_v18 = vpop.f32.mrb[4].mxu0  ;;  %v365_v19 = vpop.f32.mrb[4].mxu1 }
  0xed   :  { %v1670_v20 = vmax.f32 %v225_v16, %v420_v17  ;;  %v171_v21 = vadd.f32 %v1662_v0, %v170_v18  ;;  %v366_v22 = vadd.f32 %v1662_v0, %v365_v19  ;;  %v1039_v23 = vpop.f32.mrb[5].mxu0  ;;  %v1092_v24 = vpop.f32.mrb[5].mxu1 }
  0xef   :  { %v226_v25 = vmax.f32 %v171_v21, 0.0  ;;  %v421_v26 = vmax.f32 %v366_v22, 0.0 }
  0xf0   :  { %v175_v27 = vpop.f32.mrb[6].mxu0  ;;  %v370_v28 = vpop.f32.mrb[6].mxu1 }
  0xf1   :  { %v1674_v29 = vmax.f32 %v226_v25, %v421_v26  ;;  %v176_v30 = vadd.f32 %v1662_v0, %v175_v27  ;;  %v371_v31 = vadd.f32 %v1662_v0, %v370_v28  ;;  %v1042_v32 = vpop.f32.mrb[7].mxu0  ;;  %v1095_v33 = vpop.f32.mrb[7].mxu1 }
  0xf3   :  { %v227_v34 = vmax.f32 %v176_v30, 0.0  ;;  %v422_v35 = vmax.f32 %v371_v31, 0.0 }
  0xf4   :  { %v180_v36 = vpop.f32.mrb[8].mxu0  ;;  %v375_v37 = vpop.f32.mrb[8].mxu1 }
  0xf5   :  { %v1678_v38 = vmax.f32 %v227_v34, %v422_v35  ;;  %v181_v39 = vadd.f32 %v1662_v0, %v180_v36  ;;  %v376_v40 = vadd.f32 %v1662_v0, %v375_v37  ;;  %v1045_v41 = vpop.f32.mrb[9].mxu0  ;;  %v1098_v42 = vpop.f32.mrb[9].mxu1 }
  0xf7   :  { %v228_v43 = vmax.f32 %v181_v39, 0.0  ;;  %v423_v44 = vmax.f32 %v376_v40, 0.0 }
  0xf8   :  { %v185_v45 = vpop.f32.mrb[10].mxu0  ;;  %v380_v46 = vpop.f32.mrb[10].mxu1 }
  0xf9   :  { %v1682_v47 = vmax.f32 %v228_v43, %v423_v44  ;;  %v186_v48 = vadd.f32 %v1662_v0, %v185_v45  ;;  %v381_v49 = vadd.f32 %v1662_v0, %v380_v46  ;;  %v1048_v50 = vpop.f32.mrb[11].mxu0  ;;  %v1101_v51 = vpop.f32.mrb[11].mxu1 }
  0xfb   :  { %v229_v52 = vmax.f32 %v186_v48, 0.0  ;;  %v424_v53 = vmax.f32 %v381_v49, 0.0 }
  0xfc   :  { %v190_v54 = vpop.f32.mrb[12].mxu0  ;;  %v385_v55 = vpop.f32.mrb[12].mxu1 }
  0xfd   :  { %v1686_v56 = vmax.f32 %v229_v52, %v424_v53  ;;  %v191_v57 = vadd.f32 %v1662_v0, %v190_v54  ;;  %v386_v58 = vadd.f32 %v1662_v0, %v385_v55  ;;  %v1051_v59 = vpop.f32.mrb[13].mxu0  ;;  %v1104_v60 = vpop.f32.mrb[13].mxu1 }
  0xff   :  { %v230_v61 = vmax.f32 %v191_v57, 0.0  ;;  %v425_v62 = vmax.f32 %v386_v58, 0.0 }
 0x100   :  { %v195_v63 = vpop.f32.mrb[14].mxu0  ;;  %v390_v1 = vpop.f32.mrb[14].mxu1 }
 0x101   :  { %v1690_v2 = vmax.f32 %v230_v61, %v425_v62  ;;  %v196_v3 = vadd.f32 %v1662_v0, %v195_v63  ;;  %v391_v4 = vadd.f32 %v1662_v0, %v390_v1  ;;  %v1054_v5 = vpop.f32.mrb[15].mxu0  ;;  %v1107_v6 = vpop.f32.mrb[15].mxu1 }
 0x103   :  { %v231_v7 = vmax.f32 %v196_v3, 0.0  ;;  %v426_v8 = vmax.f32 %v391_v4, 0.0 }
 0x104   :  { %v200_v9 = vpop.f32.mrb[16].mxu0  ;;  %v395_v10 = vpop.f32.mrb[16].mxu1 }
 0x105   :  { %v1694_v12 = vmax.f32 %v231_v7, %v426_v8  ;;  %v201_v13 = vadd.f32 %v1662_v0, %v200_v9  ;;  %v396_v14 = vadd.f32 %v1662_v0, %v395_v10  ;;  %v1057_v15 = vpop.f32.mrb[17].mxu0  ;;  %v1110_v16 = vpop.f32.mrb[17].mxu1 }
 0x107   :  { %v232_v17 = vmax.f32 %v201_v13, 0.0  ;;  %v427_v18 = vmax.f32 %v396_v14, 0.0 }
 0x108   :  { %v205_v19 = vpop.f32.mrb[18].mxu0  ;;  %v400_v21 = vpop.f32.mrb[18].mxu1 }
 0x109   :  { %v1698_v22 = vmax.f32 %v232_v17, %v427_v18  ;;  %v206_v23 = vadd.f32 %v1662_v0, %v205_v19  ;;  %v401_v24 = vadd.f32 %v1662_v0, %v400_v21  ;;  %v1060_v25 = vpop.f32.mrb[19].mxu0  ;;  %v1113_v26 = vpop.f32.mrb[19].mxu1 }
 0x10b   :  { %v233_v27 = vmax.f32 %v206_v23, 0.0  ;;  %v428_v28 = vmax.f32 %v401_v24, 0.0 }
 0x10c   :  { %v210_v30 = vpop.f32.mrb[20].mxu0  ;;  %v405_v31 = vpop.f32.mrb[20].mxu1 }
 0x10d   :  { %v1702_v32 = vmax.f32 %v233_v27, %v428_v28  ;;  %v211_v33 = vadd.f32 %v1662_v0, %v210_v30  ;;  %v406_v34 = vadd.f32 %v1662_v0, %v405_v31  ;;  %v1063_v35 = vpop.f32.mrb[21].mxu0  ;;  %v1116_v36 = vpop.f32.mrb[21].mxu1 }
 0x10f   :  { %v234_v37 = vmax.f32 %v211_v33, 0.0  ;;  %v429_v39 = vmax.f32 %v406_v34, 0.0 }
 0x110   :  { %v215_v40 = vpop.f32.mrb[22].mxu0  ;;  %v410_v41 = vpop.f32.mrb[22].mxu1 }
 0x111   :  { %v1706_v42 = vmax.f32 %v234_v37, %v429_v39  ;;  %v216_v43 = vadd.f32 %v1662_v0, %v215_v40  ;;  %v411_v44 = vadd.f32 %v1662_v0, %v410_v41  ;;  %v1066_v45 = vpop.f32.mrb[23].mxu0  ;;  %v1119_v46 = vpop.f32.mrb[23].mxu1 }
 0x113   :  { %v235_v48 = vmax.f32 %v216_v43, 0.0  ;;  %v430_v49 = vmax.f32 %v411_v44, 0.0 }
 0x114   :  { %v220_v50 = vpop.f32.mrb[24].mxu0  ;;  %v415_v51 = vpop.f32.mrb[24].mxu1 }
 0x115   :  { %v1710_v52 = vmax.f32 %v235_v48, %v430_v49  ;;  %v221_v53 = vadd.f32 %v1662_v0, %v220_v50  ;;  %v416_v54 = vadd.f32 %v1662_v0, %v415_v51  ;;  %v1069_v55 = vpop.f32.mrb[25].mxu0  ;;  %v1122_v57 = vpop.f32.mrb[25].mxu1 }
 0x117   :  { %v236_v58 = vmax.f32 %v221_v53, 0.0  ;;  %v431_v59 = vmax.f32 %v416_v54, 0.0 }
 0x118   :  { %v563_v60 = vpop.f32.mrb[26].mxu0  ;;  %v758_v61 = vpop.f32.mrb[26].mxu1 }
 0x119   :  { %v1714_v62 = vmax.f32 %v236_v58, %v431_v59  ;;  %v564_v63 = vadd.f32 %v1662_v0, %v563_v60  ;;  %v759_v1 = vadd.f32 %v1662_v0, %v758_v61  ;;  %v1139_v3 = vpop.f32.mrb[27].mxu0  ;;  %v1192_v4 = vpop.f32.mrb[27].mxu1 }
 0x11b   :  { %v627_v5 = vmax.f32 %v564_v63, 0.0  ;;  %v822_v6 = vmax.f32 %v759_v1, 0.0 }
 0x11c   :  { %v568_v7 = vpop.f32.mrb[28].mxu0  ;;  %v763_v8 = vpop.f32.mrb[28].mxu1 }
 0x11d   :  { %v835_v9 = vmax.f32 %v627_v5, %v822_v6  ;;  %v569_v10 = vadd.f32 %v1662_v0, %v568_v7  ;;  %v764_v13 = vadd.f32 %v1662_v0, %v763_v8  ;;  %v1142_v14 = vpop.f32.mrb[29].mxu0  ;;  %v1195_v15 = vpop.f32.mrb[29].mxu1 }
 0x11f   :  { %v848_v16 = vmax.f32 %v1666_v11, %v835_v9  ;;  %v628_v17 = vmax.f32 %v569_v10, 0.0  ;;  %v823_v18 = vmax.f32 %v764_v13, 0.0 }
 0x120   :  { %v573_v19 = vpop.f32.mrb[30].mxu0  ;;  %v768_v21 = vpop.f32.mrb[30].mxu1 }
 0x121   :  { %862 = vst.msk [vmem:[%s1812_s6] sm:$0xff] %vm861_vm3, %v848_v16  ;;  %v836_v23 = vmax.f32 %v628_v17, %v823_v18  ;;  %v574_v24 = vadd.f32 %v1662_v0, %v573_v19  ;;  %v769_v25 = vadd.f32 %v1662_v0, %v768_v21  ;;  %v1145_v26 = vpop.f32.mrb[31].mxu0  ;;  %v1198_v27 = vpop.f32.mrb[31].mxu1 }
 0x123   :  { %v849_v28 = vmax.f32 %v1670_v20, %v836_v23  ;;  %v629_v30 = vmax.f32 %v574_v24, 0.0  ;;  %v824_v11 = vmax.f32 %v769_v25, 0.0 }
 0x124   :  { %v578_v31 = vpop.f32.mrb[32].mxu0  ;;  %v773_v33 = vpop.f32.mrb[32].mxu1 }
 0x125   :  { %863 = vst.msk [vmem:[%s1812_s6 + $0x8] sm:$0xff] %vm861_vm3, %v849_v28  ;;  %v837_v34 = vmax.f32 %v629_v30, %v824_v11  ;;  %v579_v35 = vadd.f32 %v1662_v0, %v578_v31  ;;  %v774_v36 = vadd.f32 %v1662_v0, %v773_v33  ;;  %v1148_v37 = vpop.f32.mrb[33].mxu0  ;;  %v1201_v39 = vpop.f32.mrb[33].mxu1 }
 0x127   :  { %v850_v40 = vmax.f32 %v1674_v29, %v837_v34  ;;  %v630_v41 = vmax.f32 %v579_v35, 0.0  ;;  %v825_v20 = vmax.f32 %v774_v36, 0.0 }
 0x128   :  { %v583_v43 = vpop.f32.mrb[34].mxu0  ;;  %v778_v44 = vpop.f32.mrb[34].mxu1 }
 0x129   :  { %864 = vst.msk [vmem:[%s1812_s6 + $0x10] sm:$0xff] %vm861_vm3, %v850_v40  ;;  %v838_v45 = vmax.f32 %v630_v41, %v825_v20  ;;  %v584_v46 = vadd.f32 %v1662_v0, %v583_v43  ;;  %v779_v48 = vadd.f32 %v1662_v0, %v778_v44  ;;  %v1151_v49 = vpop.f32.mrb[35].mxu0  ;;  %v1204_v50 = vpop.f32.mrb[35].mxu1 }
 0x12b   :  { %v851_v51 = vmax.f32 %v1678_v38, %v838_v45  ;;  %v631_v53 = vmax.f32 %v584_v46, 0.0  ;;  %v826_v29 = vmax.f32 %v779_v48, 0.0 }
 0x12c   :  { %v588_v54 = vpop.f32.mrb[36].mxu0  ;;  %v783_v55 = vpop.f32.mrb[36].mxu1 }
 0x12d   :  { %865 = vst.msk [vmem:[%s1812_s6 + $0x18] sm:$0xff] %vm861_vm3, %v851_v51  ;;  %v839_v57 = vmax.f32 %v631_v53, %v826_v29  ;;  %v589_v58 = vadd.f32 %v1662_v0, %v588_v54  ;;  %v784_v59 = vadd.f32 %v1662_v0, %v783_v55  ;;  %v1154_v60 = vpop.f32.mrb[37].mxu0  ;;  %v1207_v61 = vpop.f32.mrb[37].mxu1 }
 0x12f   :  { %v852_v63 = vmax.f32 %v1682_v47, %v839_v57  ;;  %v632_v1 = vmax.f32 %v589_v58, 0.0  ;;  %v827_v38 = vmax.f32 %v784_v59, 0.0 }
 0x130   :  { %v593_v3 = vpop.f32.mrb[38].mxu0  ;;  %v788_v4 = vpop.f32.mrb[38].mxu1 }
 0x131   :  { %866 = vst.msk [vmem:[%s1812_s6 + $0x20] sm:$0xff] %vm861_vm3, %v852_v63  ;;  %v840_v5 = vmax.f32 %v632_v1, %v827_v38  ;;  %v594_v6 = vadd.f32 %v1662_v0, %v593_v3  ;;  %v789_v7 = vadd.f32 %v1662_v0, %v788_v4  ;;  %v1157_v8 = vpop.f32.mrb[39].mxu0  ;;  %v1210_v9 = vpop.f32.mrb[39].mxu1 }
 0x133   :  { %v853_v10 = vmax.f32 %v1686_v56, %v840_v5  ;;  %v633_v13 = vmax.f32 %v594_v6, 0.0  ;;  %v828_v47 = vmax.f32 %v789_v7, 0.0 }
 0x134   :  { %v598_v14 = vpop.f32.mrb[40].mxu0  ;;  %v793_v15 = vpop.f32.mrb[40].mxu1 }
 0x135   :  { %867 = vst.msk [vmem:[%s1812_s6 + $0x28] sm:$0xff] %vm861_vm3, %v853_v10  ;;  %v841_v16 = vmax.f32 %v633_v13, %v828_v47  ;;  %v599_v17 = vadd.f32 %v1662_v0, %v598_v14  ;;  %v794_v18 = vadd.f32 %v1662_v0, %v793_v15  ;;  %v1160_v19 = vpop.f32.mrb[41].mxu0  ;;  %v1213_v21 = vpop.f32.mrb[41].mxu1 }
 0x137   :  { %v854_v23 = vmax.f32 %v1690_v2, %v841_v16  ;;  %v634_v24 = vmax.f32 %v599_v17, 0.0  ;;  %v829_v56 = vmax.f32 %v794_v18, 0.0 }
 0x138   :  { %v603_v25 = vpop.f32.mrb[42].mxu0  ;;  %v798_v26 = vpop.f32.mrb[42].mxu1 }
 0x139   :  { %868 = vst.msk [vmem:[%s1812_s6 + $0x30] sm:$0xff] %vm861_vm3, %v854_v23  ;;  %v842_v27 = vmax.f32 %v634_v24, %v829_v56  ;;  %v604_v28 = vadd.f32 %v1662_v0, %v603_v25  ;;  %v799_v30 = vadd.f32 %v1662_v0, %v798_v26  ;;  %v1163_v11 = vpop.f32.mrb[43].mxu0  ;;  %v1216_v31 = vpop.f32.mrb[43].mxu1 }
 0x13b   :  { %v855_v33 = vmax.f32 %v1694_v12, %v842_v27  ;;  %v635_v34 = vmax.f32 %v604_v28, 0.0  ;;  %v830_v2 = vmax.f32 %v799_v30, 0.0 }
 0x13c   :  { %v608_v35 = vpop.f32.mrb[44].mxu0  ;;  %v803_v36 = vpop.f32.mrb[44].mxu1 }
 0x13d   :  { %869 = vst.msk [vmem:[%s1812_s6 + $0x38] sm:$0xff] %vm861_vm3, %v855_v33  ;;  %v843_v37 = vmax.f32 %v635_v34, %v830_v2  ;;  %v609_v39 = vadd.f32 %v1662_v0, %v608_v35  ;;  %v804_v40 = vadd.f32 %v1662_v0, %v803_v36  ;;  %v1166_v41 = vpop.f32.mrb[45].mxu0  ;;  %v1219_v20 = vpop.f32.mrb[45].mxu1 }
 0x13f   :  { %v856_v43 = vmax.f32 %v1698_v22, %v843_v37  ;;  %v636_v44 = vmax.f32 %v609_v39, 0.0  ;;  %v831_v12 = vmax.f32 %v804_v40, 0.0 }
 0x140   :  { %v613_v45 = vpop.f32.mrb[46].mxu0  ;;  %v808_v46 = vpop.f32.mrb[46].mxu1 }
 0x141   :  { %870 = vst.msk [vmem:[%s1812_s6 + $0x40] sm:$0xff] %vm861_vm3, %v856_v43  ;;  %v844_v48 = vmax.f32 %v636_v44, %v831_v12  ;;  %v614_v49 = vadd.f32 %v1662_v0, %v613_v45  ;;  %v809_v50 = vadd.f32 %v1662_v0, %v808_v46  ;;  %v1169_v51 = vpop.f32.mrb[47].mxu0  ;;  %v1222_v53 = vpop.f32.mrb[47].mxu1 }
 0x143   :  { %v857_v29 = vmax.f32 %v1702_v32, %v844_v48  ;;  %v637_v54 = vmax.f32 %v614_v49, 0.0  ;;  %v832_v22 = vmax.f32 %v809_v50, 0.0 }
 0x144   :  { %v618_v55 = vpop.f32.mrb[48].mxu0  ;;  %v813_v57 = vpop.f32.mrb[48].mxu1 }
 0x145   :  { %871 = vst.msk [vmem:[%s1812_s6 + $0x48] sm:$0xff] %vm861_vm3, %v857_v29  ;;  %v845_v58 = vmax.f32 %v637_v54, %v832_v22  ;;  %v619_v59 = vadd.f32 %v1662_v0, %v618_v55  ;;  %v814_v60 = vadd.f32 %v1662_v0, %v813_v57  ;;  %v1172_v61 = vpop.f32.mrb[49].mxu0  ;;  %v1225_v63 = vpop.f32.mrb[49].mxu1 }
 0x147   :  { %v858_v1 = vmax.f32 %v1706_v42, %v845_v58  ;;  %v638_v38 = vmax.f32 %v619_v59, 0.0  ;;  %v833_v32 = vmax.f32 %v814_v60, 0.0 }
 0x148   :  { %v623_v3 = vpop.f32.mrb[50].mxu0  ;;  %v818_v4 = vpop.f32.mrb[50].mxu1 }
 0x149   :  { %872 = vst.msk [vmem:[%s1812_s6 + $0x50] sm:$0xff] %vm861_vm3, %v858_v1  ;;  %v846_v5 = vmax.f32 %v638_v38, %v833_v32  ;;  %v624_v6 = vadd.f32 %v1662_v0, %v623_v3  ;;  %v819_v7 = vadd.f32 %v1662_v0, %v818_v4  ;;  %v1175_v8 = vpop.f32.mrb[51].mxu0  ;;  %v1228_v9 = vpop.f32.mrb[51].mxu1 }
 0x14b   :  { %v859_v10 = vmax.f32 %v1710_v52, %v846_v5  ;;  %v639_v13 = vmax.f32 %v624_v6, 0.0  ;;  %v834_v42 = vmax.f32 %v819_v7, 0.0 }
 0x14d   :  { %873 = vst.msk [vmem:[%s1812_s6 + $0x58] sm:$0xff] %vm861_vm3, %v859_v10  ;;  %v847_v47 = vmax.f32 %v639_v13, %v834_v42 }
 0x14f   :  { %v860_v14 = vmax.f32 %v1714_v62, %v847_v47 }
 0x151   :  { %875 = vst.msk [vmem:[%s1812_s6 + $0x60] sm:$0x3] %vm874_vm4, %v860_v14 }

// kernel: weight_decay_lenet_forward.5
= control target key start
LH: loop header
LB: loop body
LE: loop exit
PB: predicated region body
PF: predicated region fallthrough
CT: control target
= control target key end

     0   :  { %v1042_v43 = vmov 1983009808   ;;  %v140_v45 = vlaneseq  ;;  %s1518_s0 = inlined_call_operand.vmem [shape: f32[2,784], index: 0, kind: input, shape index: {}]   ;;  %s1519_s1 = inlined_call_operand.vmem [shape: f32[784,120], index: 1, kind: input, shape index: {}]   ;;  %s1520_s2 = inlined_call_operand.vmem [shape: f32[1,120], index: 2, kind: input, shape index: {}]   ;;  %s1521_s3 = inlined_call_operand.vmem [shape: f32[120,84], index: 3, kind: input, shape index: {}]   ;;  %s1522_s4 = inlined_call_operand.vmem [shape: f32[1,84], index: 4, kind: input, shape index: {}]   ;;  %s1523_s5 = inlined_call_operand.vmem [shape: f32[84,10], index: 5, kind: input, shape index: {}]   ;;  %s1524_s6 = inlined_call_operand.vmem [shape: f32[1,10], index: 6, kind: input, shape index: {}]   ;;  %s1525_s7 = inlined_call_operand.hbm [shape: f32[2,10], index: 7, kind: output, shape index: {}]  }
   0x1   :  { %v45_v0 = vld [vmem:[%s1519_s1 + $0x80] sm:$0xff]  ;;  %v46_v1 = vld [vmem:[%s1519_s1 + $0x88] sm:$0xff]  ;;  %v47_v11 = vld [vmem:[%s1519_s1 + $0x90] sm:$0xff]  ;;  %v138_v44 = vunpack.c.l.s4 %v1042_v43 }
   0x2   :  { %v29_v2 = vld [vmem:[%s1519_s1] sm:$0xff]  ;;  %v876_v3 = vpack.c.bf16 %v46_v1, %v45_v0  ;;  %v30_v4 = vld [vmem:[%s1519_s1 + $0x8] sm:$0xff]  ;;  %v48_v13 = vld [vmem:[%s1519_s1 + $0x98] sm:$0xff]  ;;  %v141_v60 = vshrl.u32 %v140_v45, 7 }
   0x3   :  { %v77_v5 = vld [vmem:[%s1519_s1 + $0x180] sm:$0xff]  ;;  %v78_v6 = vld [vmem:[%s1519_s1 + $0x188] sm:$0xff]  ;;  %v878_v7 = vpack.c.bf16 %v30_v4, %v29_v2  ;;  %v31_v14 = vld [vmem:[%s1519_s1 + $0x10] sm:$0xff]  ;;  %v880_v16 = vpack.c.bf16 %v48_v13, %v47_v11  ;;  %v139_v59 = vunpack.c.0.s8 %v138_v44 }
   0x4   :  { %v908_v8 = vpack.c.bf16 %v78_v6, %v77_v5  ;;  %v61_v9 = vld [vmem:[%s1519_s1 + $0x100] sm:$0xff]  ;;  %v62_v10 = vld [vmem:[%s1519_s1 + $0x108] sm:$0xff]  ;;  %877 = vmatprep.subr.bf16.mxu0 %v876_v3  ;;  %v32_v15 = vld [vmem:[%s1519_s1 + $0x18] sm:$0xff] }
   0x5   :  { %v910_v12 = vpack.c.bf16 %v62_v10, %v61_v9  ;;  %879 = vmatpush3.bf16.msra.mxu0 %v878_v7  ;;  %v882_v17 = vpack.c.bf16 %v32_v15, %v31_v14  ;;  %v79_v18 = vld [vmem:[%s1519_s1 + $0x190] sm:$0xff]  ;;  %v80_v19 = vld [vmem:[%s1519_s1 + $0x198] sm:$0xff]  ;;  %v49_v23 = vld [vmem:[%s1519_s1 + $0xa0] sm:$0xff]  ;;  %v1231_v10 = vsub.s32 %v139_v59, %v141_v60 }
   0x6   :  { %909 = vmatprep.subr.bf16.mxu1 %v908_v8  ;;  %v63_v20 = vld [vmem:[%s1519_s1 + $0x110] sm:$0xff]  ;;  %v912_v21 = vpack.c.bf16 %v80_v19, %v79_v18  ;;  %v64_v22 = vld [vmem:[%s1519_s1 + $0x118] sm:$0xff]  ;;  %v50_v24 = vld [vmem:[%s1519_s1 + $0xa8] sm:$0xff]  ;;  %881 = vmatprep.subr.bf16.mxu0 %v880_v16 }
   0x7   :  { %911 = vmatpush3.bf16.msra.mxu1 %v910_v12  ;;  %v914_v25 = vpack.c.bf16 %v64_v22, %v63_v20  ;;  %v884_v26 = vpack.c.bf16 %v50_v24, %v49_v23  ;;  %v33_v27 = vld [vmem:[%s1519_s1 + $0x20] sm:$0xff]  ;;  %v34_v28 = vld [vmem:[%s1519_s1 + $0x28] sm:$0xff]  ;;  %v51_v35 = vld [vmem:[%s1519_s1 + $0xb0] sm:$0xff] }
   0x8   :  { %v81_v29 = vld [vmem:[%s1519_s1 + $0x1a0] sm:$0xff]  ;;  %913 = vmatprep.subr.bf16.mxu1 %v912_v21  ;;  %v82_v30 = vld [vmem:[%s1519_s1 + $0x1a8] sm:$0xff]  ;;  %v886_v33 = vpack.c.bf16 %v34_v28, %v33_v27  ;;  %v52_v36 = vld [vmem:[%s1519_s1 + $0xb8] sm:$0xff] }
   0x9   :  { %v65_v31 = vld [vmem:[%s1519_s1 + $0x120] sm:$0xff]  ;;  %v66_v32 = vld [vmem:[%s1519_s1 + $0x128] sm:$0xff]  ;;  %883 = vmatpush3.bf16.msra.mxu0 %v882_v17  ;;  %v916_v34 = vpack.c.bf16 %v82_v30, %v81_v29  ;;  %v35_v37 = vld [vmem:[%s1519_s1 + $0x30] sm:$0xff]  ;;  %v888_v39 = vpack.c.bf16 %v52_v36, %v51_v35 }
   0xa   :  { %885 = vmatprep.subr.bf16.mxu0 %v884_v26  ;;  %v918_v38 = vpack.c.bf16 %v66_v32, %v65_v31  ;;  %v36_v40 = vld [vmem:[%s1519_s1 + $0x38] sm:$0xff]  ;;  %v83_v41 = vld [vmem:[%s1519_s1 + $0x1b0] sm:$0xff]  ;;  %v53_v49 = vld [vmem:[%s1519_s1 + $0xc0] sm:$0xff] }
   0xb   :  { %915 = vmatpush3.bf16.msra.mxu1 %v914_v25  ;;  %v84_v42 = vld [vmem:[%s1519_s1 + $0x1b8] sm:$0xff]  ;;  %v67_v47 = vld [vmem:[%s1519_s1 + $0x130] sm:$0xff]  ;;  %v54_v50 = vld [vmem:[%s1519_s1 + $0xc8] sm:$0xff]  ;;  %v890_v51 = vpack.c.bf16 %v36_v40, %v35_v37 }
   0xc   :  { %917 = vmatprep.subr.bf16.mxu1 %v916_v34  ;;  %v920_v46 = vpack.c.bf16 %v84_v42, %v83_v41  ;;  %v68_v48 = vld [vmem:[%s1519_s1 + $0x138] sm:$0xff]  ;;  %v85_v52 = vld [vmem:[%s1519_s1 + $0x1c0] sm:$0xff]  ;;  %v86_v53 = vld [vmem:[%s1519_s1 + $0x1c8] sm:$0xff]  ;;  %v892_v55 = vpack.c.bf16 %v54_v50, %v53_v49 }
   0xd   :  { %887 = vmatpush3.bf16.msra.mxu0 %v886_v33  ;;  %v922_v54 = vpack.c.bf16 %v68_v48, %v67_v47  ;;  %v37_v56 = vld [vmem:[%s1519_s1 + $0x40] sm:$0xff]  ;;  %v38_v57 = vld [vmem:[%s1519_s1 + $0x48] sm:$0xff]  ;;  %v924_v61 = vpack.c.bf16 %v86_v53, %v85_v52  ;;  %v55_v63 = vld [vmem:[%s1519_s1 + $0xd0] sm:$0xff] }
   0xe   :  { %889 = vmatprep.subr.bf16.mxu0 %v888_v39  ;;  %v69_v58 = vld [vmem:[%s1519_s1 + $0x140] sm:$0xff]  ;;  %v70_v62 = vld [vmem:[%s1519_s1 + $0x148] sm:$0xff]  ;;  %v56_v0 = vld [vmem:[%s1519_s1 + $0xd8] sm:$0xff]  ;;  %v894_v3 = vpack.c.bf16 %v38_v57, %v37_v56 }
   0xf   :  { %919 = vmatpush3.bf16.msra.mxu1 %v918_v38  ;;  %v87_v1 = vld [vmem:[%s1519_s1 + $0x1d0] sm:$0xff]  ;;  %v88_v2 = vld [vmem:[%s1519_s1 + $0x1d8] sm:$0xff]  ;;  %v926_v5 = vpack.c.bf16 %v70_v62, %v69_v58  ;;  %v896_v6 = vpack.c.bf16 %v56_v0, %v55_v63  ;;  %v57_v12 = vld [vmem:[%s1519_s1 + $0xe0] sm:$0xff] }
  0x10   :  { %921 = vmatprep.subr.bf16.mxu1 %v920_v46  ;;  %v39_v4 = vld [vmem:[%s1519_s1 + $0x50] sm:$0xff]  ;;  %v40_v7 = vld [vmem:[%s1519_s1 + $0x58] sm:$0xff]  ;;  %v928_v11 = vpack.c.bf16 %v88_v2, %v87_v1  ;;  %v58_v13 = vld [vmem:[%s1519_s1 + $0xe8] sm:$0xff] }
  0x11   :  { %891 = vmatpush3.bf16.msra.mxu0 %v890_v51  ;;  %v71_v8 = vld [vmem:[%s1519_s1 + $0x150] sm:$0xff]  ;;  %v72_v9 = vld [vmem:[%s1519_s1 + $0x158] sm:$0xff]  ;;  %v89_v14 = vld [vmem:[%s1519_s1 + $0x1e0] sm:$0xff]  ;;  %v898_v16 = vpack.c.bf16 %v40_v7, %v39_v4  ;;  %v900_v19 = vpack.c.bf16 %v58_v13, %v57_v12 }
  0x12   :  { %893 = vmatprep.subr.bf16.mxu0 %v892_v55  ;;  %v90_v15 = vld [vmem:[%s1519_s1 + $0x1e8] sm:$0xff]  ;;  %v930_v17 = vpack.c.bf16 %v72_v9, %v71_v8  ;;  %v27_v18 = vld [vmem:[%s1518_s0] sm:$0xff]  ;;  %v59_v27 = vld [vmem:[%s1519_s1 + $0xf0] sm:$0xff] }
  0x13   :  { %923 = vmatpush3.bf16.msra.mxu1 %v922_v54  ;;  %v41_v20 = vld [vmem:[%s1519_s1 + $0x60] sm:$0xff]  ;;  %v42_v21 = vld [vmem:[%s1519_s1 + $0x68] sm:$0xff]  ;;  %v143_v23 = vrot.slane %v27_v18, %v1231_v10  ;;  %v136_v24 = vcombine.high %v27_v18, %v27_v18  ;;  %v932_v25 = vpack.c.bf16 %v90_v15, %v89_v14  ;;  %v60_v28 = vld [vmem:[%s1519_s1 + $0xf8] sm:$0xff] }
  0x14   :  { %925 = vmatprep.subr.bf16.mxu1 %v924_v61  ;;  %v73_v22 = vld [vmem:[%s1519_s1 + $0x160] sm:$0xff]  ;;  %v74_v26 = vld [vmem:[%s1519_s1 + $0x168] sm:$0xff]  ;;  %v91_v29 = vld [vmem:[%s1519_s1 + $0x1f0] sm:$0xff]  ;;  %v902_v33 = vpack.c.bf16 %v42_v21, %v41_v20  ;;  %v904_v35 = vpack.c.bf16 %v60_v28, %v59_v27 }
  0x15   :  { %895 = vmatpush3.bf16.msra.mxu0 %v894_v3  ;;  %v92_v30 = vld [vmem:[%s1519_s1 + $0x1f8] sm:$0xff]  ;;  %v151_v31 = vcombine.high %v143_v23, %v143_v23  ;;  %v150_v32 = vrot.slane %v136_v24, %v1231_v10  ;;  %v934_v34 = vpack.c.bf16 %v74_v26, %v73_v22  ;;  %v43_v36 = vld [vmem:[%s1519_s1 + $0x70] sm:$0xff]  ;;  %v109_v42 = vld [vmem:[%s1519_s1 + $0x280] sm:$0xff] }
  0x16   :  { %897 = vmatprep.subr.bf16.mxu0 %v896_v6  ;;  %v44_v37 = vld [vmem:[%s1519_s1 + $0x78] sm:$0xff]  ;;  %v75_v38 = vld [vmem:[%s1519_s1 + $0x170] sm:$0xff]  ;;  %v936_v40 = vpack.c.bf16 %v92_v30, %v91_v29  ;;  %v110_v43 = vld [vmem:[%s1519_s1 + $0x288] sm:$0xff] }
  0x17   :  { %927 = vmatpush3.bf16.msra.mxu1 %v926_v5  ;;  %v152_v39 = vcombine.high %v150_v32, %v150_v32  ;;  %242 = vmatprep.mubr.f32.mxu0 %v151_v31  ;;  %v76_v41 = vld [vmem:[%s1519_s1 + $0x178] sm:$0xff]  ;;  %v906_v44 = vpack.c.bf16 %v44_v37, %v43_v36  ;;  %v940_v46 = vpack.c.bf16 %v110_v43, %v109_v42  ;;  %v93_v47 = vld [vmem:[%s1519_s1 + $0x200] sm:$0xff]  ;;  %v94_v48 = vld [vmem:[%s1519_s1 + $0x208] sm:$0xff] }
  0x18   :  { %929 = vmatprep.subr.bf16.mxu1 %v928_v11  ;;  %v938_v45 = vpack.c.bf16 %v76_v41, %v75_v38  ;;  %v111_v49 = vld [vmem:[%s1519_s1 + $0x290] sm:$0xff]  ;;  %v112_v50 = vld [vmem:[%s1519_s1 + $0x298] sm:$0xff]  ;;  %v942_v51 = vpack.c.bf16 %v94_v48, %v93_v47  ;;  %v28_v53 = vld [vmem:[%s1518_s0 + $0x8] sm:$0x3f] }
  0x19   :  { %899 = vmatpush3.bf16.msra.mxu0 %v898_v16  ;;  %312 = vmatprep.mubr.f32.mxu1 %v152_v39  ;;  %v95_v52 = vld [vmem:[%s1519_s1 + $0x210] sm:$0xff]  ;;  %v125_v54 = vld [vmem:[%s1519_s1 + $0x300] sm:$0xff]  ;;  %v944_v55 = vpack.c.bf16 %v112_v50, %v111_v49  ;;  %v96_v56 = vld [vmem:[%s1519_s1 + $0x218] sm:$0xff]  ;;  %v153_v57 = vcombine.high %v28_v53, %v28_v53  ;;  %v1317_v58 = vrot.slane %v28_v53, %v1231_v10 }
  0x1a   :  { %901 = vmatprep.subr.bf16.mxu0 %v900_v19  ;;  %v126_v59 = vld [vmem:[%s1519_s1 + $0x308] sm:$0xff] }
  0x1b   :  { %931 = vmatpush3.bf16.msra.mxu1 %v930_v17 }
  0x1c   :  { %933 = vmatprep.subr.bf16.mxu1 %v932_v25 }
  0x1d   :  { %903 = vmatpush3.bf16.msra.mxu0 %v902_v33 }
  0x1e   :  { %905 = vmatprep.subr.bf16.mxu0 %v904_v35 }
  0x1f   :  { %935 = vmatpush3.bf16.msra.mxu1 %v934_v34 }
  0x20   :  { %937 = vmatprep.subr.bf16.mxu1 %v936_v40 }
  0x21   :  { %907 = vmatpush3.bf16.msra.mxu0 %v906_v44 }
  0x22   :  { %941 = vmatprep.subr.bf16.mxu0 %v940_v46 }
  0x23   :  { %939 = vmatpush3.bf16.msra.mxu1 %v938_v45 }
  0x24   :  { %12 = vsyncpa [#allocation3], 0  ;;  %v113_v60 = vld [vmem:[%s1519_s1 + $0x2a0] sm:$0xff]  ;;  %v114_v61 = vld [vmem:[%s1519_s1 + $0x2a8] sm:$0xff]  ;;  %v1043_v62 = vmov 0.0|0.0   ;;  %v973_v63 = vpack.c.bf16 %v126_v59, %v125_v54  ;;  %243 = vmatmul.mubr.f32.vlgmr.msra.gmra.mrb[0].mxu0 %v143_v23  ;;  %v168_v0 = vcombine.high %v1317_v58, %v1317_v58  ;;  %v946_v1 = vpack.c.bf16 %v96_v56, %v95_v52  ;;  %s1046_s19 = smov [#allocation2]  }
  0x25   :  { %972 = vmatprep.subr.bf16.mxu1 %v1043_v62  ;;  %943 = vmatpush3.bf16.msra.mxu0 %v942_v51  ;;  %v948_v2 = vpack.c.bf16 %v114_v61, %v113_v60  ;;  %v97_v3 = vld [vmem:[%s1519_s1 + $0x220] sm:$0xff]  ;;  %v98_v4 = vld [vmem:[%s1519_s1 + $0x228] sm:$0xff]  ;;  %v167_v5 = vrot.slane %v153_v57, %v1231_v10  ;;  %v115_v6 = vld [vmem:[%s1519_s1 + $0x2b0] sm:$0xff]  ;;  %vm1044_vm0 = vmmov 0   ;;  %v1045_v8 = vmov 0.0   ;;  %s660_s20 = sshll.u32 %s1046_s19, 4  ;;  %s661_s20 = int_to_ptr.vmem [resolvable:$true] %s660_s20 }
  0x26   :  { %313 = vmatmul.mubr.f32.vlgmr.msra.gmra.mrb[0].mxu1 %v150_v32  ;;  %945 = vmatprep.subr.bf16.mxu0 %v944_v55  ;;  %v116_v7 = vld [vmem:[%s1519_s1 + $0x2b8] sm:$0xff]  ;;  %vm175_vm1 = vcmask 130048   ;;  %v950_v9 = vpack.c.bf16 %v98_v4, %v97_v3  ;;  %v99_v11 = vld [vmem:[%s1519_s1 + $0x230] sm:$0xff]  ;;  %v117_v13 = vld [vmem:[%s1519_s1 + $0x2c0] sm:$0xff]  ;;  %vm481_vm2 = vcmask 982016   ;;  %vm578_vm3 = vcmask 1043456   ;;  %p1023_p1 = scmp.lt.s32.totalorder %s661_s20, %s661_s20 }
  0x27   :  { %382 = vmatprep.mubr.f32.mxu0 %v168_v0  ;;  %974 = vmatpush3.bf16.msra.mxu1 %v973_v63  ;;  %v952_v10 = vpack.c.bf16 %v116_v7, %v115_v6  ;;  %v100_v12 = vld [vmem:[%s1519_s1 + $0x238] sm:$0xff]  ;;  %v118_v14 = vld [vmem:[%s1519_s1 + $0x2c8] sm:$0xff]  ;;  %v101_v17 = vld [vmem:[%s1519_s1 + $0x240] sm:$0xff]  ;;  %vm574_vm4 = vcmask 687104   ;;  %vm652_vm5 = vcmask 74752  }
  0x28   :  { %815 = vmatprep.mubr.msk.f32.mxu1 %vm1044_vm0, %v1045_v8  ;;  %975 = vmatprep.subr.bf16.mxu1 %v1043_v62  ;;  %v954_v15 = vpack.c.bf16 %v100_v12, %v99_v11  ;;  %v956_v16 = vpack.c.bf16 %v118_v14, %v117_v13  ;;  %v102_v18 = vld [vmem:[%s1519_s1 + $0x248] sm:$0xff]  ;;  %v119_v19 = vld [vmem:[%s1519_s1 + $0x2d0] sm:$0xff]  ;;  %v120_v20 = vld [vmem:[%s1519_s1 + $0x2d8] sm:$0xff] }
  0x29   :  { %947 = vmatpush3.bf16.msra.mxu0 %v946_v1  ;;  %v958_v21 = vpack.c.bf16 %v102_v18, %v101_v17  ;;  %v960_v22 = vpack.c.bf16 %v120_v20, %v119_v19  ;;  %v103_v23 = vld [vmem:[%s1519_s1 + $0x250] sm:$0xff]  ;;  %v104_v24 = vld [vmem:[%s1519_s1 + $0x258] sm:$0xff]  ;;  %v121_v25 = vld [vmem:[%s1519_s1 + $0x2e0] sm:$0xff] }
  0x2a   :  { %949 = vmatprep.subr.bf16.mxu0 %v948_v2  ;;  %816 = vmatmul.mubr.msk.f32.vlgmr.msra.gmra.mrb[2].mxu1 %vm175_vm1, %v167_v5  ;;  %v122_v26 = vld [vmem:[%s1519_s1 + $0x2e8] sm:$0xff]  ;;  %v962_v27 = vpack.c.bf16 %v104_v24, %v103_v23  ;;  %v105_v29 = vld [vmem:[%s1519_s1 + $0x260] sm:$0xff]  ;;  %v123_v31 = vld [vmem:[%s1519_s1 + $0x2f0] sm:$0xff] }
  0x2b   :  { %848 = vmatprep.mubr.msk.f32.mxu1 %vm1044_vm0, %v1045_v8  ;;  %v964_v28 = vpack.c.bf16 %v122_v26, %v121_v25  ;;  %v106_v30 = vld [vmem:[%s1519_s1 + $0x268] sm:$0xff]  ;;  %v124_v32 = vld [vmem:[%s1519_s1 + $0x2f8] sm:$0xff]  ;;  %v107_v35 = vld [vmem:[%s1519_s1 + $0x270] sm:$0xff] }
  0x2c   :  { %v966_v33 = vpack.c.bf16 %v106_v30, %v105_v29  ;;  %v968_v34 = vpack.c.bf16 %v124_v32, %v123_v31  ;;  %v108_v36 = vld [vmem:[%s1519_s1 + $0x278] sm:$0xff]  ;;  %v459_v38 = vld [vmem:[%s1521_s3] sm:$0xff]  ;;  %v460_v39 = vld [vmem:[%s1521_s3 + $0x8] sm:$0xff] }
  0x2d   :  { %951 = vmatpush3.bf16.msra.mxu0 %v950_v9  ;;  %v970_v37 = vpack.c.bf16 %v108_v36, %v107_v35  ;;  %v461_v40 = vld [vmem:[%s1521_s3 + $0x10] sm:$0xff]  ;;  %v976_v41 = vpack.c.bf16 %v460_v39, %v459_v38  ;;  %v462_v42 = vld [vmem:[%s1521_s3 + $0x18] sm:$0xff]  ;;  %v463_v44 = vld [vmem:[%s1521_s3 + $0x20] sm:$0xff] }
  0x2e   :  { %953 = vmatprep.subr.bf16.mxu0 %v952_v10  ;;  %v979_v43 = vpack.c.bf16 %v462_v42, %v461_v40  ;;  %v464_v45 = vld [vmem:[%s1521_s3 + $0x28] sm:$0xff]  ;;  %v465_v47 = vld [vmem:[%s1521_s3 + $0x30] sm:$0xff]  ;;  %v466_v48 = vld [vmem:[%s1521_s3 + $0x38] sm:$0xff] }
  0x2f   :  { %977 = vmatpush3.bf16.msra.mxu1 %v976_v41  ;;  %v982_v46 = vpack.c.bf16 %v464_v45, %v463_v44  ;;  %v985_v49 = vpack.c.bf16 %v466_v48, %v465_v47  ;;  %v467_v50 = vld [vmem:[%s1521_s3 + $0x40] sm:$0xff]  ;;  %v468_v51 = vld [vmem:[%s1521_s3 + $0x48] sm:$0xff]  ;;  %v469_v53 = vld [vmem:[%s1521_s3 + $0x50] sm:$0xff] }
  0x30   :  { %978 = vmatprep.subr.bf16.mxu1 %v1043_v62  ;;  %v988_v52 = vpack.c.bf16 %v468_v51, %v467_v50  ;;  %v470_v54 = vld [vmem:[%s1521_s3 + $0x58] sm:$0xff]  ;;  %v471_v56 = vld [vmem:[%s1521_s3 + $0x60] sm:$0xff]  ;;  %v472_v57 = vld [vmem:[%s1521_s3 + $0x68] sm:$0xff] }
  0x31   :  { %955 = vmatpush3.bf16.msra.mxu0 %v954_v15  ;;  %v991_v55 = vpack.c.bf16 %v470_v54, %v469_v53  ;;  %v473_v59 = vld [vmem:[%s1521_s3 + $0x70] sm:$0xff]  ;;  %v556_v60 = vld [vmem:[%s1523_s5] sm:$0xff]  ;;  %v557_v61 = vld [vmem:[%s1523_s5 + $0x8] sm:$0xff] }
  0x32   :  { %957 = vmatprep.subr.bf16.mxu0 %v956_v16  ;;  %v558_v63 = vld [vmem:[%s1523_s5 + $0x10] sm:$0xff]  ;;  %v997_v0 = vpack.c.bf16 %v557_v61, %v556_v60  ;;  %v559_v1 = vld [vmem:[%s1523_s5 + $0x18] sm:$0xff]  ;;  %v560_v3 = vld [vmem:[%s1523_s5 + $0x20] sm:$0xff] }
  0x33   :  { %980 = vmatpush3.bf16.msra.mxu1 %v979_v43  ;;  %v1000_v2 = vpack.c.bf16 %v559_v1, %v558_v63  ;;  %v561_v4 = vld [vmem:[%s1523_s5 + $0x28] sm:$0xff]  ;;  %v562_v6 = vld [vmem:[%s1523_s5 + $0x30] sm:$0xff]  ;;  %v563_v7 = vld [vmem:[%s1523_s5 + $0x38] sm:$0xff] }
  0x34   :  { %981 = vmatprep.subr.bf16.mxu1 %v1043_v62  ;;  %v1003_v5 = vpack.c.bf16 %v561_v4, %v560_v3  ;;  %v1006_v9 = vpack.c.bf16 %v563_v7, %v562_v6  ;;  %v668_v11 = vld [vmem:[%s1520_s2] ss:$0 sm:$0xff]  ;;  %v566_v29 = vld [vmem:[%s1523_s5 + $0x50] sm:$0xf] }
  0x35   :  { %959 = vmatpush3.bf16.msra.mxu0 %v958_v21  ;;  %v564_v26 = vld [vmem:[%s1523_s5 + $0x40] sm:$0xff] }
  0x36   :  { %961 = vmatprep.subr.bf16.mxu0 %v960_v22  ;;  %v670_v30 = vld [vmem:[%s1522_s4] ss:$0 sm:$0xff] }
  0x37   :  { %983 = vmatpush3.bf16.msra.mxu1 %v982_v46 }
  0x38   :  { %984 = vmatprep.subr.bf16.mxu1 %v1043_v62 }
  0x39   :  { %963 = vmatpush3.bf16.msra.mxu0 %v962_v27  ;;  %v565_v27 = vld [vmem:[%s1523_s5 + $0x48] sm:$0xff]  ;;  %s1018_s5 = scalar_lea.vmem %s661_s20, 32 }
  0x3a   :  { %965 = vmatprep.subr.bf16.mxu0 %v964_v28  ;;  %v1009_v28 = vpack.c.bf16 %v565_v27, %v564_v26  ;;  %p1019_p0 = scmp.ne.s32.totalorder %s661_s20, %s1018_s5  ;;  %p1024_p2 = scmp.lt.s32.totalorder %s1018_s5, %s1018_s5 }
  0x3b   :  { %986 = vmatpush3.bf16.msra.mxu1 %v985_v49 }
  0x3c   :  { %987 = vmatprep.subr.bf16.mxu1 %v1043_v62  ;;  %p1025_p3 = por %p1024_p2, %p1023_p1 }
  0x3d   :  { %967 = vmatpush3.bf16.msra.mxu0 %v966_v33 }
  0x3e   :  { %969 = vmatprep.subr.bf16.mxu0 %v968_v34  ;;  %p1026_p4 = pnand %p1025_p3, %p1019_p0 }
  0x3f   :  { %989 = vmatpush3.bf16.msra.mxu1 %v988_v52 }
  0x40   :  { %990 = vmatprep.subr.bf16.mxu1 %v1043_v62 }
  0x41   :  { %971 = vmatpush3.bf16.msra.mxu0 %v970_v37 }
  0x42   :  { %996 = vmatprep.subr.bf16.mxu0 %v1043_v62 }
  0x43   :  { %992 = vmatpush3.bf16.msra.mxu1 %v991_v55 }
  0x44   :  { %383 = vmatmul.mubr.f32.vlgmr.msra.gmra.mrb[2].mxu0 %v1317_v58  ;;  %993 = vmatprep.subr.bf16.mxu1 %v1043_v62  ;;  %v994_v58 = vpack.c.bf16 %v472_v57, %v471_v56 }
  0x45   :  { %873 = vmatprep.mubr.msk.f32.mxu0 %vm1044_vm0, %v1045_v8  ;;  %998 = vmatpush3.bf16.msra.mxu0 %v997_v0 }
  0x46   :  { %999 = vmatprep.subr.bf16.mxu0 %v1043_v62 }
  0x47   :  { %995 = vmatpush3.bf16.msra.mxu1 %v994_v58 }
  0x48   :  { %846 = vmatprep.subr.mxu1 %v1045_v8 }
  0x49   :  { %1001 = vmatpush3.bf16.msra.mxu0 %v1000_v2 }
  0x4a   :  { %1002 = vmatprep.subr.bf16.mxu0 %v1043_v62 }
  0x4b   :  { %847 = vmatpush3.msra.mxu1 %v473_v59 }
  0x4d   :  { %1004 = vmatpush3.bf16.msra.mxu0 %v1003_v5 }
  0x4e   :  { %1005 = vmatprep.subr.bf16.mxu0 %v1043_v62 }
  0x51   :  { %1007 = vmatpush3.bf16.msra.mxu0 %v1006_v9 }
  0x52   :  { %1008 = vmatprep.subr.bf16.mxu0 %v1043_v62 }
  0x55   :  { %1010 = vmatpush3.bf16.msra.mxu0 %v1009_v28 }
  0x56   :  { %871 = vmatprep.subr.mxu0 %v1045_v8  ;;  %v672_v8 = vld [vmem:[%s1524_s6] ss:$0 sm:$0xff] }
  0x59   :  { %872 = vmatpush3.msk.msra.mxu0 %vm578_vm3, %v566_v29 }
  0xf7   :  { %v707_v10 = vpop.f32.mrb[0].mxu0 }
  0xf8   :  { %v708_v12 = vpop.f32.mrb[1].mxu0 }
  0xf9   :  { %v742_v13 = vpop.f32.mrb[0].mxu1  ;;  %v709_v14 = vadd.f32 %v708_v12, %v707_v10 }
  0xfa   :  { %v743_v15 = vpop.f32.mrb[1].mxu1 }
  0xfb   :  { %v744_v16 = vadd.f32 %v743_v15, %v742_v13  ;;  %v245_v17 = vadd.f32 %v709_v14, %v668_v11 }
  0xfd   :  { %v315_v18 = vadd.f32 %v744_v16, %v245_v17  ;;  %v454_v19 = vpop.f32.mrb[2].mxu1 }
  0xfe   :  { %v817_v20 = vpop.f32.mrb[3].mxu1 }
 0x117   :  { %v777_v21 = vpop.f32.mrb[2].mxu0 }
 0x118   :  { %v778_v22 = vpop.f32.mrb[3].mxu0 }
 0x119   :  { %v779_v23 = vadd.f32 %v778_v22, %v777_v21 }
 0x11b   :  { %v385_v24 = vadd.f32 %v779_v23, %v315_v18 }
 0x11d   :  { %v455_v25 = vadd.f32 %v454_v19, %v385_v24 }
 0x11f   :  { %v458_v62 = vmax.f32 %v455_v25, 0.0 }
 0x121   :  { %849 = vmatmul.mubr.msk.f32.vlgmr.msra.gmra.mrb[4].mxu1 %vm481_vm2, %v458_v62 }
 0x1f4   :  { %v551_v31 = vpop.f32.mrb[4].mxu1 }
 0x1f5   :  { %v552_v32 = vadd.f32 %v670_v30, %v551_v31  ;;  %v850_v33 = vpop.f32.mrb[5].mxu1 }
 0x1f7   :  { %v555_v34 = vmax.f32 %v552_v32, 0.0 }
 0x1f9   :  { %874 = vmatmul.mubr.msk.f32.vlgmr.msra.gmra.mrb[4].mxu0 %vm574_vm4, %v555_v34 }
 0x2cc   :  { %v648_v35 = vpop.f32.mrb[4].mxu0 }
 0x2cd   :  { %v649_v36 = vadd.f32 %v672_v8, %v648_v35  ;;  %v875_v37 = vpop.f32.mrb[5].mxu0 }
 0x2cf   :  { %653 = vst.msk [vmem:[#allocation2] sm:$0x3] %vm652_vm5, %v649_v36 }
 0x2d0   :  { %1029 = shalt.err (!%p1026_p4)
}
 0x2d1   :  { %s1030_s22 = scalar_lea.hbm %s1525_s7, 32 }
 0x2d2   :  { %p1031_p5 = scmp.ne.s32.totalorder %s1525_s7, %s1030_s22  ;;  %p1034_p6 = scmp.lt.u32.totalorder %s1030_s22, %s1525_s7 }
 0x2d4   :  { %p1036_p7 = pnand %p1034_p6, %p1031_p5 }
 0x2d6   :  { %1039 = shalt.err (!%p1036_p7)
}
 0x2d7   :  { %663 = dma.vmem_to_hbm [thread:$0]  %s661_s20, 32, %s1525_s7, [#allocation3]  }
 0x2d8   :  { %1040 = dma.done.wait [#allocation3], 32  }
 0x2d9   :  { %1041 = vsyncadd [#allocation3], 4294967264 }
 0x2da   :  { %667 = vsyncpa [#allocation3], 1 }

</bundles_post_ra>
